<compile_context>
chip_gen: v7x
topology: tpu7x:2x2x1
jax: 0.10.0
libtpu: 0.0.40
codegen_flags: <defaults>
</compile_context>

<pallas_src>
import math

import numpy as np
import jax
import jax.numpy as jnp
from jax.experimental import pallas as pl
from jax.experimental.pallas import tpu as pltpu

# ---- module constants (consistent with the reference forward) ---------------
D_MODEL = 32
HEAD_NUM = 4
HEAD_DIM = D_MODEL // HEAD_NUM
DIM_FEEDFORWARD = 2048
FEATURE_MAX_LEN = 16
TGT_MAX_LEN = 8
TGT_VOCAB = 16
BATCH = 2
ENCODER_LAYER = 6
DECODER_LAYER = 6
NUM_LAYERS = ENCODER_LAYER + DECODER_LAYER
MEAN = 256.0
STD = 1.0
LN_EPS = 1e-5
NEG_INF = -1e30

ENC_TOK = BATCH * FEATURE_MAX_LEN      # 32 flattened encoder tokens
DEC_TOK = BATCH * TGT_MAX_LEN          # 16 flattened decoder tokens

# ---- per-layer packed-slab row offsets (kernel <-> init contract) -----------
# encoder "narrow" slab (lane width D_MODEL=32), f32
E_PP = 0                               # 4*ENC_TOK = 128 rows: [a;c;b;d] tiled
E_WQ, E_WK, E_WV, E_WO = 128, 160, 192, 224           # 32 rows each (pre-T)
E_BQ, E_BK, E_BV, E_BO = 256, 257, 258, 259
E_LN1G, E_LN1B = 260, 261
E_B2 = 262
E_LN2G, E_LN2B = 263, 264
E_ROWS = 272                           # padded to a multiple of 8

# decoder "narrow" slab
D_PP = 0                               # 4*DEC_TOK = 64 rows
D_BIGW = 64                            # 16 rows: kron(I_B, w_lin)
D_WQ1, D_WK1, D_WV1, D_WO1 = 80, 112, 144, 176
D_WQ2, D_WK2, D_WV2, D_WO2 = 208, 240, 272, 304
D_BQ1, D_BK1, D_BV1, D_BO1 = 336, 337, 338, 339
D_LN1G, D_LN1B = 340, 341
D_BQ2, D_BK2, D_BV2, D_BO2 = 342, 343, 344, 345
D_LN2G, D_LN2B = 346, 347
D_B2 = 348
D_LN3G, D_LN3B = 349, 350
D_ROWS = 352

FFN_ROWS = 2 * D_MODEL + 2             # 66: w1t(0:32), w2(32:64), b1(64), pad(65)


# ----------------------------- in-kernel helpers ------------------------------
def _dot(x, w):
    # x:(M,K) @ w:(K,N) -> (M,N)
    return jax.lax.dot_general(x, w, (((1,), (0,)), ((), ())),
                               preferred_element_type=jnp.float32)


def _dot_t(x, w):
    # x:(M,K) @ w:(N,K)^T -> (M,N)
    return jax.lax.dot_general(x, w, (((1,), (1,)), ((), ())),
                               preferred_element_type=jnp.float32)


def _layernorm(x, g, b):
    mu = jnp.mean(x, axis=-1, keepdims=True)
    var = jnp.mean(jnp.square(x - mu), axis=-1, keepdims=True)
    return (x - mu) * jax.lax.rsqrt(var + LN_EPS) * g + b


def _row(ref, r):
    # (1, D) bias / LN row from a narrow slab ref
    return ref[0, r:r + 1, :]


def _ssan_qk(x, m4, pp4):
    # Fused generateQ / generateK windowed mixing.
    #   m4  = [[kron(I_B,LM), kron(I_B,UM), 0, 0],
    #          [0, 0, kron(I_B,LM), kron(I_B,UM)]]          (2N, 4N)
    #   pp4 = [a; c; b; d] tiled over the batch              (4N, D)
    # Sublane-stacked RHS (no lane-axis concatenation).
    n = x.shape[0]
    x4 = jnp.concatenate([x, x, x, x], axis=0)               # (4N, D)
    qk = _dot(m4, x4 * pp4)                                   # (2N, D)
    return x + qk[0:n, :], x + qk[n:2 * n, :]


def _mha(q_in, k_in, v_in, wqT, bq, wkT, bk, wvT, bv, woT, bo,
         head_mask, add_mask):
    # nn.MultiheadAttention (batch_first=False quirk) on flattened tokens.
    # `add_mask` restricts attention to tokens sharing the same original dim-1
    # index (the reference attends over the *batch* axis).  All 4 head softmaxes
    # are batched by sublane-stacking the scores as (4*Nq, Nk).
    # The 1/sqrt(head_dim) scale is pre-folded into wqT/bq at init.
    nq = q_in.shape[0]
    nk = k_in.shape[0]
    q = _dot(q_in, wqT) + bq
    k = _dot(k_in, wkT) + bk
    v = _dot(v_in, wvT) + bv
    q4 = jnp.concatenate([q, q, q, q], axis=0) * head_mask    # (4Nq, D)
    v4 = jnp.concatenate([v, v, v, v], axis=0) * head_mask    # (4Nk, D)
    s = _dot_t(q4, k) + add_mask                               # (4Nq, Nk)
    s = s - jnp.max(s, axis=-1, keepdims=True)
    p = jnp.exp(s)
    p = p * pl.reciprocal(jnp.sum(p, axis=-1, keepdims=True), approx=True)
    ctx = _dot(p[0:nq, :], v4[0:nk, :])                        # head-h lanes only
    for h in range(1, HEAD_NUM):
        ctx = ctx + _dot(p[h * nq:(h + 1) * nq, :], v4[h * nk:(h + 1) * nk, :])
    return _dot(ctx, woT) + bo


def _ffn(x, ffn_ref, b2):
    # FFN slab (bf16): rows 0:32 = w1^T (lane-dense), 32:64 = w2, 64 = b1.
    w1t = ffn_ref[0, 0:D_MODEL, :]
    w2 = ffn_ref[0, D_MODEL:2 * D_MODEL, :]
    b1 = ffn_ref[0, 2 * D_MODEL:2 * D_MODEL + 1, :].astype(jnp.float32)
    h = jnp.maximum(_dot(x.astype(jnp.bfloat16), w1t) + b1, 0.0)
    return _dot_t(h.astype(jnp.bfloat16), w2) + b2


# ----------------------------- fused full-model kernel ------------------------
def _stack_kernel(x0_ref, y0_ref, hm_e_ref, me_ref, hm_d_ref, md_ref, projT_ref,
                  ew_ref, en_ref, ef_ref, dw_ref, dn_ref, df_ref,
                  logits_ref, enc_carry, dec_carry):
    layer = pl.program_id(0)

    @pl.when(layer == 0)
    def _():
        enc_carry[...] = x0_ref[...]
        dec_carry[...] = y0_ref[...]

    @pl.when(layer < ENCODER_LAYER)
    def _encoder_layer():
        x = enc_carry[...]
        # SSANBlock: x + LN(MultiHeadSSAN(x))
        q2, k2 = _ssan_qk(x, ew_ref[0], en_ref[0, E_PP:E_PP + 4 * ENC_TOK, :])
        attn = _mha(q2, k2, x,
                    en_ref[0, E_WQ:E_WQ + D_MODEL, :], _row(en_ref, E_BQ),
                    en_ref[0, E_WK:E_WK + D_MODEL, :], _row(en_ref, E_BK),
                    en_ref[0, E_WV:E_WV + D_MODEL, :], _row(en_ref, E_BV),
                    en_ref[0, E_WO:E_WO + D_MODEL, :], _row(en_ref, E_BO),
                    hm_e_ref[...], me_ref[...])
        x = x + _layernorm(attn, _row(en_ref, E_LN1G), _row(en_ref, E_LN1B))
        # FeedForwardBlock: x + LN(W2 relu(W1 x + b1) + b2)
        y = _ffn(x, ef_ref, _row(en_ref, E_B2))
        x = x + _layernorm(y, _row(en_ref, E_LN2G), _row(en_ref, E_LN2B))
        enc_carry[...] = x

    @pl.when(layer >= ENCODER_LAYER)
    def _decoder_layer():
        d = dec_carry[...]
        # per-layer Linear on the encoder memory (transpose->Linear->transpose)
        # pre-packed as a block-diagonal matmul on flattened tokens
        encp = _dot(dn_ref[0, D_BIGW:D_BIGW + DEC_TOK, :], enc_carry[...])
        # SSANBlock on the decoder state
        q2, k2 = _ssan_qk(d, dw_ref[0], dn_ref[0, D_PP:D_PP + 4 * DEC_TOK, :])
        attn = _mha(q2, k2, d,
                    dn_ref[0, D_WQ1:D_WQ1 + D_MODEL, :], _row(dn_ref, D_BQ1),
                    dn_ref[0, D_WK1:D_WK1 + D_MODEL, :], _row(dn_ref, D_BK1),
                    dn_ref[0, D_WV1:D_WV1 + D_MODEL, :], _row(dn_ref, D_BV1),
                    dn_ref[0, D_WO1:D_WO1 + D_MODEL, :], _row(dn_ref, D_BO1),
                    hm_d_ref[...], md_ref[...])
        d = d + _layernorm(attn, _row(dn_ref, D_LN1G), _row(dn_ref, D_LN1B))
        # SANBlock(dec, enc', enc')
        attn2 = _mha(d, encp, encp,
                     dn_ref[0, D_WQ2:D_WQ2 + D_MODEL, :], _row(dn_ref, D_BQ2),
                     dn_ref[0, D_WK2:D_WK2 + D_MODEL, :], _row(dn_ref, D_BK2),
                     dn_ref[0, D_WV2:D_WV2 + D_MODEL, :], _row(dn_ref, D_BV2),
                     dn_ref[0, D_WO2:D_WO2 + D_MODEL, :], _row(dn_ref, D_BO2),
                     hm_d_ref[...], md_ref[...])
        d = d + _layernorm(attn2, _row(dn_ref, D_LN2G), _row(dn_ref, D_LN2B))
        # FeedForwardBlock
        y = _ffn(d, df_ref, _row(dn_ref, D_B2))
        d = d + _layernorm(y, _row(dn_ref, D_LN3G), _row(dn_ref, D_LN3B))
        dec_carry[...] = d

    @pl.when(layer == NUM_LAYERS - 1)
    def _final_projection():
        logits_ref[...] = _dot(dec_carry[...], projT_ref[...])


# ----------------------------- forward ----------------------------------------
def ssan_transformer_forward(params, enc_inputs, dec_inputs):
    bsz, src_len, dm = enc_inputs.shape
    tgt_len = dec_inputs.shape[1]
    pos = params['pos_table']
    # PositionalEncoding does an in-place `inputs += pos`, so the reference's
    # `PositionEncoding(x) + x` evaluates to 2*(x + pos).
    # TODO(synk): dropout(p=0.1) is treated as eval-mode identity.
    x0 = (2.0 * (enc_inputs + pos[:src_len])).reshape(bsz * src_len, dm)
    emb = jnp.take(params['emb'], dec_inputs, axis=0)          # (B, T, D)
    y0 = (2.0 * (emb + pos[:tgt_len])).reshape(bsz * tgt_len, dm)

    consts = (x0, y0, params['hm_enc'], params['m4_enc'],
              params['hm_dec'], params['m4_dec'], params['projT'])
    enc_stacked = (params['enc_wide'], params['enc_narrow'], params['enc_ffn'])
    dec_stacked = (params['dec_wide'], params['dec_narrow'], params['dec_ffn'])

    def _const_spec(a):
        return pl.BlockSpec(a.shape, lambda l: (0,) * a.ndim)

    def _enc_spec(a):
        # pinned at the last encoder layer during decoder steps -> no extra DMA
        return pl.BlockSpec((1,) + a.shape[1:],
                            lambda l: (jnp.minimum(l, ENCODER_LAYER - 1), 0, 0))

    def _dec_spec(a):
        # block 0 during encoder steps -> decoder layer-0 weights are already
        # resident in VMEM when the decoder starts
        return pl.BlockSpec((1,) + a.shape[1:],
                            lambda l: (jnp.maximum(l - ENCODER_LAYER, 0), 0, 0))

    grid_spec = pltpu.PrefetchScalarGridSpec(
        num_scalar_prefetch=0,
        grid=(NUM_LAYERS,),
        in_specs=[_const_spec(a) for a in consts]
        + [_enc_spec(a) for a in enc_stacked]
        + [_dec_spec(a) for a in dec_stacked],
        out_specs=pl.BlockSpec((DEC_TOK, TGT_VOCAB), lambda l: (0, 0)),
        scratch_shapes=[pltpu.VMEM((ENC_TOK, D_MODEL), jnp.float32),
                        pltpu.VMEM((DEC_TOK, D_MODEL), jnp.float32)],
    )
    return pl.pallas_call(
        _stack_kernel,
        out_shape=jax.ShapeDtypeStruct((DEC_TOK, TGT_VOCAB), jnp.float32),
        grid_spec=grid_spec,
        compiler_params=pltpu.CompilerParams(
            dimension_semantics=("arbitrary",)),
    )(*consts, *enc_stacked, *dec_stacked)


# ----------------------------- deterministic init + packing -------------------
def _positional_table(max_len):
    tab = np.array(
        [[pos / np.power(10000, 2 * i / D_MODEL) for i in range(D_MODEL)]
         if pos != 0 else np.zeros(D_MODEL) for pos in range(max_len)])
    tab[1:, 0::2] = np.sin(tab[1:, 0::2])
    tab[1:, 1::2] = np.cos(tab[1:, 1::2])
    return jnp.asarray(tab.astype(np.float32))


def _head_mask4(n_tok):
    # (HEAD_NUM*n_tok, D): row block h keeps only lanes of head h
    hm = np.zeros((HEAD_NUM * n_tok, D_MODEL), np.float32)
    for h in range(HEAD_NUM):
        hm[h * n_tok:(h + 1) * n_tok, h * HEAD_DIM:(h + 1) * HEAD_DIM] = 1.0
    return jnp.asarray(hm)


def _same_pos_mask4(batch, seq):
    # additive mask (0 / -1e30), tiled HEAD_NUM x along sublanes: flattened
    # tokens attend only to tokens sharing the same original dim-1 index
    # (reproduces nn.MultiheadAttention batch_first=False over the batch axis).
    pos = np.arange(batch * seq) % seq
    m = np.where(pos[:, None] == pos[None, :], 0.0, NEG_INF).astype(np.float32)
    return jnp.asarray(np.tile(m, (HEAD_NUM, 1)))


def _init_mha_packed(key):
    ks = jax.random.split(key, 4)
    s = 1.0 / math.sqrt(D_MODEL)
    scale = 1.0 / math.sqrt(HEAD_DIM)
    wq = jax.random.normal(ks[0], (D_MODEL, D_MODEL), jnp.float32) * s
    wk = jax.random.normal(ks[1], (D_MODEL, D_MODEL), jnp.float32) * s
    wv = jax.random.normal(ks[2], (D_MODEL, D_MODEL), jnp.float32) * s
    wo = jax.random.normal(ks[3], (D_MODEL, D_MODEL), jnp.float32) * s
    z = jnp.zeros((1, D_MODEL), jnp.float32)
    return dict(wqT=wq.T * scale, wkT=wk.T, wvT=wv.T, woT=wo.T,
                bq=z * scale, bk=z, bv=z, bo=z)


def _init_ssan_packed(key, seq_len):
    # a/c/b/d parameters + static N1/N2 window masks, pre-packed so the kernel
    # does ONE (2N,4N)@(4N,D) matmul for both generateQ and generateK.
    ks = jax.random.split(key, 6)
    a = jax.random.normal(ks[0], (seq_len, D_MODEL), jnp.float32)
    c = jax.random.normal(ks[1], (seq_len, D_MODEL), jnp.float32)
    b = jax.random.normal(ks[2], (seq_len, D_MODEL), jnp.float32)
    d = jax.random.normal(ks[3], (seq_len, D_MODEL), jnp.float32)
    n1 = float(MEAN + STD * jax.random.normal(ks[4], ()))
    n2 = float(MEAN + STD * jax.random.normal(ks[5], ()))
    f1, f2 = math.floor(n1), math.floor(n2)
    idx = np.arange(seq_len)
    diff = idx[:, None] - idx[None, :]                          # t - s
    if f1 > 1:  # reference gates BOTH windows on floor(N1) > 1
        lm = ((diff > 0) & (diff < f1)).astype(np.float32)
        um = ((-diff > 0) & (-diff < f2)).astype(np.float32)
    else:
        lm = np.zeros((seq_len, seq_len), np.float32)
        um = np.zeros((seq_len, seq_len), np.float32)
    eye_b = np.eye(BATCH, dtype=np.float32)
    lm_b = np.kron(eye_b, lm)
    um_b = np.kron(eye_b, um)
    n = BATCH * seq_len
    m4 = np.zeros((2 * n, 4 * n), np.float32)
    m4[0:n, 0:n] = lm_b
    m4[0:n, n:2 * n] = um_b
    m4[n:2 * n, 2 * n:3 * n] = lm_b
    m4[n:2 * n, 3 * n:4 * n] = um_b
    pp4 = jnp.concatenate([jnp.tile(t, (BATCH, 1)) for t in (a, c, b, d)],
                          axis=0)                               # (4N, D)
    return jnp.asarray(m4), pp4


def _init_ffn_slab(key):
    k1, k2 = jax.random.split(key)
    w1 = jax.random.normal(k1, (DIM_FEEDFORWARD, D_MODEL), jnp.float32) \
        / math.sqrt(D_MODEL)
    w2 = jax.random.normal(k2, (D_MODEL, DIM_FEEDFORWARD), jnp.float32) \
        / math.sqrt(DIM_FEEDFORWARD)
    b1 = jnp.zeros((1, DIM_FEEDFORWARD), jnp.float32)
    b2 = jnp.zeros((1, D_MODEL), jnp.float32)
    # lane-dense bf16 slab: w1^T, w2, b1, pad  -> (66, 2048)
    slab = jnp.concatenate(
        [w1.T, w2, b1, jnp.zeros((1, DIM_FEEDFORWARD), jnp.float32)],
        axis=0).astype(jnp.bfloat16)
    return slab, b2


def _pack_encoder_layer(key):
    k1, k2, k3 = jax.random.split(key, 3)
    m4, pp4 = _init_ssan_packed(k1, FEATURE_MAX_LEN)            # (64,128),(128,32)
    mha = _init_mha_packed(k2)
    ffn_slab, b2 = _init_ffn_slab(k3)
    ones = jnp.ones((1, D_MODEL), jnp.float32)
    zeros = jnp.zeros((1, D_MODEL), jnp.float32)
    narrow = jnp.concatenate([
        pp4,                                                    # 0:128
        mha['wqT'], mha['wkT'], mha['wvT'], mha['woT'],         # 128:256
        mha['bq'], mha['bk'], mha['bv'], mha['bo'],             # 256:260
        ones, zeros,                                            # ln1 260,261
        b2,                                                     # 262
        ones, zeros,                                            # ln2 263,264
        jnp.zeros((E_ROWS - 265, D_MODEL), jnp.float32),        # pad -> 272
    ], axis=0)
    return m4, narrow, ffn_slab


def _pack_decoder_layer(key):
    k1, k2, k3, k4, k5 = jax.random.split(key, 5)
    m4, pp4 = _init_ssan_packed(k1, TGT_MAX_LEN)                # (32,64),(64,32)
    mha1 = _init_mha_packed(k2)
    w_lin = jax.random.normal(k3, (TGT_MAX_LEN, FEATURE_MAX_LEN), jnp.float32) \
        / math.sqrt(FEATURE_MAX_LEN)
    bigw = jnp.kron(jnp.eye(BATCH, dtype=jnp.float32), w_lin)   # (16, 32)
    mha2 = _init_mha_packed(k4)
    ffn_slab, b2 = _init_ffn_slab(k5)
    ones = jnp.ones((1, D_MODEL), jnp.float32)
    zeros = jnp.zeros((1, D_MODEL), jnp.float32)
    narrow = jnp.concatenate([
        pp4,                                                    # 0:64
        bigw,                                                   # 64:80
        mha1['wqT'], mha1['wkT'], mha1['wvT'], mha1['woT'],     # 80:208
        mha2['wqT'], mha2['wkT'], mha2['wvT'], mha2['woT'],     # 208:336
        mha1['bq'], mha1['bk'], mha1['bv'], mha1['bo'],         # 336:340
        ones, zeros,                                            # ln1 340,341
        mha2['bq'], mha2['bk'], mha2['bv'], mha2['bo'],         # 342:346
        ones, zeros,                                            # ln2 346,347
        b2,                                                     # 348
        ones, zeros,                                            # ln3 349,350
        jnp.zeros((D_ROWS - 351, D_MODEL), jnp.float32),        # pad -> 352
    ], axis=0)
    return m4, narrow, ffn_slab


def init_params(key):
    keys = jax.random.split(key, ENCODER_LAYER + DECODER_LAYER + 2)
    enc = [_pack_encoder_layer(keys[i]) for i in range(ENCODER_LAYER)]
    dec = [_pack_decoder_layer(keys[ENCODER_LAYER + i])
           for i in range(DECODER_LAYER)]
    emb = jax.random.normal(keys[-2], (TGT_VOCAB, D_MODEL), jnp.float32)
    proj = jax.random.normal(keys[-1], (TGT_VOCAB, D_MODEL), jnp.float32) \
        / math.sqrt(D_MODEL)
    return dict(
        enc_wide=jnp.stack([e[0] for e in enc]),      # (6, 64, 128)   f32
        enc_narrow=jnp.stack([e[1] for e in enc]),    # (6, 272, 32)   f32
        enc_ffn=jnp.stack([e[2] for e in enc]),       # (6, 66, 2048)  bf16
        dec_wide=jnp.stack([d[0] for d in dec]),      # (6, 32, 64)    f32
        dec_narrow=jnp.stack([d[1] for d in dec]),    # (6, 352, 32)   f32
        dec_ffn=jnp.stack([d[2] for d in dec]),       # (6, 66, 2048)  bf16
        emb=emb,
        projT=proj.T,                                 # (32, 16)
        pos_table=_positional_table(64),
        hm_enc=_head_mask4(ENC_TOK),                  # (128, 32)
        m4_enc=_same_pos_mask4(BATCH, FEATURE_MAX_LEN),   # (128, 32)
        hm_dec=_head_mask4(DEC_TOK),                  # (64, 32)
        m4_dec=_same_pos_mask4(BATCH, TGT_MAX_LEN),   # (64, 16)
    )


# ----------------------------- main -------------------------------------------
if __name__ == "__main__":
    key = jax.random.PRNGKey(0)
    kp, ke, kd = jax.random.split(key, 3)
    params = init_params(kp)
    enc_inputs = jax.random.normal(
        ke, (BATCH, FEATURE_MAX_LEN, D_MODEL), jnp.float32)
    dec_inputs = jax.random.randint(
        kd, (BATCH, TGT_MAX_LEN), 0, TGT_VOCAB, jnp.int32)

    fwd = jax.jit(ssan_transformer_forward)
    logits = fwd(params, enc_inputs, dec_inputs)
    jax.block_until_ready(logits)
    assert logits.shape == (BATCH * TGT_MAX_LEN, TGT_VOCAB)
    assert bool(jnp.all(jnp.isfinite(logits)))
    print("KERNEL_OK")
</pallas_src>

<mosaic_0001>
module attributes {stable_mosaic.version = 11 : i64} {
  func.func @_stack_kernel(%arg0: i32, %arg1: memref<32x32xf32, #tpu.memory_space<vmem>>, %arg2: memref<16x32xf32, #tpu.memory_space<vmem>>, %arg3: memref<128x32xf32, #tpu.memory_space<vmem>>, %arg4: memref<128x32xf32, #tpu.memory_space<vmem>>, %arg5: memref<64x32xf32, #tpu.memory_space<vmem>>, %arg6: memref<64x16xf32, #tpu.memory_space<vmem>>, %arg7: memref<32x16xf32, #tpu.memory_space<vmem>>, %arg8: memref<1x64x128xf32, #tpu.memory_space<vmem>>, %arg9: memref<1x272x32xf32, #tpu.memory_space<vmem>>, %arg10: memref<1x66x2048xbf16, #tpu.memory_space<vmem>>, %arg11: memref<1x32x64xf32, #tpu.memory_space<vmem>>, %arg12: memref<1x352x32xf32, #tpu.memory_space<vmem>>, %arg13: memref<1x66x2048xbf16, #tpu.memory_space<vmem>>, %arg14: memref<16x16xf32, #tpu.memory_space<vmem>>, %arg15: memref<32x32xf32, #tpu.memory_space<vmem>>, %arg16: memref<16x32xf32, #tpu.memory_space<vmem>>) attributes {dimension_semantics = [#tpu.dimension_semantics<arbitrary>], iteration_bounds = array<i64: 12>, scalar_prefetch = 0 : i64, scratch_operands = 2 : i64, tpu.core_type = #tpu.core_type<tc>, window_params = [{pipeline_mode = #tpu.pipeline_mode<synchronous>, transform_indices = @transform_0, window_bounds = array<i64: 32, 32>}, {pipeline_mode = #tpu.pipeline_mode<synchronous>, transform_indices = @transform_1, window_bounds = array<i64: 16, 32>}, {pipeline_mode = #tpu.pipeline_mode<synchronous>, transform_indices = @transform_2, window_bounds = array<i64: 128, 32>}, {pipeline_mode = #tpu.pipeline_mode<synchronous>, transform_indices = @transform_3, window_bounds = array<i64: 128, 32>}, {pipeline_mode = #tpu.pipeline_mode<synchronous>, transform_indices = @transform_4, window_bounds = array<i64: 64, 32>}, {pipeline_mode = #tpu.pipeline_mode<synchronous>, transform_indices = @transform_5, window_bounds = array<i64: 64, 16>}, {pipeline_mode = #tpu.pipeline_mode<synchronous>, transform_indices = @transform_6, window_bounds = array<i64: 32, 16>}, {transform_indices = @transform_7, window_bounds = array<i64: 1, 64, 128>}, {transform_indices = @transform_8, window_bounds = array<i64: 1, 272, 32>}, {transform_indices = @transform_9, window_bounds = array<i64: 1, 66, 2048>}, {transform_indices = @transform_10, window_bounds = array<i64: 1, 32, 64>}, {transform_indices = @transform_11, window_bounds = array<i64: 1, 352, 32>}, {transform_indices = @transform_12, window_bounds = array<i64: 1, 66, 2048>}, {pipeline_mode = #tpu.pipeline_mode<synchronous>, transform_indices = @transform_13, window_bounds = array<i64: 16, 16>}]} {
    %c0_i32 = arith.constant 0 : i32
    %0 = arith.cmpi eq, %arg0, %c0_i32 : i32
    %1 = arith.extui %0 : i1 to i32
    %c0_i32_0 = arith.constant 0 : i32
    %2 = arith.cmpi ne, %1, %c0_i32_0 : i32
    scf.if %2 {
      %c0 = arith.constant 0 : index
      %c0_5 = arith.constant 0 : index
      %12 = vector.load %arg1[%c0, %c0_5] : memref<32x32xf32, #tpu.memory_space<vmem>>, vector<32x32xf32>
      %c0_6 = arith.constant 0 : index
      %c0_7 = arith.constant 0 : index
      %13 = vector.load %arg15[%c0_6, %c0_7] : memref<32x32xf32, #tpu.memory_space<vmem>>, vector<32x32xf32>
      tpu.vector_store %arg15[%c0_6, %c0_7], %12 {strides = array<i32>} : memref<32x32xf32, #tpu.memory_space<vmem>>, vector<32x32xf32>,
      %c0_8 = arith.constant 0 : index
      %c0_9 = arith.constant 0 : index
      %14 = vector.load %arg2[%c0_8, %c0_9] : memref<16x32xf32, #tpu.memory_space<vmem>>, vector<16x32xf32>
      %c0_10 = arith.constant 0 : index
      %c0_11 = arith.constant 0 : index
      %15 = vector.load %arg16[%c0_10, %c0_11] : memref<16x32xf32, #tpu.memory_space<vmem>>, vector<16x32xf32>
      tpu.vector_store %arg16[%c0_10, %c0_11], %14 {strides = array<i32>} : memref<16x32xf32, #tpu.memory_space<vmem>>, vector<16x32xf32>,
    } else {
    }
    %c6_i32 = arith.constant 6 : i32
    %3 = arith.cmpi slt, %arg0, %c6_i32 : i32
    %4 = arith.extui %3 : i1 to i32
    %c0_i32_1 = arith.constant 0 : i32
    %5 = arith.cmpi ne, %4, %c0_i32_1 : i32
    scf.if %5 {
      %c0 = arith.constant 0 : index
      %c0_5 = arith.constant 0 : index
      %12 = vector.load %arg15[%c0, %c0_5] : memref<32x32xf32, #tpu.memory_space<vmem>>, vector<32x32xf32>
      %c0_6 = arith.constant 0 : index
      %c0_7 = arith.constant 0 : index
      %c0_8 = arith.constant 0 : index
      %13 = vector.load %arg8[%c0_6, %c0_7, %c0_8] : memref<1x64x128xf32, #tpu.memory_space<vmem>>, vector<1x64x128xf32>
      %14 = vector.shape_cast %13 : vector<1x64x128xf32> to vector<64x128xf32>
      %c0_9 = arith.constant 0 : index
      %c0_10 = arith.constant 0 : index
      %c0_11 = arith.constant 0 : index
      %15 = vector.load %arg9[%c0_9, %c0_10, %c0_11] : memref<1x272x32xf32, #tpu.memory_space<vmem>>, vector<1x128x32xf32>
      %16 = vector.shape_cast %15 : vector<1x128x32xf32> to vector<128x32xf32>
      %17 = tpu.concatenate %12, %12, %12, %12 in 0 : vector<32x32xf32>, vector<32x32xf32>, vector<32x32xf32>, vector<32x32xf32> -> vector<128x32xf32>
      %18 = arith.mulf %17, %16 : vector<128x32xf32>
      %cst = arith.constant dense<0.000000e+00> : vector<64x32xf32>
      %19 = tpu.matmul %14, %18, %cst {dimension_numbers = #tpu.dot_dimension_numbers<[1], [0], [0], [1], [0, 0, 1, 1], [], []>} : vector<64x128xf32>, vector<128x32xf32>, vector<64x32xf32> -> vector<64x32xf32>
      %20 = vector.extract_strided_slice %19 {offsets = [0, 0], sizes = [32, 32], strides = [1, 1]} : vector<64x32xf32> to vector<32x32xf32>
      %21 = arith.addf %12, %20 : vector<32x32xf32>
      %22 = vector.extract_strided_slice %19 {offsets = [32, 0], sizes = [32, 32], strides = [1, 1]} : vector<64x32xf32> to vector<32x32xf32>
      %23 = arith.addf %12, %22 : vector<32x32xf32>
      %c0_12 = arith.constant 0 : index
      %c128 = arith.constant 128 : index
      %c0_13 = arith.constant 0 : index
      %24 = vector.load %arg9[%c0_12, %c128, %c0_13] : memref<1x272x32xf32, #tpu.memory_space<vmem>>, vector<1x32x32xf32>
      %25 = vector.shape_cast %24 : vector<1x32x32xf32> to vector<32x32xf32>
      %c0_14 = arith.constant 0 : index
      %c256 = arith.constant 256 : index
      %c0_15 = arith.constant 0 : index
      %26 = vector.load %arg9[%c0_14, %c256, %c0_15] : memref<1x272x32xf32, #tpu.memory_space<vmem>>, vector<1x1x32xf32>
      %27 = vector.shape_cast %26 : vector<1x1x32xf32> to vector<1x32xf32>
      %c0_16 = arith.constant 0 : index
      %c160 = arith.constant 160 : index
      %c0_17 = arith.constant 0 : index
      %28 = vector.load %arg9[%c0_16, %c160, %c0_17] : memref<1x272x32xf32, #tpu.memory_space<vmem>>, vector<1x32x32xf32>
      %29 = vector.shape_cast %28 : vector<1x32x32xf32> to vector<32x32xf32>
      %c0_18 = arith.constant 0 : index
      %c257 = arith.constant 257 : index
      %c0_19 = arith.constant 0 : index
      %30 = vector.load %arg9[%c0_18, %c257, %c0_19] : memref<1x272x32xf32, #tpu.memory_space<vmem>>, vector<1x1x32xf32>
      %31 = vector.shape_cast %30 : vector<1x1x32xf32> to vector<1x32xf32>
      %c0_20 = arith.constant 0 : index
      %c192 = arith.constant 192 : index
      %c0_21 = arith.constant 0 : index
      %32 = vector.load %arg9[%c0_20, %c192, %c0_21] : memref<1x272x32xf32, #tpu.memory_space<vmem>>, vector<1x32x32xf32>
      %33 = vector.shape_cast %32 : vector<1x32x32xf32> to vector<32x32xf32>
      %c0_22 = arith.constant 0 : index
      %c258 = arith.constant 258 : index
      %c0_23 = arith.constant 0 : index
      %34 = vector.load %arg9[%c0_22, %c258, %c0_23] : memref<1x272x32xf32, #tpu.memory_space<vmem>>, vector<1x1x32xf32>
      %35 = vector.shape_cast %34 : vector<1x1x32xf32> to vector<1x32xf32>
      %c0_24 = arith.constant 0 : index
      %c224 = arith.constant 224 : index
      %c0_25 = arith.constant 0 : index
      %36 = vector.load %arg9[%c0_24, %c224, %c0_25] : memref<1x272x32xf32, #tpu.memory_space<vmem>>, vector<1x32x32xf32>
      %37 = vector.shape_cast %36 : vector<1x32x32xf32> to vector<32x32xf32>
      %c0_26 = arith.constant 0 : index
      %c259 = arith.constant 259 : index
      %c0_27 = arith.constant 0 : index
      %38 = vector.load %arg9[%c0_26, %c259, %c0_27] : memref<1x272x32xf32, #tpu.memory_space<vmem>>, vector<1x1x32xf32>
      %39 = vector.shape_cast %38 : vector<1x1x32xf32> to vector<1x32xf32>
      %c0_28 = arith.constant 0 : index
      %c0_29 = arith.constant 0 : index
      %40 = vector.load %arg3[%c0_28, %c0_29] : memref<128x32xf32, #tpu.memory_space<vmem>>, vector<128x32xf32>
      %c0_30 = arith.constant 0 : index
      %c0_31 = arith.constant 0 : index
      %41 = vector.load %arg4[%c0_30, %c0_31] : memref<128x32xf32, #tpu.memory_space<vmem>>, vector<128x32xf32>
      %cst_32 = arith.constant dense<0.000000e+00> : vector<32x32xf32>
      %42 = tpu.matmul %21, %25, %cst_32 {dimension_numbers = #tpu.dot_dimension_numbers<[1], [0], [0], [1], [0, 0, 1, 1], [], []>} : vector<32x32xf32>, vector<32x32xf32>, vector<32x32xf32> -> vector<32x32xf32>
      %43 = vector.broadcast %27 : vector<1x32xf32> to vector<32x32xf32>
      %44 = arith.addf %42, %43 : vector<32x32xf32>
      %cst_33 = arith.constant dense<0.000000e+00> : vector<32x32xf32>
      %45 = tpu.matmul %23, %29, %cst_33 {dimension_numbers = #tpu.dot_dimension_numbers<[1], [0], [0], [1], [0, 0, 1, 1], [], []>} : vector<32x32xf32>, vector<32x32xf32>, vector<32x32xf32> -> vector<32x32xf32>
      %46 = vector.broadcast %31 : vector<1x32xf32> to vector<32x32xf32>
      %47 = arith.addf %45, %46 : vector<32x32xf32>
      %cst_34 = arith.constant dense<0.000000e+00> : vector<32x32xf32>
      %48 = tpu.matmul %12, %33, %cst_34 {dimension_numbers = #tpu.dot_dimension_numbers<[1], [0], [0], [1], [0, 0, 1, 1], [], []>} : vector<32x32xf32>, vector<32x32xf32>, vector<32x32xf32> -> vector<32x32xf32>
      %49 = vector.broadcast %35 : vector<1x32xf32> to vector<32x32xf32>
      %50 = arith.addf %48, %49 : vector<32x32xf32>
      %51 = tpu.concatenate %44, %44, %44, %44 in 0 : vector<32x32xf32>, vector<32x32xf32>, vector<32x32xf32>, vector<32x32xf32> -> vector<128x32xf32>
      %52 = arith.mulf %51, %40 : vector<128x32xf32>
      %53 = tpu.concatenate %50, %50, %50, %50 in 0 : vector<32x32xf32>, vector<32x32xf32>, vector<32x32xf32>, vector<32x32xf32> -> vector<128x32xf32>
      %54 = arith.mulf %53, %40 : vector<128x32xf32>
      %cst_35 = arith.constant dense<0.000000e+00> : vector<128x32xf32>
      %55 = tpu.matmul %52, %47, %cst_35 {dimension_numbers = #tpu.dot_dimension_numbers<[1], [1], [0], [0], [0, 0, 1, 0], [], []>} : vector<128x32xf32>, vector<32x32xf32>, vector<128x32xf32> -> vector<128x32xf32>
      %56 = arith.addf %55, %41 : vector<128x32xf32>
      %cst_36 = arith.constant dense<0xFF800000> : vector<128xf32>
      %57 = vector.multi_reduction <maximumf>, %56, %cst_36 [1] : vector<128x32xf32> to vector<128xf32>
      %58 = vector.shape_cast %57 : vector<128xf32> to vector<128x1xf32>
      %59 = vector.broadcast %58 : vector<128x1xf32> to vector<128x32xf32>
      %60 = arith.subf %56, %59 : vector<128x32xf32>
      %61 = math.exp %60 : vector<128x32xf32>
      %cst_37 = arith.constant dense<0.000000e+00> : vector<128xf32>
      %62 = vector.multi_reduction <add>, %61, %cst_37 [1] : vector<128x32xf32> to vector<128xf32>
      %63 = vector.shape_cast %62 : vector<128xf32> to vector<128x1xf32>
      %64 = tpu.reciprocal %63 {approx = true} : vector<128x1xf32> -> vector<128x1xf32>
      %65 = vector.broadcast %64 : vector<128x1xf32> to vector<128x32xf32>
      %66 = arith.mulf %61, %65 : vector<128x32xf32>
      %67 = vector.extract_strided_slice %66 {offsets = [0, 0], sizes = [32, 32], strides = [1, 1]} : vector<128x32xf32> to vector<32x32xf32>
      %68 = vector.extract_strided_slice %54 {offsets = [0, 0], sizes = [32, 32], strides = [1, 1]} : vector<128x32xf32> to vector<32x32xf32>
      %cst_38 = arith.constant dense<0.000000e+00> : vector<32x32xf32>
      %69 = tpu.matmul %67, %68, %cst_38 {dimension_numbers = #tpu.dot_dimension_numbers<[1], [0], [0], [1], [0, 0, 1, 1], [], []>} : vector<32x32xf32>, vector<32x32xf32>, vector<32x32xf32> -> vector<32x32xf32>
      %70 = vector.extract_strided_slice %66 {offsets = [32, 0], sizes = [32, 32], strides = [1, 1]} : vector<128x32xf32> to vector<32x32xf32>
      %71 = vector.extract_strided_slice %54 {offsets = [32, 0], sizes = [32, 32], strides = [1, 1]} : vector<128x32xf32> to vector<32x32xf32>
      %cst_39 = arith.constant dense<0.000000e+00> : vector<32x32xf32>
      %72 = tpu.matmul %70, %71, %cst_39 {dimension_numbers = #tpu.dot_dimension_numbers<[1], [0], [0], [1], [0, 0, 1, 1], [], []>} : vector<32x32xf32>, vector<32x32xf32>, vector<32x32xf32> -> vector<32x32xf32>
      %73 = arith.addf %69, %72 : vector<32x32xf32>
      %74 = vector.extract_strided_slice %66 {offsets = [64, 0], sizes = [32, 32], strides = [1, 1]} : vector<128x32xf32> to vector<32x32xf32>
      %75 = vector.extract_strided_slice %54 {offsets = [64, 0], sizes = [32, 32], strides = [1, 1]} : vector<128x32xf32> to vector<32x32xf32>
      %cst_40 = arith.constant dense<0.000000e+00> : vector<32x32xf32>
      %76 = tpu.matmul %74, %75, %cst_40 {dimension_numbers = #tpu.dot_dimension_numbers<[1], [0], [0], [1], [0, 0, 1, 1], [], []>} : vector<32x32xf32>, vector<32x32xf32>, vector<32x32xf32> -> vector<32x32xf32>
      %77 = arith.addf %73, %76 : vector<32x32xf32>
      %78 = vector.extract_strided_slice %66 {offsets = [96, 0], sizes = [32, 32], strides = [1, 1]} : vector<128x32xf32> to vector<32x32xf32>
      %79 = vector.extract_strided_slice %54 {offsets = [96, 0], sizes = [32, 32], strides = [1, 1]} : vector<128x32xf32> to vector<32x32xf32>
      %cst_41 = arith.constant dense<0.000000e+00> : vector<32x32xf32>
      %80 = tpu.matmul %78, %79, %cst_41 {dimension_numbers = #tpu.dot_dimension_numbers<[1], [0], [0], [1], [0, 0, 1, 1], [], []>} : vector<32x32xf32>, vector<32x32xf32>, vector<32x32xf32> -> vector<32x32xf32>
      %81 = arith.addf %77, %80 : vector<32x32xf32>
      %cst_42 = arith.constant dense<0.000000e+00> : vector<32x32xf32>
      %82 = tpu.matmul %81, %37, %cst_42 {dimension_numbers = #tpu.dot_dimension_numbers<[1], [0], [0], [1], [0, 0, 1, 1], [], []>} : vector<32x32xf32>, vector<32x32xf32>, vector<32x32xf32> -> vector<32x32xf32>
      %83 = vector.broadcast %39 : vector<1x32xf32> to vector<32x32xf32>
      %84 = arith.addf %82, %83 : vector<32x32xf32>
      %c0_43 = arith.constant 0 : index
      %c260 = arith.constant 260 : index
      %c0_44 = arith.constant 0 : index
      %85 = vector.load %arg9[%c0_43, %c260, %c0_44] : memref<1x272x32xf32, #tpu.memory_space<vmem>>, vector<1x1x32xf32>
      %86 = vector.shape_cast %85 : vector<1x1x32xf32> to vector<1x32xf32>
      %c0_45 = arith.constant 0 : index
      %c261 = arith.constant 261 : index
      %c0_46 = arith.constant 0 : index
      %87 = vector.load %arg9[%c0_45, %c261, %c0_46] : memref<1x272x32xf32, #tpu.memory_space<vmem>>, vector<1x1x32xf32>
      %88 = vector.shape_cast %87 : vector<1x1x32xf32> to vector<1x32xf32>
      %cst_47 = arith.constant dense<0.000000e+00> : vector<32xf32>
      %89 = vector.multi_reduction <add>, %84, %cst_47 [1] : vector<32x32xf32> to vector<32xf32>
      %90 = vector.shape_cast %89 : vector<32xf32> to vector<32x1xf32>
      %cst_48 = arith.constant 3.200000e+01 : f32
      %91 = vector.broadcast %cst_48 : f32 to vector<32x1xf32>
      %92 = arith.divf %90, %91 : vector<32x1xf32>
      %93 = vector.broadcast %92 : vector<32x1xf32> to vector<32x32xf32>
      %94 = arith.subf %84, %93 : vector<32x32xf32>
      %95 = arith.mulf %94, %94 : vector<32x32xf32>
      %cst_49 = arith.constant dense<0.000000e+00> : vector<32xf32>
      %96 = vector.multi_reduction <add>, %95, %cst_49 [1] : vector<32x32xf32> to vector<32xf32>
      %97 = vector.shape_cast %96 : vector<32xf32> to vector<32x1xf32>
      %cst_50 = arith.constant 3.200000e+01 : f32
      %98 = vector.broadcast %cst_50 : f32 to vector<32x1xf32>
      %99 = arith.divf %97, %98 : vector<32x1xf32>
      %100 = vector.broadcast %92 : vector<32x1xf32> to vector<32x32xf32>
      %101 = arith.subf %84, %100 : vector<32x32xf32>
      %cst_51 = arith.constant 9.99999974E-6 : f32
      %102 = vector.broadcast %cst_51 : f32 to vector<32x1xf32>
      %103 = arith.addf %99, %102 : vector<32x1xf32>
      %104 = math.rsqrt %103 : vector<32x1xf32>
      %105 = vector.broadcast %104 : vector<32x1xf32> to vector<32x32xf32>
      %106 = arith.mulf %101, %105 : vector<32x32xf32>
      %107 = vector.broadcast %86 : vector<1x32xf32> to vector<32x32xf32>
      %108 = arith.mulf %106, %107 : vector<32x32xf32>
      %109 = vector.broadcast %88 : vector<1x32xf32> to vector<32x32xf32>
      %110 = arith.addf %108, %109 : vector<32x32xf32>
      %111 = arith.addf %12, %110 : vector<32x32xf32>
      %c0_52 = arith.constant 0 : index
      %c262 = arith.constant 262 : index
      %c0_53 = arith.constant 0 : index
      %112 = vector.load %arg9[%c0_52, %c262, %c0_53] : memref<1x272x32xf32, #tpu.memory_space<vmem>>, vector<1x1x32xf32>
      %113 = vector.shape_cast %112 : vector<1x1x32xf32> to vector<1x32xf32>
      %c0_54 = arith.constant 0 : index
      %c0_55 = arith.constant 0 : index
      %c0_56 = arith.constant 0 : index
      %114 = vector.load %arg10[%c0_54, %c0_55, %c0_56] : memref<1x66x2048xbf16, #tpu.memory_space<vmem>>, vector<1x32x2048xbf16>
      %115 = vector.shape_cast %114 : vector<1x32x2048xbf16> to vector<32x2048xbf16>
      %c0_57 = arith.constant 0 : index
      %c32 = arith.constant 32 : index
      %c0_58 = arith.constant 0 : index
      %116 = vector.load %arg10[%c0_57, %c32, %c0_58] : memref<1x66x2048xbf16, #tpu.memory_space<vmem>>, vector<1x32x2048xbf16>
      %117 = vector.shape_cast %116 : vector<1x32x2048xbf16> to vector<32x2048xbf16>
      %c0_59 = arith.constant 0 : index
      %c64 = arith.constant 64 : index
      %c0_60 = arith.constant 0 : index
      %118 = vector.load %arg10[%c0_59, %c64, %c0_60] : memref<1x66x2048xbf16, #tpu.memory_space<vmem>>, vector<1x1x2048xbf16>
      %119 = vector.shape_cast %118 : vector<1x1x2048xbf16> to vector<1x2048xbf16>
      %120 = arith.extf %119 : vector<1x2048xbf16> to vector<1x2048xf32>
      %121 = arith.truncf %111 : vector<32x32xf32> to vector<32x32xbf16>
      %cst_61 = arith.constant dense<0.000000e+00> : vector<32x2048xf32>
      %122 = tpu.matmul %121, %115, %cst_61 {dimension_numbers = #tpu.dot_dimension_numbers<[1], [0], [0], [1], [0, 0, 1, 1], [], []>} : vector<32x32xbf16>, vector<32x2048xbf16>, vector<32x2048xf32> -> vector<32x2048xf32>
      %123 = vector.broadcast %120 : vector<1x2048xf32> to vector<32x2048xf32>
      %124 = arith.addf %122, %123 : vector<32x2048xf32>
      %cst_62 = arith.constant 0.000000e+00 : f32
      %125 = vector.broadcast %cst_62 : f32 to vector<32x2048xf32>
      %126 = arith.maximumf %124, %125 : vector<32x2048xf32>
      %127 = arith.truncf %126 : vector<32x2048xf32> to vector<32x2048xbf16>
      %cst_63 = arith.constant dense<0.000000e+00> : vector<32x32xf32>
      %128 = tpu.matmul %127, %117, %cst_63 {dimension_numbers = #tpu.dot_dimension_numbers<[1], [1], [0], [0], [0, 0, 1, 0], [], []>} : vector<32x2048xbf16>, vector<32x2048xbf16>, vector<32x32xf32> -> vector<32x32xf32>
      %129 = vector.broadcast %113 : vector<1x32xf32> to vector<32x32xf32>
      %130 = arith.addf %128, %129 : vector<32x32xf32>
      %c0_64 = arith.constant 0 : index
      %c263 = arith.constant 263 : index
      %c0_65 = arith.constant 0 : index
      %131 = vector.load %arg9[%c0_64, %c263, %c0_65] : memref<1x272x32xf32, #tpu.memory_space<vmem>>, vector<1x1x32xf32>
      %132 = vector.shape_cast %131 : vector<1x1x32xf32> to vector<1x32xf32>
      %c0_66 = arith.constant 0 : index
      %c264 = arith.constant 264 : index
      %c0_67 = arith.constant 0 : index
      %133 = vector.load %arg9[%c0_66, %c264, %c0_67] : memref<1x272x32xf32, #tpu.memory_space<vmem>>, vector<1x1x32xf32>
      %134 = vector.shape_cast %133 : vector<1x1x32xf32> to vector<1x32xf32>
      %cst_68 = arith.constant dense<0.000000e+00> : vector<32xf32>
      %135 = vector.multi_reduction <add>, %130, %cst_68 [1] : vector<32x32xf32> to vector<32xf32>
      %136 = vector.shape_cast %135 : vector<32xf32> to vector<32x1xf32>
      %cst_69 = arith.constant 3.200000e+01 : f32
      %137 = vector.broadcast %cst_69 : f32 to vector<32x1xf32>
      %138 = arith.divf %136, %137 : vector<32x1xf32>
      %139 = vector.broadcast %138 : vector<32x1xf32> to vector<32x32xf32>
      %140 = arith.subf %130, %139 : vector<32x32xf32>
      %141 = arith.mulf %140, %140 : vector<32x32xf32>
      %cst_70 = arith.constant dense<0.000000e+00> : vector<32xf32>
      %142 = vector.multi_reduction <add>, %141, %cst_70 [1] : vector<32x32xf32> to vector<32xf32>
      %143 = vector.shape_cast %142 : vector<32xf32> to vector<32x1xf32>
      %cst_71 = arith.constant 3.200000e+01 : f32
      %144 = vector.broadcast %cst_71 : f32 to vector<32x1xf32>
      %145 = arith.divf %143, %144 : vector<32x1xf32>
      %146 = vector.broadcast %138 : vector<32x1xf32> to vector<32x32xf32>
      %147 = arith.subf %130, %146 : vector<32x32xf32>
      %cst_72 = arith.constant 9.99999974E-6 : f32
      %148 = vector.broadcast %cst_72 : f32 to vector<32x1xf32>
      %149 = arith.addf %145, %148 : vector<32x1xf32>
      %150 = math.rsqrt %149 : vector<32x1xf32>
      %151 = vector.broadcast %150 : vector<32x1xf32> to vector<32x32xf32>
      %152 = arith.mulf %147, %151 : vector<32x32xf32>
      %153 = vector.broadcast %132 : vector<1x32xf32> to vector<32x32xf32>
      %154 = arith.mulf %152, %153 : vector<32x32xf32>
      %155 = vector.broadcast %134 : vector<1x32xf32> to vector<32x32xf32>
      %156 = arith.addf %154, %155 : vector<32x32xf32>
      %157 = arith.addf %111, %156 : vector<32x32xf32>
      %c0_73 = arith.constant 0 : index
      %c0_74 = arith.constant 0 : index
      %158 = vector.load %arg15[%c0_73, %c0_74] : memref<32x32xf32, #tpu.memory_space<vmem>>, vector<32x32xf32>
      tpu.vector_store %arg15[%c0_73, %c0_74], %157 {strides = array<i32>} : memref<32x32xf32, #tpu.memory_space<vmem>>, vector<32x32xf32>,
    } else {
    }
    %c6_i32_2 = arith.constant 6 : i32
    %6 = arith.cmpi sge, %arg0, %c6_i32_2 : i32
    %7 = arith.extui %6 : i1 to i32
    %c0_i32_3 = arith.constant 0 : i32
    %8 = arith.cmpi ne, %7, %c0_i32_3 : i32
    scf.if %8 {
      %c0 = arith.constant 0 : index
      %c0_5 = arith.constant 0 : index
      %12 = vector.load %arg16[%c0, %c0_5] : memref<16x32xf32, #tpu.memory_space<vmem>>, vector<16x32xf32>
      %c0_6 = arith.constant 0 : index
      %c64 = arith.constant 64 : index
      %c0_7 = arith.constant 0 : index
      %13 = vector.load %arg12[%c0_6, %c64, %c0_7] : memref<1x352x32xf32, #tpu.memory_space<vmem>>, vector<1x16x32xf32>
      %14 = vector.shape_cast %13 : vector<1x16x32xf32> to vector<16x32xf32>
      %c0_8 = arith.constant 0 : index
      %c0_9 = arith.constant 0 : index
      %15 = vector.load %arg15[%c0_8, %c0_9] : memref<32x32xf32, #tpu.memory_space<vmem>>, vector<32x32xf32>
      %cst = arith.constant dense<0.000000e+00> : vector<16x32xf32>
      %16 = tpu.matmul %14, %15, %cst {dimension_numbers = #tpu.dot_dimension_numbers<[1], [0], [0], [1], [0, 0, 1, 1], [], []>} : vector<16x32xf32>, vector<32x32xf32>, vector<16x32xf32> -> vector<16x32xf32>
      %c0_10 = arith.constant 0 : index
      %c0_11 = arith.constant 0 : index
      %c0_12 = arith.constant 0 : index
      %17 = vector.load %arg11[%c0_10, %c0_11, %c0_12] : memref<1x32x64xf32, #tpu.memory_space<vmem>>, vector<1x32x64xf32>
      %18 = vector.shape_cast %17 : vector<1x32x64xf32> to vector<32x64xf32>
      %c0_13 = arith.constant 0 : index
      %c0_14 = arith.constant 0 : index
      %c0_15 = arith.constant 0 : index
      %19 = vector.load %arg12[%c0_13, %c0_14, %c0_15] : memref<1x352x32xf32, #tpu.memory_space<vmem>>, vector<1x64x32xf32>
      %20 = vector.shape_cast %19 : vector<1x64x32xf32> to vector<64x32xf32>
      %21 = tpu.concatenate %12, %12, %12, %12 in 0 : vector<16x32xf32>, vector<16x32xf32>, vector<16x32xf32>, vector<16x32xf32> -> vector<64x32xf32>
      %22 = arith.mulf %21, %20 : vector<64x32xf32>
      %cst_16 = arith.constant dense<0.000000e+00> : vector<32x32xf32>
      %23 = tpu.matmul %18, %22, %cst_16 {dimension_numbers = #tpu.dot_dimension_numbers<[1], [0], [0], [1], [0, 0, 1, 1], [], []>} : vector<32x64xf32>, vector<64x32xf32>, vector<32x32xf32> -> vector<32x32xf32>
      %24 = vector.extract_strided_slice %23 {offsets = [0, 0], sizes = [16, 32], strides = [1, 1]} : vector<32x32xf32> to vector<16x32xf32>
      %25 = arith.addf %12, %24 : vector<16x32xf32>
      %26 = vector.extract_strided_slice %23 {offsets = [16, 0], sizes = [16, 32], strides = [1, 1]} : vector<32x32xf32> to vector<16x32xf32>
      %27 = arith.addf %12, %26 : vector<16x32xf32>
      %c0_17 = arith.constant 0 : index
      %c80 = arith.constant 80 : index
      %c0_18 = arith.constant 0 : index
      %28 = vector.load %arg12[%c0_17, %c80, %c0_18] : memref<1x352x32xf32, #tpu.memory_space<vmem>>, vector<1x32x32xf32>
      %29 = vector.shape_cast %28 : vector<1x32x32xf32> to vector<32x32xf32>
      %c0_19 = arith.constant 0 : index
      %c336 = arith.constant 336 : index
      %c0_20 = arith.constant 0 : index
      %30 = vector.load %arg12[%c0_19, %c336, %c0_20] : memref<1x352x32xf32, #tpu.memory_space<vmem>>, vector<1x1x32xf32>
      %31 = vector.shape_cast %30 : vector<1x1x32xf32> to vector<1x32xf32>
      %c0_21 = arith.constant 0 : index
      %c112 = arith.constant 112 : index
      %c0_22 = arith.constant 0 : index
      %32 = vector.load %arg12[%c0_21, %c112, %c0_22] : memref<1x352x32xf32, #tpu.memory_space<vmem>>, vector<1x32x32xf32>
      %33 = vector.shape_cast %32 : vector<1x32x32xf32> to vector<32x32xf32>
      %c0_23 = arith.constant 0 : index
      %c337 = arith.constant 337 : index
      %c0_24 = arith.constant 0 : index
      %34 = vector.load %arg12[%c0_23, %c337, %c0_24] : memref<1x352x32xf32, #tpu.memory_space<vmem>>, vector<1x1x32xf32>
      %35 = vector.shape_cast %34 : vector<1x1x32xf32> to vector<1x32xf32>
      %c0_25 = arith.constant 0 : index
      %c144 = arith.constant 144 : index
      %c0_26 = arith.constant 0 : index
      %36 = vector.load %arg12[%c0_25, %c144, %c0_26] : memref<1x352x32xf32, #tpu.memory_space<vmem>>, vector<1x32x32xf32>
      %37 = vector.shape_cast %36 : vector<1x32x32xf32> to vector<32x32xf32>
      %c0_27 = arith.constant 0 : index
      %c338 = arith.constant 338 : index
      %c0_28 = arith.constant 0 : index
      %38 = vector.load %arg12[%c0_27, %c338, %c0_28] : memref<1x352x32xf32, #tpu.memory_space<vmem>>, vector<1x1x32xf32>
      %39 = vector.shape_cast %38 : vector<1x1x32xf32> to vector<1x32xf32>
      %c0_29 = arith.constant 0 : index
      %c176 = arith.constant 176 : index
      %c0_30 = arith.constant 0 : index
      %40 = vector.load %arg12[%c0_29, %c176, %c0_30] : memref<1x352x32xf32, #tpu.memory_space<vmem>>, vector<1x32x32xf32>
      %41 = vector.shape_cast %40 : vector<1x32x32xf32> to vector<32x32xf32>
      %c0_31 = arith.constant 0 : index
      %c339 = arith.constant 339 : index
      %c0_32 = arith.constant 0 : index
      %42 = vector.load %arg12[%c0_31, %c339, %c0_32] : memref<1x352x32xf32, #tpu.memory_space<vmem>>, vector<1x1x32xf32>
      %43 = vector.shape_cast %42 : vector<1x1x32xf32> to vector<1x32xf32>
      %c0_33 = arith.constant 0 : index
      %c0_34 = arith.constant 0 : index
      %44 = vector.load %arg5[%c0_33, %c0_34] : memref<64x32xf32, #tpu.memory_space<vmem>>, vector<64x32xf32>
      %c0_35 = arith.constant 0 : index
      %c0_36 = arith.constant 0 : index
      %45 = vector.load %arg6[%c0_35, %c0_36] : memref<64x16xf32, #tpu.memory_space<vmem>>, vector<64x16xf32>
      %cst_37 = arith.constant dense<0.000000e+00> : vector<16x32xf32>
      %46 = tpu.matmul %25, %29, %cst_37 {dimension_numbers = #tpu.dot_dimension_numbers<[1], [0], [0], [1], [0, 0, 1, 1], [], []>} : vector<16x32xf32>, vector<32x32xf32>, vector<16x32xf32> -> vector<16x32xf32>
      %47 = vector.broadcast %31 : vector<1x32xf32> to vector<16x32xf32>
      %48 = arith.addf %46, %47 : vector<16x32xf32>
      %cst_38 = arith.constant dense<0.000000e+00> : vector<16x32xf32>
      %49 = tpu.matmul %27, %33, %cst_38 {dimension_numbers = #tpu.dot_dimension_numbers<[1], [0], [0], [1], [0, 0, 1, 1], [], []>} : vector<16x32xf32>, vector<32x32xf32>, vector<16x32xf32> -> vector<16x32xf32>
      %50 = vector.broadcast %35 : vector<1x32xf32> to vector<16x32xf32>
      %51 = arith.addf %49, %50 : vector<16x32xf32>
      %cst_39 = arith.constant dense<0.000000e+00> : vector<16x32xf32>
      %52 = tpu.matmul %12, %37, %cst_39 {dimension_numbers = #tpu.dot_dimension_numbers<[1], [0], [0], [1], [0, 0, 1, 1], [], []>} : vector<16x32xf32>, vector<32x32xf32>, vector<16x32xf32> -> vector<16x32xf32>
      %53 = vector.broadcast %39 : vector<1x32xf32> to vector<16x32xf32>
      %54 = arith.addf %52, %53 : vector<16x32xf32>
      %55 = tpu.concatenate %48, %48, %48, %48 in 0 : vector<16x32xf32>, vector<16x32xf32>, vector<16x32xf32>, vector<16x32xf32> -> vector<64x32xf32>
      %56 = arith.mulf %55, %44 : vector<64x32xf32>
      %57 = tpu.concatenate %54, %54, %54, %54 in 0 : vector<16x32xf32>, vector<16x32xf32>, vector<16x32xf32>, vector<16x32xf32> -> vector<64x32xf32>
      %58 = arith.mulf %57, %44 : vector<64x32xf32>
      %cst_40 = arith.constant dense<0.000000e+00> : vector<64x16xf32>
      %59 = tpu.matmul %56, %51, %cst_40 {dimension_numbers = #tpu.dot_dimension_numbers<[1], [1], [0], [0], [0, 0, 1, 0], [], []>} : vector<64x32xf32>, vector<16x32xf32>, vector<64x16xf32> -> vector<64x16xf32>
      %60 = arith.addf %59, %45 : vector<64x16xf32>
      %cst_41 = arith.constant dense<0xFF800000> : vector<64xf32>
      %61 = vector.multi_reduction <maximumf>, %60, %cst_41 [1] : vector<64x16xf32> to vector<64xf32>
      %62 = vector.shape_cast %61 : vector<64xf32> to vector<64x1xf32>
      %63 = vector.broadcast %62 : vector<64x1xf32> to vector<64x16xf32>
      %64 = arith.subf %60, %63 : vector<64x16xf32>
      %65 = math.exp %64 : vector<64x16xf32>
      %cst_42 = arith.constant dense<0.000000e+00> : vector<64xf32>
      %66 = vector.multi_reduction <add>, %65, %cst_42 [1] : vector<64x16xf32> to vector<64xf32>
      %67 = vector.shape_cast %66 : vector<64xf32> to vector<64x1xf32>
      %68 = tpu.reciprocal %67 {approx = true} : vector<64x1xf32> -> vector<64x1xf32>
      %69 = vector.broadcast %68 : vector<64x1xf32> to vector<64x16xf32>
      %70 = arith.mulf %65, %69 : vector<64x16xf32>
      %71 = vector.extract_strided_slice %70 {offsets = [0, 0], sizes = [16, 16], strides = [1, 1]} : vector<64x16xf32> to vector<16x16xf32>
      %72 = vector.extract_strided_slice %58 {offsets = [0, 0], sizes = [16, 32], strides = [1, 1]} : vector<64x32xf32> to vector<16x32xf32>
      %cst_43 = arith.constant dense<0.000000e+00> : vector<16x32xf32>
      %73 = tpu.matmul %71, %72, %cst_43 {dimension_numbers = #tpu.dot_dimension_numbers<[1], [0], [0], [1], [0, 0, 1, 1], [], []>} : vector<16x16xf32>, vector<16x32xf32>, vector<16x32xf32> -> vector<16x32xf32>
      %74 = vector.extract_strided_slice %70 {offsets = [16, 0], sizes = [16, 16], strides = [1, 1]} : vector<64x16xf32> to vector<16x16xf32>
      %75 = vector.extract_strided_slice %58 {offsets = [16, 0], sizes = [16, 32], strides = [1, 1]} : vector<64x32xf32> to vector<16x32xf32>
      %cst_44 = arith.constant dense<0.000000e+00> : vector<16x32xf32>
      %76 = tpu.matmul %74, %75, %cst_44 {dimension_numbers = #tpu.dot_dimension_numbers<[1], [0], [0], [1], [0, 0, 1, 1], [], []>} : vector<16x16xf32>, vector<16x32xf32>, vector<16x32xf32> -> vector<16x32xf32>
      %77 = arith.addf %73, %76 : vector<16x32xf32>
      %78 = vector.extract_strided_slice %70 {offsets = [32, 0], sizes = [16, 16], strides = [1, 1]} : vector<64x16xf32> to vector<16x16xf32>
      %79 = vector.extract_strided_slice %58 {offsets = [32, 0], sizes = [16, 32], strides = [1, 1]} : vector<64x32xf32> to vector<16x32xf32>
      %cst_45 = arith.constant dense<0.000000e+00> : vector<16x32xf32>
      %80 = tpu.matmul %78, %79, %cst_45 {dimension_numbers = #tpu.dot_dimension_numbers<[1], [0], [0], [1], [0, 0, 1, 1], [], []>} : vector<16x16xf32>, vector<16x32xf32>, vector<16x32xf32> -> vector<16x32xf32>
      %81 = arith.addf %77, %80 : vector<16x32xf32>
      %82 = vector.extract_strided_slice %70 {offsets = [48, 0], sizes = [16, 16], strides = [1, 1]} : vector<64x16xf32> to vector<16x16xf32>
      %83 = vector.extract_strided_slice %58 {offsets = [48, 0], sizes = [16, 32], strides = [1, 1]} : vector<64x32xf32> to vector<16x32xf32>
      %cst_46 = arith.constant dense<0.000000e+00> : vector<16x32xf32>
      %84 = tpu.matmul %82, %83, %cst_46 {dimension_numbers = #tpu.dot_dimension_numbers<[1], [0], [0], [1], [0, 0, 1, 1], [], []>} : vector<16x16xf32>, vector<16x32xf32>, vector<16x32xf32> -> vector<16x32xf32>
      %85 = arith.addf %81, %84 : vector<16x32xf32>
      %cst_47 = arith.constant dense<0.000000e+00> : vector<16x32xf32>
      %86 = tpu.matmul %85, %41, %cst_47 {dimension_numbers = #tpu.dot_dimension_numbers<[1], [0], [0], [1], [0, 0, 1, 1], [], []>} : vector<16x32xf32>, vector<32x32xf32>, vector<16x32xf32> -> vector<16x32xf32>
      %87 = vector.broadcast %43 : vector<1x32xf32> to vector<16x32xf32>
      %88 = arith.addf %86, %87 : vector<16x32xf32>
      %c0_48 = arith.constant 0 : index
      %c340 = arith.constant 340 : index
      %c0_49 = arith.constant 0 : index
      %89 = vector.load %arg12[%c0_48, %c340, %c0_49] : memref<1x352x32xf32, #tpu.memory_space<vmem>>, vector<1x1x32xf32>
      %90 = vector.shape_cast %89 : vector<1x1x32xf32> to vector<1x32xf32>
      %c0_50 = arith.constant 0 : index
      %c341 = arith.constant 341 : index
      %c0_51 = arith.constant 0 : index
      %91 = vector.load %arg12[%c0_50, %c341, %c0_51] : memref<1x352x32xf32, #tpu.memory_space<vmem>>, vector<1x1x32xf32>
      %92 = vector.shape_cast %91 : vector<1x1x32xf32> to vector<1x32xf32>
      %cst_52 = arith.constant dense<0.000000e+00> : vector<16xf32>
      %93 = vector.multi_reduction <add>, %88, %cst_52 [1] : vector<16x32xf32> to vector<16xf32>
      %94 = vector.shape_cast %93 : vector<16xf32> to vector<16x1xf32>
      %cst_53 = arith.constant 3.200000e+01 : f32
      %95 = vector.broadcast %cst_53 : f32 to vector<16x1xf32>
      %96 = arith.divf %94, %95 : vector<16x1xf32>
      %97 = vector.broadcast %96 : vector<16x1xf32> to vector<16x32xf32>
      %98 = arith.subf %88, %97 : vector<16x32xf32>
      %99 = arith.mulf %98, %98 : vector<16x32xf32>
      %cst_54 = arith.constant dense<0.000000e+00> : vector<16xf32>
      %100 = vector.multi_reduction <add>, %99, %cst_54 [1] : vector<16x32xf32> to vector<16xf32>
      %101 = vector.shape_cast %100 : vector<16xf32> to vector<16x1xf32>
      %cst_55 = arith.constant 3.200000e+01 : f32
      %102 = vector.broadcast %cst_55 : f32 to vector<16x1xf32>
      %103 = arith.divf %101, %102 : vector<16x1xf32>
      %104 = vector.broadcast %96 : vector<16x1xf32> to vector<16x32xf32>
      %105 = arith.subf %88, %104 : vector<16x32xf32>
      %cst_56 = arith.constant 9.99999974E-6 : f32
      %106 = vector.broadcast %cst_56 : f32 to vector<16x1xf32>
      %107 = arith.addf %103, %106 : vector<16x1xf32>
      %108 = math.rsqrt %107 : vector<16x1xf32>
      %109 = vector.broadcast %108 : vector<16x1xf32> to vector<16x32xf32>
      %110 = arith.mulf %105, %109 : vector<16x32xf32>
      %111 = vector.broadcast %90 : vector<1x32xf32> to vector<16x32xf32>
      %112 = arith.mulf %110, %111 : vector<16x32xf32>
      %113 = vector.broadcast %92 : vector<1x32xf32> to vector<16x32xf32>
      %114 = arith.addf %112, %113 : vector<16x32xf32>
      %115 = arith.addf %12, %114 : vector<16x32xf32>
      %c0_57 = arith.constant 0 : index
      %c208 = arith.constant 208 : index
      %c0_58 = arith.constant 0 : index
      %116 = vector.load %arg12[%c0_57, %c208, %c0_58] : memref<1x352x32xf32, #tpu.memory_space<vmem>>, vector<1x32x32xf32>
      %117 = vector.shape_cast %116 : vector<1x32x32xf32> to vector<32x32xf32>
      %c0_59 = arith.constant 0 : index
      %c342 = arith.constant 342 : index
      %c0_60 = arith.constant 0 : index
      %118 = vector.load %arg12[%c0_59, %c342, %c0_60] : memref<1x352x32xf32, #tpu.memory_space<vmem>>, vector<1x1x32xf32>
      %119 = vector.shape_cast %118 : vector<1x1x32xf32> to vector<1x32xf32>
      %c0_61 = arith.constant 0 : index
      %c240 = arith.constant 240 : index
      %c0_62 = arith.constant 0 : index
      %120 = vector.load %arg12[%c0_61, %c240, %c0_62] : memref<1x352x32xf32, #tpu.memory_space<vmem>>, vector<1x32x32xf32>
      %121 = vector.shape_cast %120 : vector<1x32x32xf32> to vector<32x32xf32>
      %c0_63 = arith.constant 0 : index
      %c343 = arith.constant 343 : index
      %c0_64 = arith.constant 0 : index
      %122 = vector.load %arg12[%c0_63, %c343, %c0_64] : memref<1x352x32xf32, #tpu.memory_space<vmem>>, vector<1x1x32xf32>
      %123 = vector.shape_cast %122 : vector<1x1x32xf32> to vector<1x32xf32>
      %c0_65 = arith.constant 0 : index
      %c272 = arith.constant 272 : index
      %c0_66 = arith.constant 0 : index
      %124 = vector.load %arg12[%c0_65, %c272, %c0_66] : memref<1x352x32xf32, #tpu.memory_space<vmem>>, vector<1x32x32xf32>
      %125 = vector.shape_cast %124 : vector<1x32x32xf32> to vector<32x32xf32>
      %c0_67 = arith.constant 0 : index
      %c344 = arith.constant 344 : index
      %c0_68 = arith.constant 0 : index
      %126 = vector.load %arg12[%c0_67, %c344, %c0_68] : memref<1x352x32xf32, #tpu.memory_space<vmem>>, vector<1x1x32xf32>
      %127 = vector.shape_cast %126 : vector<1x1x32xf32> to vector<1x32xf32>
      %c0_69 = arith.constant 0 : index
      %c304 = arith.constant 304 : index
      %c0_70 = arith.constant 0 : index
      %128 = vector.load %arg12[%c0_69, %c304, %c0_70] : memref<1x352x32xf32, #tpu.memory_space<vmem>>, vector<1x32x32xf32>
      %129 = vector.shape_cast %128 : vector<1x32x32xf32> to vector<32x32xf32>
      %c0_71 = arith.constant 0 : index
      %c345 = arith.constant 345 : index
      %c0_72 = arith.constant 0 : index
      %130 = vector.load %arg12[%c0_71, %c345, %c0_72] : memref<1x352x32xf32, #tpu.memory_space<vmem>>, vector<1x1x32xf32>
      %131 = vector.shape_cast %130 : vector<1x1x32xf32> to vector<1x32xf32>
      %c0_73 = arith.constant 0 : index
      %c0_74 = arith.constant 0 : index
      %132 = vector.load %arg5[%c0_73, %c0_74] : memref<64x32xf32, #tpu.memory_space<vmem>>, vector<64x32xf32>
      %c0_75 = arith.constant 0 : index
      %c0_76 = arith.constant 0 : index
      %133 = vector.load %arg6[%c0_75, %c0_76] : memref<64x16xf32, #tpu.memory_space<vmem>>, vector<64x16xf32>
      %cst_77 = arith.constant dense<0.000000e+00> : vector<16x32xf32>
      %134 = tpu.matmul %115, %117, %cst_77 {dimension_numbers = #tpu.dot_dimension_numbers<[1], [0], [0], [1], [0, 0, 1, 1], [], []>} : vector<16x32xf32>, vector<32x32xf32>, vector<16x32xf32> -> vector<16x32xf32>
      %135 = vector.broadcast %119 : vector<1x32xf32> to vector<16x32xf32>
      %136 = arith.addf %134, %135 : vector<16x32xf32>
      %cst_78 = arith.constant dense<0.000000e+00> : vector<16x32xf32>
      %137 = tpu.matmul %16, %121, %cst_78 {dimension_numbers = #tpu.dot_dimension_numbers<[1], [0], [0], [1], [0, 0, 1, 1], [], []>} : vector<16x32xf32>, vector<32x32xf32>, vector<16x32xf32> -> vector<16x32xf32>
      %138 = vector.broadcast %123 : vector<1x32xf32> to vector<16x32xf32>
      %139 = arith.addf %137, %138 : vector<16x32xf32>
      %cst_79 = arith.constant dense<0.000000e+00> : vector<16x32xf32>
      %140 = tpu.matmul %16, %125, %cst_79 {dimension_numbers = #tpu.dot_dimension_numbers<[1], [0], [0], [1], [0, 0, 1, 1], [], []>} : vector<16x32xf32>, vector<32x32xf32>, vector<16x32xf32> -> vector<16x32xf32>
      %141 = vector.broadcast %127 : vector<1x32xf32> to vector<16x32xf32>
      %142 = arith.addf %140, %141 : vector<16x32xf32>
      %143 = tpu.concatenate %136, %136, %136, %136 in 0 : vector<16x32xf32>, vector<16x32xf32>, vector<16x32xf32>, vector<16x32xf32> -> vector<64x32xf32>
      %144 = arith.mulf %143, %132 : vector<64x32xf32>
      %145 = tpu.concatenate %142, %142, %142, %142 in 0 : vector<16x32xf32>, vector<16x32xf32>, vector<16x32xf32>, vector<16x32xf32> -> vector<64x32xf32>
      %146 = arith.mulf %145, %132 : vector<64x32xf32>
      %cst_80 = arith.constant dense<0.000000e+00> : vector<64x16xf32>
      %147 = tpu.matmul %144, %139, %cst_80 {dimension_numbers = #tpu.dot_dimension_numbers<[1], [1], [0], [0], [0, 0, 1, 0], [], []>} : vector<64x32xf32>, vector<16x32xf32>, vector<64x16xf32> -> vector<64x16xf32>
      %148 = arith.addf %147, %133 : vector<64x16xf32>
      %cst_81 = arith.constant dense<0xFF800000> : vector<64xf32>
      %149 = vector.multi_reduction <maximumf>, %148, %cst_81 [1] : vector<64x16xf32> to vector<64xf32>
      %150 = vector.shape_cast %149 : vector<64xf32> to vector<64x1xf32>
      %151 = vector.broadcast %150 : vector<64x1xf32> to vector<64x16xf32>
      %152 = arith.subf %148, %151 : vector<64x16xf32>
      %153 = math.exp %152 : vector<64x16xf32>
      %cst_82 = arith.constant dense<0.000000e+00> : vector<64xf32>
      %154 = vector.multi_reduction <add>, %153, %cst_82 [1] : vector<64x16xf32> to vector<64xf32>
      %155 = vector.shape_cast %154 : vector<64xf32> to vector<64x1xf32>
      %156 = tpu.reciprocal %155 {approx = true} : vector<64x1xf32> -> vector<64x1xf32>
      %157 = vector.broadcast %156 : vector<64x1xf32> to vector<64x16xf32>
      %158 = arith.mulf %153, %157 : vector<64x16xf32>
      %159 = vector.extract_strided_slice %158 {offsets = [0, 0], sizes = [16, 16], strides = [1, 1]} : vector<64x16xf32> to vector<16x16xf32>
      %160 = vector.extract_strided_slice %146 {offsets = [0, 0], sizes = [16, 32], strides = [1, 1]} : vector<64x32xf32> to vector<16x32xf32>
      %cst_83 = arith.constant dense<0.000000e+00> : vector<16x32xf32>
      %161 = tpu.matmul %159, %160, %cst_83 {dimension_numbers = #tpu.dot_dimension_numbers<[1], [0], [0], [1], [0, 0, 1, 1], [], []>} : vector<16x16xf32>, vector<16x32xf32>, vector<16x32xf32> -> vector<16x32xf32>
      %162 = vector.extract_strided_slice %158 {offsets = [16, 0], sizes = [16, 16], strides = [1, 1]} : vector<64x16xf32> to vector<16x16xf32>
      %163 = vector.extract_strided_slice %146 {offsets = [16, 0], sizes = [16, 32], strides = [1, 1]} : vector<64x32xf32> to vector<16x32xf32>
      %cst_84 = arith.constant dense<0.000000e+00> : vector<16x32xf32>
      %164 = tpu.matmul %162, %163, %cst_84 {dimension_numbers = #tpu.dot_dimension_numbers<[1], [0], [0], [1], [0, 0, 1, 1], [], []>} : vector<16x16xf32>, vector<16x32xf32>, vector<16x32xf32> -> vector<16x32xf32>
      %165 = arith.addf %161, %164 : vector<16x32xf32>
      %166 = vector.extract_strided_slice %158 {offsets = [32, 0], sizes = [16, 16], strides = [1, 1]} : vector<64x16xf32> to vector<16x16xf32>
      %167 = vector.extract_strided_slice %146 {offsets = [32, 0], sizes = [16, 32], strides = [1, 1]} : vector<64x32xf32> to vector<16x32xf32>
      %cst_85 = arith.constant dense<0.000000e+00> : vector<16x32xf32>
      %168 = tpu.matmul %166, %167, %cst_85 {dimension_numbers = #tpu.dot_dimension_numbers<[1], [0], [0], [1], [0, 0, 1, 1], [], []>} : vector<16x16xf32>, vector<16x32xf32>, vector<16x32xf32> -> vector<16x32xf32>
      %169 = arith.addf %165, %168 : vector<16x32xf32>
      %170 = vector.extract_strided_slice %158 {offsets = [48, 0], sizes = [16, 16], strides = [1, 1]} : vector<64x16xf32> to vector<16x16xf32>
      %171 = vector.extract_strided_slice %146 {offsets = [48, 0], sizes = [16, 32], strides = [1, 1]} : vector<64x32xf32> to vector<16x32xf32>
      %cst_86 = arith.constant dense<0.000000e+00> : vector<16x32xf32>
      %172 = tpu.matmul %170, %171, %cst_86 {dimension_numbers = #tpu.dot_dimension_numbers<[1], [0], [0], [1], [0, 0, 1, 1], [], []>} : vector<16x16xf32>, vector<16x32xf32>, vector<16x32xf32> -> vector<16x32xf32>
      %173 = arith.addf %169, %172 : vector<16x32xf32>
      %cst_87 = arith.constant dense<0.000000e+00> : vector<16x32xf32>
      %174 = tpu.matmul %173, %129, %cst_87 {dimension_numbers = #tpu.dot_dimension_numbers<[1], [0], [0], [1], [0, 0, 1, 1], [], []>} : vector<16x32xf32>, vector<32x32xf32>, vector<16x32xf32> -> vector<16x32xf32>
      %175 = vector.broadcast %131 : vector<1x32xf32> to vector<16x32xf32>
      %176 = arith.addf %174, %175 : vector<16x32xf32>
      %c0_88 = arith.constant 0 : index
      %c346 = arith.constant 346 : index
      %c0_89 = arith.constant 0 : index
      %177 = vector.load %arg12[%c0_88, %c346, %c0_89] : memref<1x352x32xf32, #tpu.memory_space<vmem>>, vector<1x1x32xf32>
      %178 = vector.shape_cast %177 : vector<1x1x32xf32> to vector<1x32xf32>
      %c0_90 = arith.constant 0 : index
      %c347 = arith.constant 347 : index
      %c0_91 = arith.constant 0 : index
      %179 = vector.load %arg12[%c0_90, %c347, %c0_91] : memref<1x352x32xf32, #tpu.memory_space<vmem>>, vector<1x1x32xf32>
      %180 = vector.shape_cast %179 : vector<1x1x32xf32> to vector<1x32xf32>
      %cst_92 = arith.constant dense<0.000000e+00> : vector<16xf32>
      %181 = vector.multi_reduction <add>, %176, %cst_92 [1] : vector<16x32xf32> to vector<16xf32>
      %182 = vector.shape_cast %181 : vector<16xf32> to vector<16x1xf32>
      %cst_93 = arith.constant 3.200000e+01 : f32
      %183 = vector.broadcast %cst_93 : f32 to vector<16x1xf32>
      %184 = arith.divf %182, %183 : vector<16x1xf32>
      %185 = vector.broadcast %184 : vector<16x1xf32> to vector<16x32xf32>
      %186 = arith.subf %176, %185 : vector<16x32xf32>
      %187 = arith.mulf %186, %186 : vector<16x32xf32>
      %cst_94 = arith.constant dense<0.000000e+00> : vector<16xf32>
      %188 = vector.multi_reduction <add>, %187, %cst_94 [1] : vector<16x32xf32> to vector<16xf32>
      %189 = vector.shape_cast %188 : vector<16xf32> to vector<16x1xf32>
      %cst_95 = arith.constant 3.200000e+01 : f32
      %190 = vector.broadcast %cst_95 : f32 to vector<16x1xf32>
      %191 = arith.divf %189, %190 : vector<16x1xf32>
      %192 = vector.broadcast %184 : vector<16x1xf32> to vector<16x32xf32>
      %193 = arith.subf %176, %192 : vector<16x32xf32>
      %cst_96 = arith.constant 9.99999974E-6 : f32
      %194 = vector.broadcast %cst_96 : f32 to vector<16x1xf32>
      %195 = arith.addf %191, %194 : vector<16x1xf32>
      %196 = math.rsqrt %195 : vector<16x1xf32>
      %197 = vector.broadcast %196 : vector<16x1xf32> to vector<16x32xf32>
      %198 = arith.mulf %193, %197 : vector<16x32xf32>
      %199 = vector.broadcast %178 : vector<1x32xf32> to vector<16x32xf32>
      %200 = arith.mulf %198, %199 : vector<16x32xf32>
      %201 = vector.broadcast %180 : vector<1x32xf32> to vector<16x32xf32>
      %202 = arith.addf %200, %201 : vector<16x32xf32>
      %203 = arith.addf %115, %202 : vector<16x32xf32>
      %c0_97 = arith.constant 0 : index
      %c348 = arith.constant 348 : index
      %c0_98 = arith.constant 0 : index
      %204 = vector.load %arg12[%c0_97, %c348, %c0_98] : memref<1x352x32xf32, #tpu.memory_space<vmem>>, vector<1x1x32xf32>
      %205 = vector.shape_cast %204 : vector<1x1x32xf32> to vector<1x32xf32>
      %c0_99 = arith.constant 0 : index
      %c0_100 = arith.constant 0 : index
      %c0_101 = arith.constant 0 : index
      %206 = vector.load %arg13[%c0_99, %c0_100, %c0_101] : memref<1x66x2048xbf16, #tpu.memory_space<vmem>>, vector<1x32x2048xbf16>
      %207 = vector.shape_cast %206 : vector<1x32x2048xbf16> to vector<32x2048xbf16>
      %c0_102 = arith.constant 0 : index
      %c32 = arith.constant 32 : index
      %c0_103 = arith.constant 0 : index
      %208 = vector.load %arg13[%c0_102, %c32, %c0_103] : memref<1x66x2048xbf16, #tpu.memory_space<vmem>>, vector<1x32x2048xbf16>
      %209 = vector.shape_cast %208 : vector<1x32x2048xbf16> to vector<32x2048xbf16>
      %c0_104 = arith.constant 0 : index
      %c64_105 = arith.constant 64 : index
      %c0_106 = arith.constant 0 : index
      %210 = vector.load %arg13[%c0_104, %c64_105, %c0_106] : memref<1x66x2048xbf16, #tpu.memory_space<vmem>>, vector<1x1x2048xbf16>
      %211 = vector.shape_cast %210 : vector<1x1x2048xbf16> to vector<1x2048xbf16>
      %212 = arith.extf %211 : vector<1x2048xbf16> to vector<1x2048xf32>
      %213 = arith.truncf %203 : vector<16x32xf32> to vector<16x32xbf16>
      %cst_107 = arith.constant dense<0.000000e+00> : vector<16x2048xf32>
      %214 = tpu.matmul %213, %207, %cst_107 {dimension_numbers = #tpu.dot_dimension_numbers<[1], [0], [0], [1], [0, 0, 1, 1], [], []>} : vector<16x32xbf16>, vector<32x2048xbf16>, vector<16x2048xf32> -> vector<16x2048xf32>
      %215 = vector.broadcast %212 : vector<1x2048xf32> to vector<16x2048xf32>
      %216 = arith.addf %214, %215 : vector<16x2048xf32>
      %cst_108 = arith.constant 0.000000e+00 : f32
      %217 = vector.broadcast %cst_108 : f32 to vector<16x2048xf32>
      %218 = arith.maximumf %216, %217 : vector<16x2048xf32>
      %219 = arith.truncf %218 : vector<16x2048xf32> to vector<16x2048xbf16>
      %cst_109 = arith.constant dense<0.000000e+00> : vector<16x32xf32>
      %220 = tpu.matmul %219, %209, %cst_109 {dimension_numbers = #tpu.dot_dimension_numbers<[1], [1], [0], [0], [0, 0, 1, 0], [], []>} : vector<16x2048xbf16>, vector<32x2048xbf16>, vector<16x32xf32> -> vector<16x32xf32>
      %221 = vector.broadcast %205 : vector<1x32xf32> to vector<16x32xf32>
      %222 = arith.addf %220, %221 : vector<16x32xf32>
      %c0_110 = arith.constant 0 : index
      %c349 = arith.constant 349 : index
      %c0_111 = arith.constant 0 : index
      %223 = vector.load %arg12[%c0_110, %c349, %c0_111] : memref<1x352x32xf32, #tpu.memory_space<vmem>>, vector<1x1x32xf32>
      %224 = vector.shape_cast %223 : vector<1x1x32xf32> to vector<1x32xf32>
      %c0_112 = arith.constant 0 : index
      %c350 = arith.constant 350 : index
      %c0_113 = arith.constant 0 : index
      %225 = vector.load %arg12[%c0_112, %c350, %c0_113] : memref<1x352x32xf32, #tpu.memory_space<vmem>>, vector<1x1x32xf32>
      %226 = vector.shape_cast %225 : vector<1x1x32xf32> to vector<1x32xf32>
      %cst_114 = arith.constant dense<0.000000e+00> : vector<16xf32>
      %227 = vector.multi_reduction <add>, %222, %cst_114 [1] : vector<16x32xf32> to vector<16xf32>
      %228 = vector.shape_cast %227 : vector<16xf32> to vector<16x1xf32>
      %cst_115 = arith.constant 3.200000e+01 : f32
      %229 = vector.broadcast %cst_115 : f32 to vector<16x1xf32>
      %230 = arith.divf %228, %229 : vector<16x1xf32>
      %231 = vector.broadcast %230 : vector<16x1xf32> to vector<16x32xf32>
      %232 = arith.subf %222, %231 : vector<16x32xf32>
      %233 = arith.mulf %232, %232 : vector<16x32xf32>
      %cst_116 = arith.constant dense<0.000000e+00> : vector<16xf32>
      %234 = vector.multi_reduction <add>, %233, %cst_116 [1] : vector<16x32xf32> to vector<16xf32>
      %235 = vector.shape_cast %234 : vector<16xf32> to vector<16x1xf32>
      %cst_117 = arith.constant 3.200000e+01 : f32
      %236 = vector.broadcast %cst_117 : f32 to vector<16x1xf32>
      %237 = arith.divf %235, %236 : vector<16x1xf32>
      %238 = vector.broadcast %230 : vector<16x1xf32> to vector<16x32xf32>
      %239 = arith.subf %222, %238 : vector<16x32xf32>
      %cst_118 = arith.constant 9.99999974E-6 : f32
      %240 = vector.broadcast %cst_118 : f32 to vector<16x1xf32>
      %241 = arith.addf %237, %240 : vector<16x1xf32>
      %242 = math.rsqrt %241 : vector<16x1xf32>
      %243 = vector.broadcast %242 : vector<16x1xf32> to vector<16x32xf32>
      %244 = arith.mulf %239, %243 : vector<16x32xf32>
      %245 = vector.broadcast %224 : vector<1x32xf32> to vector<16x32xf32>
      %246 = arith.mulf %244, %245 : vector<16x32xf32>
      %247 = vector.broadcast %226 : vector<1x32xf32> to vector<16x32xf32>
      %248 = arith.addf %246, %247 : vector<16x32xf32>
      %249 = arith.addf %203, %248 : vector<16x32xf32>
      %c0_119 = arith.constant 0 : index
      %c0_120 = arith.constant 0 : index
      %250 = vector.load %arg16[%c0_119, %c0_120] : memref<16x32xf32, #tpu.memory_space<vmem>>, vector<16x32xf32>
      tpu.vector_store %arg16[%c0_119, %c0_120], %249 {strides = array<i32>} : memref<16x32xf32, #tpu.memory_space<vmem>>, vector<16x32xf32>,
    } else {
    }
    %c11_i32 = arith.constant 11 : i32
    %9 = arith.cmpi eq, %arg0, %c11_i32 : i32
    %10 = arith.extui %9 : i1 to i32
    %c0_i32_4 = arith.constant 0 : i32
    %11 = arith.cmpi ne, %10, %c0_i32_4 : i32
    scf.if %11 {
      %c0 = arith.constant 0 : index
      %c0_5 = arith.constant 0 : index
      %12 = vector.load %arg16[%c0, %c0_5] : memref<16x32xf32, #tpu.memory_space<vmem>>, vector<16x32xf32>
      %c0_6 = arith.constant 0 : index
      %c0_7 = arith.constant 0 : index
      %13 = vector.load %arg7[%c0_6, %c0_7] : memref<32x16xf32, #tpu.memory_space<vmem>>, vector<32x16xf32>
      %cst = arith.constant dense<0.000000e+00> : vector<16x16xf32>
      %14 = tpu.matmul %12, %13, %cst {dimension_numbers = #tpu.dot_dimension_numbers<[1], [0], [0], [1], [0, 0, 1, 1], [], []>} : vector<16x32xf32>, vector<32x16xf32>, vector<16x16xf32> -> vector<16x16xf32>
      %c0_8 = arith.constant 0 : index
      %c0_9 = arith.constant 0 : index
      %15 = vector.load %arg14[%c0_8, %c0_9] : memref<16x16xf32, #tpu.memory_space<vmem>>, vector<16x16xf32>
      tpu.vector_store %arg14[%c0_8, %c0_9], %14 {strides = array<i32>} : memref<16x16xf32, #tpu.memory_space<vmem>>, vector<16x16xf32>,
    } else {
    }
    return
  }
  func.func @transform_0(%arg0: i32) -> (i32, i32) {
    %c0_i32 = arith.constant 0 : i32
    %c0_i32_0 = arith.constant 0 : i32
    %c0_i32_1 = arith.constant 0 : i32
    return %c0_i32, %c0_i32_0 : i32, i32
  }
  func.func @transform_1(%arg0: i32) -> (i32, i32) {
    %c0_i32 = arith.constant 0 : i32
    %c0_i32_0 = arith.constant 0 : i32
    %c0_i32_1 = arith.constant 0 : i32
    return %c0_i32, %c0_i32_0 : i32, i32
  }
  func.func @transform_2(%arg0: i32) -> (i32, i32) {
    %c0_i32 = arith.constant 0 : i32
    %c0_i32_0 = arith.constant 0 : i32
    %c0_i32_1 = arith.constant 0 : i32
    return %c0_i32, %c0_i32_0 : i32, i32
  }
  func.func @transform_3(%arg0: i32) -> (i32, i32) {
    %c0_i32 = arith.constant 0 : i32
    %c0_i32_0 = arith.constant 0 : i32
    %c0_i32_1 = arith.constant 0 : i32
    return %c0_i32, %c0_i32_0 : i32, i32
  }
  func.func @transform_4(%arg0: i32) -> (i32, i32) {
    %c0_i32 = arith.constant 0 : i32
    %c0_i32_0 = arith.constant 0 : i32
    %c0_i32_1 = arith.constant 0 : i32
    return %c0_i32, %c0_i32_0 : i32, i32
  }
  func.func @transform_5(%arg0: i32) -> (i32, i32) {
    %c0_i32 = arith.constant 0 : i32
    %c0_i32_0 = arith.constant 0 : i32
    %c0_i32_1 = arith.constant 0 : i32
    return %c0_i32, %c0_i32_0 : i32, i32
  }
  func.func @transform_6(%arg0: i32) -> (i32, i32) {
    %c0_i32 = arith.constant 0 : i32
    %c0_i32_0 = arith.constant 0 : i32
    %c0_i32_1 = arith.constant 0 : i32
    return %c0_i32, %c0_i32_0 : i32, i32
  }
  func.func @transform_7(%arg0: i32) -> (i32, i32, i32) {
    %c5_i32 = arith.constant 5 : i32
    %0 = arith.minsi %arg0, %c5_i32 : i32
    %c0_i32 = arith.constant 0 : i32
    %c0_i32_0 = arith.constant 0 : i32
    %c0_i32_1 = arith.constant 0 : i32
    return %0, %c0_i32, %c0_i32_0 : i32, i32, i32
  }
  func.func @transform_8(%arg0: i32) -> (i32, i32, i32) {
    %c5_i32 = arith.constant 5 : i32
    %0 = arith.minsi %arg0, %c5_i32 : i32
    %c0_i32 = arith.constant 0 : i32
    %c0_i32_0 = arith.constant 0 : i32
    %c0_i32_1 = arith.constant 0 : i32
    return %0, %c0_i32, %c0_i32_0 : i32, i32, i32
  }
  func.func @transform_9(%arg0: i32) -> (i32, i32, i32) {
    %c5_i32 = arith.constant 5 : i32
    %0 = arith.minsi %arg0, %c5_i32 : i32
    %c0_i32 = arith.constant 0 : i32
    %c0_i32_0 = arith.constant 0 : i32
    %c0_i32_1 = arith.constant 0 : i32
    return %0, %c0_i32, %c0_i32_0 : i32, i32, i32
  }
  func.func @transform_10(%arg0: i32) -> (i32, i32, i32) {
    %c6_i32 = arith.constant 6 : i32
    %0 = arith.subi %arg0, %c6_i32 : i32
    %c0_i32 = arith.constant 0 : i32
    %1 = arith.maxsi %0, %c0_i32 : i32
    %c0_i32_0 = arith.constant 0 : i32
    %c0_i32_1 = arith.constant 0 : i32
    %c0_i32_2 = arith.constant 0 : i32
    return %1, %c0_i32_0, %c0_i32_1 : i32, i32, i32
  }
  func.func @transform_11(%arg0: i32) -> (i32, i32, i32) {
    %c6_i32 = arith.constant 6 : i32
    %0 = arith.subi %arg0, %c6_i32 : i32
    %c0_i32 = arith.constant 0 : i32
    %1 = arith.maxsi %0, %c0_i32 : i32
    %c0_i32_0 = arith.constant 0 : i32
    %c0_i32_1 = arith.constant 0 : i32
    %c0_i32_2 = arith.constant 0 : i32
    return %1, %c0_i32_0, %c0_i32_1 : i32, i32, i32
  }
  func.func @transform_12(%arg0: i32) -> (i32, i32, i32) {
    %c6_i32 = arith.constant 6 : i32
    %0 = arith.subi %arg0, %c6_i32 : i32
    %c0_i32 = arith.constant 0 : i32
    %1 = arith.maxsi %0, %c0_i32 : i32
    %c0_i32_0 = arith.constant 0 : i32
    %c0_i32_1 = arith.constant 0 : i32
    %c0_i32_2 = arith.constant 0 : i32
    return %1, %c0_i32_0, %c0_i32_1 : i32, i32, i32
  }
  func.func @transform_13(%arg0: i32) -> (i32, i32) {
    %c0_i32 = arith.constant 0 : i32
    %c0_i32_0 = arith.constant 0 : i32
    %c0_i32_1 = arith.constant 0 : i32
    return %c0_i32, %c0_i32_0 : i32, i32
  }
}

</mosaic_0001>

<bundles_post_ra>
// kernel: ssan_transformer_forward.1
= control target key start
LH: loop header
LB: loop body
LE: loop exit
PB: predicated region body
PF: predicated region fallthrough
CT: control target
= control target key end

     0   :  { %s10526_s0 = inlined_call_operand.vmem [shape: f32[32,32], index: 0, kind: input, shape index: {}]   ;;  %s10527_s1 = inlined_call_operand.vmem [shape: f32[16,32], index: 1, kind: input, shape index: {}]   ;;  %s10528_s2 = inlined_call_operand.vmem [shape: f32[128,32], index: 2, kind: input, shape index: {}]   ;;  %s10529_s3 = inlined_call_operand.vmem [shape: f32[128,32], index: 3, kind: input, shape index: {}]   ;;  %s10530_s4 = inlined_call_operand.vmem [shape: f32[64,32], index: 4, kind: input, shape index: {}]   ;;  %s10531_s5 = inlined_call_operand.vmem [shape: f32[64,16], index: 5, kind: input, shape index: {}]   ;;  %s10532_s6 = inlined_call_operand.vmem [shape: f32[32,16], index: 6, kind: input, shape index: {}]   ;;  %s10533_s7 = inlined_call_operand.vmem [shape: f32[6,64,128], index: 7, kind: input, shape index: {}]   ;;  %s10534_s8 = inlined_call_operand.vmem [shape: f32[6,272,32], index: 8, kind: input, shape index: {}]   ;;  %s10535_s9 = inlined_call_operand.vmem [shape: bf16[6,66,2048], index: 9, kind: input, shape index: {}]   ;;  %s10536_s10 = inlined_call_operand.vmem [shape: f32[6,32,64], index: 10, kind: input, shape index: {}]   ;;  %s10537_s11 = inlined_call_operand.vmem [shape: f32[6,352,32], index: 11, kind: input, shape index: {}]   ;;  %s10538_s12 = inlined_call_operand.hbm [shape: bf16[6,66,2048], index: 12, kind: input, shape index: {}]   ;;  %s10539_s13 = inlined_call_operand.hbm [shape: f32[16,16], index: 13, kind: output, shape index: {}]  }
   0x1   :  { %10546 = sst [smem:[#allocation14_spill]] %s10532_s6 }
   0x2   :  { %10547 = sst [smem:[#allocation15_spill]] %s10538_s12 }
   0x3   :  { %10548 = sst [smem:[#allocation16_spill]] %s10539_s13 }
   0x4   :  { %18 = vsyncpa [#allocation5], 0 }
   0x5   :  { %20 = vsyncpa [#allocation5 + $0x1], 0 }
   0x6   :  { %21 = vsyncpa [#allocation6], 0  ;;  %s8997_s25 = smov 0   ;;  %s8999_s26 = smov 0  }
   0x7   :  { %s9001_s27 = smov 0   ;;  %s9003_s28 = smov 0  }
   0x8 LB: > { %10549 = sst [smem:[#allocation10_spill]] %s8909_s26  ;;  %s9016_s29 = sadd.s32 4294967295, %s8917_s28   ;;  %s8917_s28 = sphi %s9003_s28, %s10564_s28   ;;  %s8913_s27 = sphi %s9001_s27, %s10567_s27   ;;  %s8909_s26 = sphi %s8999_s26, %s10566_s26   ;;  %s8905_s25 = sphi %s8997_s25, %s10565_s25  }
   0x9   : > { %10550 = sst [smem:[#allocation11_spill]] %s8913_s27  ;;  %s9019_s30 = sadd.s32 1, %s8917_s28  }
   0xa   : > { %10551 = sst [smem:[#allocation12_spill]] %s9019_s30  ;;  %s7268_s14 = sadd.s32 4294967290, %s8917_s28 }
   0xb   : > { %s7269_s15 = sadd.s32 4294967290, %s9019_s30  ;;  %p333_p0 = scmp.gt.s32.totalorder %s7268_s14, 0 }
   0xc   : > { %p336_p1 = scmp.gt.s32.totalorder %s7269_s15, 0  ;;  %s341_s16 = sadd.s32 1, %s8913_s27 }
   0xd   : > { %p348_p2 = scmp.ne.s32.totalorder %s8913_s27, %s8909_s26  ;;  %s10569_s14 = smov (!%p333_p0, %s7268_s14), 0 }
   0xe   : > { %s10571_s15 = smov (!%p336_p1, %s7269_s15), 0  ;;  %p349_p3 = scmp.eq.s32.totalorder %s8917_s28, 0 }
   0xf   : > { %p354_p4 = scmp.ne.s32.totalorder %s8909_s26, %s8905_s25  ;;  %s338_s17 = ssub.s32 %s10569_s14, %s10571_s15 }
  0x10   : > { %p355_p5 = scmp.eq.s32.totalorder %s9016_s29, 0  ;;  %p339_p6 = scmp.eq.s32.totalorder %s338_s17, 0 }
  0x11   : > { %p350_p7 = por %p349_p3, %p348_p2  ;;  %p8621_p9 = scmp.lt.s32.totalorder %s8917_s28, 12 }
  0x12   : > { %p9029_p8 = por %p355_p5, %p354_p4  ;;  %s484_s20 = sand.u32 1, %s8913_s27  }
  0x13   : > { %s9034_s19 = scalar_select %p339_p6, %s8913_s27, %s341_s16  }
  0x14   : > { %s8605_s21 = smul.u32 576, %s484_s20  ;;  %p9038_p10 = pnand %p8621_p9, %p350_p7 }
  0x15   : > { %10553 = sst [smem:[#allocation13_spill]] %s9034_s19  ;;  %s8606_s22 = smul.u32 9216, %s10569_s14 }
  0x16   : > { %s10555_s12 = sld [smem:[#allocation15_spill]]  ;;  %s488_s16 = scalar_lea.vmem [#allocation4], %s8605_s21 }
  0x17   : > { %s498_s17 = sshll.u32 %s488_s16, 4  ;;  %s9050_s14 = scalar_lea.sflag [#allocation5], %s484_s20  ;;  %s9047_s17 = int_to_ptr.vmem [resolvable:$true] %s498_s17 }
  0x18   : > { %p8825_p13 = pneg %p9038_p10 }
  0x1c   : > { %s9045_s15 = scalar_lea.hbm %s10555_s12, %s8606_s22  ;;  %s8828_s25 = scalar_lea.hbm %s10555_s12, 55296 }
  0x1d   : > { %s8823_s19 = scalar_lea.hbm %s9045_s15, 9216  ;;  %p8829_p2 = scmp.lt.u32.totalorder %s9045_s15, %s10555_s12 }
  0x1e   : > { %p8824_p12 = scmp.ne.s32.totalorder %s9045_s15, %s8823_s19  ;;  %p8830_p3 = scmp.lt.u32.totalorder %s8828_s25, %s8823_s19 }
  0x1f   : > { %p8832_p5 = scmp.lt.u32.totalorder %s8823_s19, %s9045_s15 }
  0x20   : > { %p8826_p0 = pnand %p8825_p13, %p8824_p12  ;;  %p8831_p4 = por %p8830_p3, %p8829_p2 }
  0x22   : > { %p8827_p1 = pneg %p8826_p0  ;;  %p8833_p6 = por %p8832_p5, %p8831_p4 }
  0x24   : > { %p8834_p7 = pnand %p8833_p6, %p8827_p1 }
  0x26   : > { %8837 = shalt.err (!%p8834_p7)
}
  0x27   : > { %s8838_s20 = scalar_lea.vmem %s9047_s17, 9216  ;;  %s8919_s16 = smov [#allocation4]  }
  0x28   : > { %p8839_p9 = scmp.ne.s32.totalorder %s9047_s17, %s8838_s20  ;;  %s8843_s22 = sshll.u32 %s8919_s16, 4  ;;  %s8844_s22 = int_to_ptr.vmem [resolvable:$false] %s8843_s22 }
  0x29   : > { %s8845_s27 = scalar_lea.vmem %s8844_s22, 18432  ;;  %p8846_p11 = scmp.lt.s32.totalorder %s9047_s17, %s8844_s22 }
  0x2a   : > { %p8841_p12 = pnand %p8839_p9, %p8825_p13  ;;  %p8847_p2 = scmp.lt.s32.totalorder %s8845_s27, %s8838_s20 }
  0x2c   : > { %p8842_p0 = pneg %p8841_p12  ;;  %p8848_p3 = por %p8847_p2, %p8846_p11 }
  0x2e   : > { %p8849_p4 = pnand %p8848_p3, %p8842_p0 }
  0x30   : > { %8852 = shalt.err (!%p8849_p4)
}
  0x31   : > { %s8920_s19 = smov 1024   ;;  %s8921_s24 = smov 64  }
  0x32   : > { %8620 = dma.hbm_to_vmem [thread:$0]  (!%p9038_p10), %s9045_s15, 9216, %s9047_s17, %s9050_s14, %s8920_s19, %s8920_s19, %s8921_s24  }
  0x33   : > { %p506_p13 = scmp.lt.s32.totalorder %s8917_s28, 13  ;;  %p10556_p1 = scmp.ge.s32.totalorder %s8917_s28, 1 }
  0x35   : > { %p507_p5 = pnand %p10556_p1, %p506_p13 }
  0x36   : > { %s512_s25 = sand.u32 (!%p507_p5), 1, %s8909_s26  }
  0x37   : > { %510 = sbr.rel (%p507_p5) target bundleno = 7170 (0x1c02), region = 72  ;;  %s513_s20 = scalar_lea.sflag (!%p507_p5), [#allocation5], %s512_s25 }
  0x38   : > { %s8607_s21 = smul.u32 (!%p507_p5), 576, %s512_s25 }
  0x3a   : > { %s9082_s16 = scalar_lea.vmem (!%p507_p5), [#allocation4], %s8607_s21 }
  0x3e   : > { %8896 = dma.done.wait (%p9029_p8), %s513_s20, 9216  }
  0x3f   : > { %8898 = vsyncadd (%p9029_p8), %s513_s20, 4294958080  ;;  %p591_p10 = scmp.lt.s32.totalorder %s9016_s29, 5  ;;  %s7288_s23 = sadd.s32 4294967290, %s9016_s29 }
  0x40   : > { %p619_p11 = scmp.gt.s32.totalorder %s7288_s23, 0  ;;  %p7289_p6 = scmp.lt.s32.totalorder %s7288_s23, 5 }
  0x41   : > { %s592_s28 = scalar_select %p591_p10, %s9016_s29, 5 }
  0x42   : > { %s10573_s23 = smov (!%p619_p11, %s7288_s23), 0  ;;  %p7303_p8 = scmp.ne.s32.totalorder %s9016_s29, 0 }
  0x43   : > { %s10575_s28 = smov (!%p591_p10, %s592_s28), 5  ;;  %s10577_s23 = smov (!%p7289_p6, %s10573_s23), 5 }
  0x44   : > { %s7599_s15 = sshll.u32 %s10575_s28, 6  ;;  %s8608_s17 = smul.u32 272, %s10575_s28  ;;  %v648_v0 = vld [vmem:[%s10526_s0] sm:$0xff] (!%p7303_p8)  ;;  %vm652_vm0 = vcmask (!%p7303_p8), 261120   ;;  %v649_v1 = vld [vmem:[%s10526_s0 + $0x8] sm:$0xff] (!%p7303_p8)  ;;  %v650_v2 = vld [vmem:[%s10526_s0 + $0x10] sm:$0xff] (!%p7303_p8) }
  0x45   : > { %s9094_s27 = scalar_lea.vmem %s10533_s7, %s7599_s15  ;;  %s8609_s18 = smul.u32 576, %s10575_s28  ;;  %653 = vst.msk [vmem:[#allocation2] sm:$0xff] (!%p7303_p8), %vm652_vm0, %v648_v0  ;;  %654 = vst.msk [vmem:[#allocation2 + $0x8] sm:$0xff] (!%p7303_p8), %vm652_vm0, %v649_v1  ;;  %v651_v3 = vld [vmem:[%s10526_s0 + $0x18] sm:$0xff] (!%p7303_p8)  ;;  %v657_v4 = vld [vmem:[%s10527_s1] sm:$0xff] (!%p7303_p8) }
  0x46   : > { %s9099_s25 = scalar_lea.vmem %s10534_s8, %s8608_s17  ;;  %s7602_s21 = sshll.u32 %s10577_s23, 5  ;;  %655 = vst.msk [vmem:[#allocation2 + $0x10] sm:$0xff] (!%p7303_p8), %vm652_vm0, %v650_v2  ;;  %v658_v5 = vld [vmem:[%s10527_s1 + $0x8] sm:$0xff] (!%p7303_p8)  ;;  %656 = vst.msk [vmem:[#allocation2 + $0x18] sm:$0xff] (!%p7303_p8), %vm652_vm0, %v651_v3 }
  0x47   : > { %s9104_s26 = scalar_lea.vmem %s10535_s9, %s8609_s18  ;;  %s9109_s6 = scalar_lea.vmem %s10536_s10, %s7602_s21  ;;  %659 = vst.msk [vmem:[#allocation3] sm:$0xff] (!%p7303_p8), %vm652_vm0, %v657_v4  ;;  %660 = vst.msk [vmem:[#allocation3 + $0x8] sm:$0xff] (!%p7303_p8), %vm652_vm0, %v658_v5 }
  0x48   : > { %s8610_s14 = smul.u32 352, %s10577_s23 }
  0x49   : > { %647 = sbr.rel (%p7303_p8) target bundleno = 80 (0x50), region = 80 }
  0x4a   : > { %s9114_s28 = scalar_lea.vmem %s10537_s11, %s8610_s14 }
  0x50 PF: > { %p7304_p7 = scmp.ge.s32.totalorder %s9016_s29, 6 }
  0x51   : > { %v9136_v6 = vld [vmem:[#allocation2] sm:$0xff] (!%p7304_p7)  ;;  %v9138_v7 = vld [vmem:[#allocation2 + $0x8] sm:$0xff] (!%p7304_p7)  ;;  %v9143_v11 = vld [vmem:[#allocation2 + $0x10] sm:$0xff] (!%p7304_p7)  ;;  %vm878_vm1 = vcmask (!%p7304_p7), 261120  }
  0x52   : > { %664 = sbr.rel (%p7304_p7) target bundleno = 2756 (0xac4), region = 84  ;;  %v677_v8 = vld [vmem:[%s9099_s25] sm:$0xff] (!%p7304_p7)  ;;  %v678_v9 = vld [vmem:[%s9099_s25 + $0x8] sm:$0xff] (!%p7304_p7)  ;;  %v9145_v12 = vld [vmem:[#allocation2 + $0x18] sm:$0xff] (!%p7304_p7) }
  0x53   : > { %v693_v10 = vmul.f32 (!%p7304_p7), %v677_v8, %v9136_v6  ;;  %v694_v13 = vmul.f32 (!%p7304_p7), %v678_v9, %v9138_v7  ;;  %v679_v14 = vld [vmem:[%s9099_s25 + $0x10] sm:$0xff] (!%p7304_p7)  ;;  %v680_v15 = vld [vmem:[%s9099_s25 + $0x18] sm:$0xff] (!%p7304_p7)  ;;  %v681_v16 = vld [vmem:[%s9099_s25 + $0x20] sm:$0xff] (!%p7304_p7) }
  0x54   : > { %v695_v17 = vmul.f32 (!%p7304_p7), %v679_v14, %v9143_v11  ;;  %v696_v18 = vmul.f32 (!%p7304_p7), %v680_v15, %v9145_v12  ;;  %v682_v19 = vld [vmem:[%s9099_s25 + $0x28] sm:$0xff] (!%p7304_p7)  ;;  %v697_v21 = vmul.f32 (!%p7304_p7), %v681_v16, %v9136_v6  ;;  %v683_v24 = vld [vmem:[%s9099_s25 + $0x30] sm:$0xff] (!%p7304_p7)  ;;  %v684_v25 = vld [vmem:[%s9099_s25 + $0x38] sm:$0xff] (!%p7304_p7) }
  0x55   : > { %v8245_v20 = vpack.c.bf16 (!%p7304_p7), %v694_v13, %v693_v10  ;;  %v698_v22 = vmul.f32 (!%p7304_p7), %v682_v19, %v9138_v7  ;;  %v669_v26 = vld [vmem:[%s9094_s27] sm:$0xff] (!%p7304_p7)  ;;  %v699_v28 = vmul.f32 (!%p7304_p7), %v683_v24, %v9143_v11  ;;  %v700_v29 = vmul.f32 (!%p7304_p7), %v684_v25, %v9145_v12  ;;  %v686_v31 = vld [vmem:[%s9099_s25 + $0x48] sm:$0xff] (!%p7304_p7)  ;;  %v687_v35 = vld [vmem:[%s9099_s25 + $0x50] sm:$0xff] (!%p7304_p7) }
  0x56   : > { %v8249_v23 = vpack.c.bf16 (!%p7304_p7), %v696_v18, %v695_v17  ;;  %7869 = vmatprep.mubr.f32.mxu1 (!%p7304_p7), %v669_v26  ;;  %v685_v30 = vld [vmem:[%s9099_s25 + $0x40] sm:$0xff] (!%p7304_p7)  ;;  %v702_v34 = vmul.f32 (!%p7304_p7), %v686_v31, %v9138_v7  ;;  %v688_v36 = vld [vmem:[%s9099_s25 + $0x58] sm:$0xff] (!%p7304_p7)  ;;  %v703_v38 = vmul.f32 (!%p7304_p7), %v687_v35, %v9143_v11  ;;  %v690_v41 = vld [vmem:[%s9099_s25 + $0x68] sm:$0xff] (!%p7304_p7) }
  0x57   : > { %8246 = vmatprep.subr.bf16.mxu1 (!%p7304_p7), %v8245_v20  ;;  %v8253_v27 = vpack.c.bf16 (!%p7304_p7), %v698_v22, %v697_v21  ;;  %v8257_v32 = vpack.c.bf16 (!%p7304_p7), %v700_v29, %v699_v28  ;;  %v701_v33 = vmul.f32 (!%p7304_p7), %v685_v30, %v9136_v6  ;;  %v704_v39 = vmul.f32 (!%p7304_p7), %v688_v36, %v9145_v12  ;;  %v689_v40 = vld [vmem:[%s9099_s25 + $0x60] sm:$0xff] (!%p7304_p7)  ;;  %v691_v45 = vld [vmem:[%s9099_s25 + $0x70] sm:$0xff] (!%p7304_p7)  ;;  %v692_v46 = vld [vmem:[%s9099_s25 + $0x78] sm:$0xff] (!%p7304_p7) }
  0x58   : > { %8248 = vmatpush3.bf16.msra.mxu1 (!%p7304_p7), %v8245_v20  ;;  %v705_v43 = vmul.f32 (!%p7304_p7), %v689_v40, %v9136_v6  ;;  %v706_v44 = vmul.f32 (!%p7304_p7), %v690_v41, %v9138_v7  ;;  %v707_v48 = vmul.f32 (!%p7304_p7), %v691_v45, %v9143_v11  ;;  %v708_v49 = vmul.f32 (!%p7304_p7), %v692_v46, %v9145_v12  ;;  %v822_v51 = vld [vmem:[%s9099_s25 + $0x80] sm:$0xff] (!%p7304_p7)  ;;  %v823_v52 = vld [vmem:[%s9099_s25 + $0x88] sm:$0xff] (!%p7304_p7)  ;;  %v824_v54 = vld [vmem:[%s9099_s25 + $0x90] sm:$0xff] (!%p7304_p7) }
  0x59   : > { %8250 = vmatprep.subr.bf16.mxu1 %v8249_v23  ;;  %v8261_v37 = vpack.c.bf16 %v702_v34, %v701_v33  ;;  %v8265_v42 = vpack.c.bf16 %v704_v39, %v703_v38  ;;  %v8277_v53 = vpack.c.bf16 %v823_v52, %v822_v51  ;;  %v825_v55 = vld [vmem:[%s9099_s25 + $0x98] sm:$0xff]  ;;  %v670_v56 = vld [vmem:[%s9094_s27 + $0x8] sm:$0xff]  ;;  %v671_v57 = vld [vmem:[%s9094_s27 + $0x10] sm:$0xff] }
  0x5a   : > { %v8269_v47 = vpack.c.bf16 %v706_v44, %v705_v43  ;;  %v8273_v50 = vpack.c.bf16 %v708_v49, %v707_v48  ;;  %v8281_v58 = vpack.c.bf16 %v825_v55, %v824_v54  ;;  %v672_v59 = vld [vmem:[%s9094_s27 + $0x18] sm:$0xff]  ;;  %v673_v60 = vld [vmem:[%s9094_s27 + $0x20] sm:$0xff]  ;;  %v674_v61 = vld [vmem:[%s9094_s27 + $0x28] sm:$0xff] }
  0x5b   : > { %v675_v62 = vld [vmem:[%s9094_s27 + $0x30] sm:$0xff]  ;;  %v676_v63 = vld [vmem:[%s9094_s27 + $0x38] sm:$0xff]  ;;  %v827_v0 = vld [vmem:[%s9099_s25 + $0xa0] sm:$0xff] }
  0x5c   : > { %8252 = vmatpush3.bf16.msra.mxu1 %v8249_v23  ;;  %v828_v1 = vld [vmem:[%s9099_s25 + $0xa8] sm:$0xff]  ;;  %v829_v4 = vld [vmem:[%s9099_s25 + $0xb0] sm:$0xff]  ;;  %v830_v5 = vld [vmem:[%s9099_s25 + $0xb8] sm:$0xff] }
  0x5d   : > { %8254 = vmatprep.subr.bf16.mxu1 %v8253_v27  ;;  %v8285_v2 = vpack.c.bf16 %v828_v1, %v827_v0  ;;  %v8289_v13 = vpack.c.bf16 %v830_v5, %v829_v4  ;;  %v832_v15 = vld [vmem:[%s9099_s25 + $0xc0] sm:$0xff]  ;;  %v833_v16 = vld [vmem:[%s9099_s25 + $0xc8] sm:$0xff]  ;;  %v834_v22 = vld [vmem:[%s9099_s25 + $0xd0] sm:$0xff] }
  0x5e   : > { %v8293_v20 = vpack.c.bf16 %v833_v16, %v832_v15  ;;  %v835_v23 = vld [vmem:[%s9099_s25 + $0xd8] sm:$0xff]  ;;  %v842_v35 = vld [vmem:[%s10528_s2] sm:$0xff]  ;;  %vm9231_vm2 = vmpackc.low %vm878_vm1, %vm878_vm1 }
  0x5f   : > { %v843_v52 = vld [vmem:[%s10528_s2 + $0x8] sm:$0xff]  ;;  %v846_v55 = vld [vmem:[%s10528_s2 + $0x20] sm:$0xff] }
  0x60   : > { %8256 = vmatpush3.bf16.msra.mxu1 %v8253_v27  ;;  %v8297_v27 = vpack.c.bf16 %v835_v23, %v834_v22  ;;  %v848_v23 = vld [vmem:[%s10528_s2 + $0x30] sm:$0xff]  ;;  %v858_v41 = vld [vmem:[%s10529_s3] sm:$0xff] }
  0x61   : > { %8258 = vmatprep.subr.bf16.mxu1 %v8257_v32 }
  0x64   : > { %8260 = vmatpush3.bf16.msra.mxu1 %v8257_v32  ;;  %v7305_v32 = vld [vmem:[%s9099_s25 + $0x100] ss:$0 sm:$0xff] }
  0x65   : > { %8262 = vmatprep.subr.bf16.mxu1 %v8261_v37 }
  0x68   : > { %8264 = vmatpush3.bf16.msra.mxu1 %v8261_v37 }
  0x69   : > { %8266 = vmatprep.subr.bf16.mxu1 %v8265_v42 }
  0x6c   : > { %8268 = vmatpush3.bf16.msra.mxu1 %v8265_v42 }
  0x6d   : > { %8270 = vmatprep.subr.bf16.mxu1 %v8269_v47 }
  0x70   : > { %8272 = vmatpush3.bf16.msra.mxu1 %v8269_v47  ;;  %v7315_v47 = vld [vmem:[%s9099_s25 + $0x102] ss:$0 sm:$0xff] }
  0x71   : > { %8274 = vmatprep.subr.bf16.mxu1 %v8273_v50 }
  0x74   : > { %8276 = vmatpush3.bf16.msra.mxu1 %v8273_v50 }
  0x75   : > { %8278 = vmatprep.subr.bf16.mxu1 %v8277_v53 }
  0x77   : > { %7870 = vmatmul.mubr.f32.vlgmr.msra.gmra.mrb[0].mxu1 %v670_v56 }
  0x78   : > { %7872 = vmatprep.mubr.f32.mxu1 %v671_v57  ;;  %8280 = vmatpush3.bf16.msra.mxu1 %v8277_v53  ;;  %v847_v53 = vld [vmem:[%s10528_s2 + $0x28] sm:$0xff] }
  0x79   : > { %8282 = vmatprep.subr.bf16.mxu1 %v8281_v58 }
  0x7b   : > { %7873 = vmatmul.mubr.f32.gmra.mrb[2].mxu1 %v672_v59 }
  0x7c   : > { %7875 = vmatprep.mubr.f32.mxu1 %v673_v60  ;;  %8284 = vmatpush3.bf16.msra.mxu1 %v8281_v58  ;;  %v851_v58 = vld [vmem:[%s10528_s2 + $0x48] sm:$0xff] }
  0x7d   : > { %8286 = vmatprep.subr.bf16.mxu1 %v8285_v2 }
  0x7f   : > { %7876 = vmatmul.mubr.f32.gmra.mrb[4].mxu1 %v674_v61 }
  0x80   : > { %7878 = vmatprep.mubr.f32.mxu1 %v675_v62  ;;  %v850_v62 = vld [vmem:[%s10528_s2 + $0x40] sm:$0xff] }
  0x83   : > { %7879 = vmatmul.mubr.f32.gmra.mrb[6].mxu1 %v676_v63 }
 0x14a   : > { %v7871_v3 = vpop.f32.mrb[0].mxu1 }
 0x14b   : > { %v775_v8 = vpop.f32.mrb[1].mxu1  ;;  %v815_v10 = vadd.f32 %v7871_v3, %v9138_v7 }
 0x14c   : > { %v814_v9 = vadd.f32 %v775_v8, %v9136_v6 }
 0x14e   : > { %v7874_v14 = vpop.f32.mrb[2].mxu1  ;;  %7889 = vmatprep.mubr.msk.f32.mxu1 %vm878_vm1, %v814_v9  ;;  %v844_v9 = vld [vmem:[%s10528_s2 + $0x10] sm:$0xff] }
 0x14f   : > { %v785_v17 = vpop.f32.mrb[3].mxu1  ;;  %7890 = vmatmul.mubr.msk.f32.vlgmr.msra.gmra.mrb[8].mxu1 %vm878_vm1, %v815_v10  ;;  %v817_v19 = vadd.f32 %v7874_v14, %v9145_v12 }
 0x150   : > { %v816_v18 = vadd.f32 %v785_v17, %v9143_v11  ;;  %8288 = vmatpush3.bf16.msra.mxu1 %v8285_v2  ;;  %v845_v2 = vld [vmem:[%s10528_s2 + $0x18] sm:$0xff] }
 0x151   : > { %8290 = vmatprep.subr.bf16.mxu1 %v8289_v13 }
 0x152   : > { %v7877_v21 = vpop.f32.mrb[4].mxu1  ;;  %7892 = vmatprep.mubr.msk.f32.mxu1 %vm878_vm1, %v816_v18 }
 0x153   : > { %v795_v24 = vpop.f32.mrb[5].mxu1  ;;  %7893 = vmatmul.mubr.msk.f32.gmra.mrb[10].mxu1 %vm878_vm1, %v817_v19  ;;  %v819_v26 = vadd.f32 %v7877_v21, %v9138_v7 }
 0x154   : > { %v818_v25 = vadd.f32 %v795_v24, %v9136_v6  ;;  %8292 = vmatpush3.bf16.msra.mxu1 %v8289_v13 }
 0x155   : > { %8294 = vmatprep.subr.bf16.mxu1 %v8293_v20 }
 0x156   : > { %7903 = vmatprep.mubr.msk.f32.mxu1 %vm878_vm1, %v818_v25  ;;  %v7880_v28 = vpop.f32.mrb[6].mxu1 }
 0x157   : > { %v821_v29 = vadd.f32 %v7880_v28, %v9145_v12  ;;  %7904 = vmatmul.mubr.msk.f32.vlgmr.msra.gmra.mrb[12].mxu1 %vm878_vm1, %v819_v26  ;;  %v805_v30 = vpop.f32.mrb[7].mxu1  ;;  %v849_v26 = vld [vmem:[%s10528_s2 + $0x38] sm:$0xff] }
 0x158   : > { %v820_v31 = vadd.f32 %v805_v30, %v9143_v11  ;;  %8296 = vmatpush3.bf16.msra.mxu1 %v8293_v20 }
 0x159   : > { %8298 = vmatprep.subr.bf16.mxu1 %v8297_v27 }
 0x15a   : > { %7906 = vmatprep.mubr.msk.f32.mxu1 %vm878_vm1, %v820_v31 }
 0x15b   : > { %7907 = vmatmul.mubr.msk.f32.gmra.mrb[14].mxu1 %vm878_vm1, %v821_v29  ;;  %v9302_v29 = vld [vmem:[%s10528_s2 + $0x50] sm:$0xff] }
 0x15c   : > { %8300 = vmatpush3.bf16.msra.mxu1 %v8297_v27  ;;  %7917 = vmatprep.mubr.msk.f32.mxu1 %vm878_vm1, %v9136_v6 }
 0x15f   : > { %7918 = vmatmul.mubr.msk.f32.vlgmr.msra.gmra.mrb[16].mxu1 %vm878_vm1, %v9138_v7 }
 0x160   : > { %7920 = vmatprep.mubr.msk.f32.mxu1 %vm878_vm1, %v9143_v11  ;;  %v7310_v11 = vld [vmem:[%s9099_s25 + $0x101] ss:$0 sm:$0xff] }
 0x163   : > { %7921 = vmatmul.mubr.msk.f32.gmra.mrb[18].mxu1 %vm878_vm1, %v9145_v12 }
 0x222   : > { %v7891_v33 = vpop.f32.mrb[8].mxu1 }
 0x223   : > { %v957_v34 = vpop.f32.mrb[9].mxu1  ;;  %v963_v13 = vadd.f32 %v7891_v33, %v7305_v32  ;;  %v9315_v33 = vld [vmem:[%s10528_s2 + $0x60] sm:$0xff] }
 0x224   : > { %v9224_v36 = vadd.f32 %v7305_v32, %v957_v34 }
 0x225   : > { %v1179_v18 = vmul.f32 %v963_v13, %v843_v52  ;;  %v1183_v24 = vmul.f32 %v963_v13, %v847_v53  ;;  %v1187_v30 = vmul.f32 %v963_v13, %v851_v58 }
 0x226   : > { %v7894_v37 = vpop.f32.mrb[10].mxu1  ;;  %v1178_v6 = vmul.f32 %v9224_v36, %v842_v35  ;;  %v1182_v22 = vmul.f32 %v9224_v36, %v846_v55  ;;  %v1186_v28 = vmul.f32 %v9224_v36, %v850_v62 }
 0x227   : > { %v967_v7 = vpop.f32.mrb[11].mxu1  ;;  %v973_v19 = vadd.f32 %v7894_v37, %v7305_v32  ;;  %v9324_v37 = vld [vmem:[%s10528_s2 + $0x68] sm:$0xff] }
 0x228   : > { %7931 = vmatprep.mubr.msk.f32.mxu1 %vm878_vm1, %v1178_v6  ;;  %v968_v15 = vadd.f32 %v7305_v32, %v967_v7  ;;  %v9309_v32 = vld [vmem:[%s10528_s2 + $0x58] sm:$0xff]  ;;  %v9330_v6 = vld [vmem:[%s10528_s2 + $0x70] sm:$0xff]  ;;  %v1191_v7 = vmul.f32 %v963_v13, %v9324_v37 }
 0x229   : > { %v1181_v21 = vmul.f32 %v973_v19, %v845_v2  ;;  %v1185_v27 = vmul.f32 %v973_v19, %v849_v26  ;;  %v1189_v34 = vmul.f32 %v973_v19, %v9309_v32  ;;  %v868_v13 = vld [vmem:[%s10529_s3 + $0x50] sm:$0xff] }
 0x22a   : > { %v7905_v38 = vpop.f32.mrb[12].mxu1  ;;  %v1180_v20 = vmul.f32 %v968_v15, %v844_v9  ;;  %v1184_v25 = vmul.f32 %v968_v15, %v848_v23  ;;  %v1188_v31 = vmul.f32 %v968_v15, %v9302_v29 }
 0x22b   : > { %v1064_v39 = vadd.f32 %v7905_v38, %v7310_v11  ;;  %v1058_v12 = vpop.f32.mrb[13].mxu1 }
 0x22c   : > { %v1059_v40 = vadd.f32 %v7310_v11, %v1058_v12 }
 0x22e   : > { %v8301_v42 = vpack.c.bf16 %v1064_v39, %v1059_v40  ;;  %v7908_v43 = vpop.f32.mrb[14].mxu1 }
 0x22f   : > { %v1074_v44 = vadd.f32 %v7908_v43, %v7310_v11  ;;  %v1068_v45 = vpop.f32.mrb[15].mxu1  ;;  %v859_v43 = vld [vmem:[%s10529_s3 + $0x8] sm:$0xff] }
 0x230   : > { %v1069_v46 = vadd.f32 %v7310_v11, %v1068_v45  ;;  %8303 = vmatprep.subr.msk.bf16.mxu1 %vm9231_vm2, %v8301_v42  ;;  %v1192_v11 = vmul.f32 %v968_v15, %v9330_v6 }
 0x231   : > { %8306 = vmatpush3.bf16.xpose.msk.msra.mxu1 %vm9231_vm2, %v8301_v42 }
 0x232   : > { %v8307_v48 = vpack.c.bf16 %v1074_v44, %v1069_v46  ;;  %v7919_v49 = vpop.f32.mrb[16].mxu1  ;;  %v861_v46 = vld [vmem:[%s10529_s3 + $0x18] sm:$0xff] }
 0x233   : > { %v9240_v50 = vadd.f32 %v7919_v49, %v7315_v47  ;;  %v1159_v51 = vpop.f32.mrb[17].mxu1  ;;  %v860_v49 = vld [vmem:[%s10529_s3 + $0x10] sm:$0xff] }
 0x234   : > { %8309 = vmatprep.subr.msk.bf16.mxu1 %vm9231_vm2, %v8307_v48  ;;  %v9250_v54 = vadd.f32 %v7315_v47, %v1159_v51 }
 0x235   : > { %v1195_v56 = vmul.f32 %v9240_v50, %v843_v52  ;;  %v1199_v57 = vmul.f32 %v9240_v50, %v847_v53  ;;  %v1203_v1 = vmul.f32 %v9240_v50, %v851_v58 }
 0x236   : > { %v7922_v59 = vpop.f32.mrb[18].mxu1  ;;  %v1194_v60 = vmul.f32 %v9250_v54, %v842_v35  ;;  %v1198_v61 = vmul.f32 %v9250_v54, %v846_v55  ;;  %v1202_v8 = vmul.f32 %v9250_v54, %v850_v62  ;;  %v1190_v35 = vmul.f32 %v9224_v36, %v9315_v33  ;;  %v9338_v36 = vld [vmem:[%s10528_s2 + $0x78] sm:$0xff] }
 0x237   : > { %v9265_v63 = vadd.f32 %v7922_v59, %v7315_v47  ;;  %v1169_v0 = vpop.f32.mrb[19].mxu1  ;;  %v1193_v38 = vmul.f32 %v973_v19, %v9338_v36 }
 0x238   : > { %v9271_v3 = vadd.f32 %v7315_v47, %v1169_v0  ;;  %v8321_v4 = vpack.c.bf16 %v1195_v56, %v1194_v60  ;;  %v8313_v5 = vpack.c.bf16 %v1199_v57, %v1198_v61  ;;  %v9281_v17 = vpack.c.bf16 %v1203_v1, %v1202_v8  ;;  %v867_v0 = vld [vmem:[%s10529_s3 + $0x48] sm:$0xff]  ;;  %v866_v1 = vld [vmem:[%s10529_s3 + $0x40] sm:$0xff] }
 0x239   : > { %8312 = vmatpush3.bf16.xpose.msk.msra.mxu1 %vm9231_vm2, %v8307_v48  ;;  %v1197_v10 = vmul.f32 %v9265_v63, %v845_v2  ;;  %v1201_v12 = vmul.f32 %v9265_v63, %v849_v26  ;;  %v863_v26 = vld [vmem:[%s10529_s3 + $0x28] sm:$0xff] }
 0x23a   : > { %8322 = vmatprep.subr.bf16.mxu0 %v8321_v4  ;;  %v1196_v14 = vmul.f32 %v9271_v3, %v844_v9  ;;  %8314 = vmatprep.subr.bf16.mxu1 %v8313_v5  ;;  %v1200_v39 = vmul.f32 %v9271_v3, %v848_v23  ;;  %v869_v9 = vld [vmem:[%s10529_s3 + $0x58] sm:$0xff] }
 0x23b   : > { %8324 = vmatpush3.bf16.msra.mxu0 %v8321_v4 }
 0x23c   : > { %v8325_v16 = vpack.c.bf16 %v1197_v10, %v1196_v14  ;;  %v8317_v40 = vpack.c.bf16 %v1201_v12, %v1200_v39  ;;  %v872_v12 = vld [vmem:[%s10529_s3 + $0x70] sm:$0xff] }
 0x23e   : > { %8326 = vmatprep.subr.bf16.mxu0 %v8325_v16 }
 0x23f   : > { %8328 = vmatpush3.bf16.msra.mxu0 %v8325_v16  ;;  %v862_v16 = vld [vmem:[%s10529_s3 + $0x20] sm:$0xff] }
 0x240   : > { %7932 = vmatmul.mubr.msk.f32.vlgmr.msra.gmra.mrb[20].mxu1 %vm878_vm1, %v1179_v18  ;;  %8330 = vmatprep.subr.bf16.mxu0 %v9281_v17 }
 0x241   : > { %7934 = vmatprep.mubr.msk.f32.mxu1 %vm878_vm1, %v1180_v20  ;;  %8316 = vmatpush3.bf16.msra.mxu1 %v8313_v5 }
 0x242   : > { %8318 = vmatprep.subr.bf16.mxu1 %v8317_v40 }
 0x244   : > { %7935 = vmatmul.mubr.msk.f32.gmra.mrb[22].mxu1 %vm878_vm1, %v1181_v21 }
 0x245   : > { %7937 = vmatprep.mubr.msk.f32.mxu1 %vm878_vm1, %v1182_v22  ;;  %8320 = vmatpush3.bf16.msra.mxu1 %v8317_v40  ;;  %v870_v22 = vld [vmem:[%s10529_s3 + $0x60] sm:$0xff] }
 0x248   : > { %7938 = vmatmul.mubr.msk.f32.gmra.mrb[24].mxu1 %vm878_vm1, %v1183_v24 }
 0x249   : > { %7940 = vmatprep.mubr.msk.f32.mxu1 %vm878_vm1, %v1184_v25 }
 0x24c   : > { %7941 = vmatmul.mubr.msk.f32.gmra.mrb[26].mxu1 %vm878_vm1, %v1185_v27  ;;  %v871_v27 = vld [vmem:[%s10529_s3 + $0x68] sm:$0xff] }
 0x24d   : > { %7943 = vmatprep.mubr.msk.f32.mxu1 %vm878_vm1, %v1186_v28 }
 0x250   : > { %7944 = vmatmul.mubr.msk.f32.gmra.mrb[28].mxu1 %vm878_vm1, %v1187_v30 }
 0x251   : > { %7946 = vmatprep.mubr.msk.f32.mxu1 %vm878_vm1, %v1188_v31 }
 0x254   : > { %7947 = vmatmul.mubr.msk.f32.gmra.mrb[30].mxu1 %vm878_vm1, %v1189_v34 }
 0x255   : > { %7949 = vmatprep.mubr.msk.f32.mxu1 %vm878_vm1, %v1190_v35 }
 0x258   : > { %7950 = vmatmul.mubr.msk.f32.gmra.mrb[32].mxu1 %vm878_vm1, %v1191_v7 }
 0x259   : > { %7952 = vmatprep.mubr.msk.f32.mxu1 %vm878_vm1, %v1192_v11 }
 0x25c   : > { %7953 = vmatmul.mubr.msk.f32.gmra.mrb[34].mxu1 %vm878_vm1, %v1193_v38  ;;  %v864_v38 = vld [vmem:[%s10529_s3 + $0x30] sm:$0xff] }
 0x313   : > { %v7933_v42 = vpop.f32.mrb[20].mxu1 }
 0x314   : > { %v1336_v44 = vpop.f32.mrb[21].mxu1  ;;  %v9357_v47 = vadd.f32 %v7933_v42, %v859_v43 }
 0x315   : > { %v9352_v45 = vadd.f32 %v1336_v44, %v858_v41  ;;  %v865_v44 = vld [vmem:[%s10529_s3 + $0x38] sm:$0xff] }
 0x316   : > { %v1418_v58 = vsel %vm878_vm1, %v9357_v47, -inf }
 0x317   : > { %v7936_v48 = vpop.f32.mrb[22].mxu1  ;;  %v1415_v51 = vsel %vm878_vm1, %v9352_v45, -inf }
 0x318   : > { %v9364_v52 = vadd.f32 %v7936_v48, %v861_v46  ;;  %v1346_v53 = vpop.f32.mrb[23].mxu1  ;;  %1416 = vmax.xlane.f32.xlu0 %v1415_v51  ;;  %v873_v46 = vld [vmem:[%s10529_s3 + $0x78] sm:$0xff] }
 0x319   : > { %v9366_v55 = vadd.f32 %v1346_v53, %v860_v49 }
 0x31a   : > { %v1424_v56 = vsel %vm878_vm1, %v9364_v52, -inf }
 0x31b   : > { %1425 = vmax.xlane.f32.xlu1 %v1424_v56  ;;  %v7939_v57 = vpop.f32.mrb[24].mxu1  ;;  %v1421_v60 = vsel %vm878_vm1, %v9366_v55, -inf }
 0x31c   : > { %v1356_v59 = vpop.f32.mrb[25].mxu1  ;;  %1419 = vmax.xlane.f32.xlu0 %v1418_v58  ;;  %v9418_v31 = vadd.f32 %v7939_v57, %v863_v26 }
 0x31d   : > { %v9406_v23 = vadd.f32 %v1356_v59, %v862_v16 }
 0x31e   : > { %v1430_v43 = vsel %vm878_vm1, %v9418_v31, -inf }
 0x31f   : > { %v7942_v61 = vpop.f32.mrb[26].mxu1  ;;  %1422 = vmax.xlane.f32.xlu1 %v1421_v60  ;;  %v1427_v11 = vsel %vm878_vm1, %v9406_v23, -inf }
 0x320   : > { %v1366_v62 = vpop.f32.mrb[27].mxu1  ;;  %v9446_v48 = vadd.f32 %v7942_v61, %v865_v44 }
 0x321   : > { %v9432_v40 = vadd.f32 %v1366_v62, %v864_v38 }
 0x322   : > { %v1436_v57 = vsel %vm878_vm1, %v9446_v48, -inf }
 0x323   : > { %v7945_v2 = vpop.f32.mrb[28].mxu1  ;;  %v1433_v53 = vsel %vm878_vm1, %v9432_v40, -inf }
 0x324   : > { %v9380_v4 = vadd.f32 %v7945_v2, %v867_v0  ;;  %v1376_v5 = vpop.f32.mrb[29].mxu1 }
 0x325   : > { %v9382_v8 = vadd.f32 %v1376_v5, %v866_v1 }
 0x326   : > { %v1442_v10 = vsel %vm878_vm1, %v9380_v4, -inf }
 0x327   : > { %v7948_v14 = vpop.f32.mrb[30].mxu1  ;;  %1443 = vmax.xlane.f32.xlu1 %v1442_v10  ;;  %v1439_v15 = vsel %vm878_vm1, %v9382_v8, -inf }
 0x328   : > { %v9397_v18 = vadd.f32 %v7948_v14, %v869_v9  ;;  %v1386_v19 = vpop.f32.mrb[31].mxu1  ;;  %1440 = vmax.xlane.f32.xlu0 %v1439_v15 }
 0x329   : > { %v9399_v20 = vadd.f32 %v1386_v19, %v868_v13 }
 0x32a   : > { %v1448_v21 = vsel %vm878_vm1, %v9397_v18, -inf }
 0x32b   : > { %v7951_v24 = vpop.f32.mrb[32].mxu1  ;;  %1449 = vmax.xlane.f32.xlu1 %v1448_v21  ;;  %v1445_v25 = vsel %vm878_vm1, %v9399_v20, -inf }
 0x32c   : > { %v1396_v28 = vpop.f32.mrb[33].mxu1  ;;  %1446 = vmax.xlane.f32.xlu0 %v1445_v25  ;;  %v9420_v34 = vadd.f32 %v7951_v24, %v871_v27 }
 0x32d   : > { %v9416_v30 = vadd.f32 %v1396_v28, %v870_v22 }
 0x32e   : > { %v1454_v42 = vsel %vm878_vm1, %v9420_v34, -inf }
 0x32f   : > { %v7954_v35 = vpop.f32.mrb[34].mxu1  ;;  %v1451_v7 = vsel %vm878_vm1, %v9416_v30, -inf }
 0x330   : > { %v1406_v39 = vpop.f32.mrb[35].mxu1  ;;  %1452 = vmax.xlane.f32.xlu1 %v1451_v7  ;;  %1428 = vmax.xlane.f32.xlu0 %v1427_v11  ;;  %v9448_v49 = vadd.f32 %v7954_v35, %v873_v46 }
 0x331   : > { %v9434_v41 = vadd.f32 %v1406_v39, %v872_v12 }
 0x332   : > { %v1460_v56 = vsel %vm878_vm1, %v9448_v49, -inf }
 0x333   : > { %v1457_v51 = vsel %vm878_vm1, %v9434_v41, -inf }
 0x334   : > { %1455 = vmax.xlane.f32.xlu1 %v1454_v42  ;;  %1431 = vmax.xlane.f32.xlu0 %v1430_v43 }
 0x338   : > { %1458 = vmax.xlane.f32.xlu1 %v1457_v51  ;;  %1434 = vmax.xlane.f32.xlu0 %v1433_v53 }
 0x33c   : > { %1461 = vmax.xlane.f32.xlu1 %v1460_v56  ;;  %1437 = vmax.xlane.f32.xlu0 %v1436_v57 }
 0x3a5   : > { %v1417_v58 = vpop.xlane.xlu0 %1416 }
 0x3a6   : > { %v1463_v59 = vsub.f32 %v9352_v45, %v1417_v58 }
 0x3a8   : > { %v1479_v60 = vmul.f32 1.442695, %v1463_v59  ;;  %v1426_v61 = vpop.xlane.xlu1 %1425 }
 0x3a9   : > { %v1466_v62 = vsub.f32 %v9364_v52, %v1426_v61  ;;  %v1420_v0 = vpop.xlane.xlu0 %1419 }
 0x3aa   : > { %8663 = vpow2.f32 %v1479_v60  ;;  %v1464_v1 = vsub.f32 %v9357_v47, %v1420_v0 }
 0x3ab   : > { %v1485_v2 = vmul.f32 1.442695, %v1466_v62 }
 0x3ac   : > { %v1481_v5 = vmul.f32 1.442695, %v1464_v1  ;;  %v1423_v9 = vpop.xlane.xlu1 %1422 }
 0x3ad   : > { %v1465_v10 = vsub.f32 %v9366_v55, %v1423_v9 }
 0x3ae   : > { %8665 = vpow2.f32 %v1481_v5 }
 0x3af   : > { %v1483_v13 = vmul.f32 1.442695, %v1465_v10  ;;  %8667 = vpow2.f32 %v1485_v2 }
 0x3b1   : > { %8669 = vpow2.f32 %v1483_v13 }
 0x3b4   : > { %v9462_v14 = vpop.eup %8663  ;;  %v1444_v45 = vpop.xlane.xlu1 %1443 }
 0x3b5   : > { %v1472_v15 = vsub.f32 %v9380_v4, %v1444_v45  ;;  %v1441_v16 = vpop.xlane.xlu0 %1440  ;;  %v1511_v52 = vsel %vm878_vm1, %v9462_v14, 0.0 }
 0x3b6   : > { %v1471_v47 = vsub.f32 %v9382_v8, %v1441_v16  ;;  %1512 = vadd.xlane.f32.xlu0 %v1511_v52 }
 0x3b7   : > { %v1497_v19 = vmul.f32 1.442695, %v1472_v15 }
 0x3b8   : > { %v9468_v21 = vpop.eup %8665  ;;  %v1495_v55 = vmul.f32 1.442695, %v1471_v47  ;;  %v1450_v22 = vpop.xlane.xlu1 %1449 }
 0x3b9   : > { %8671 = vpow2.f32 %v1497_v19  ;;  %v1474_v24 = vsub.f32 %v9397_v18, %v1450_v22  ;;  %v1447_v25 = vpop.xlane.xlu0 %1446  ;;  %v1514_v26 = vsel %vm878_vm1, %v9468_v21, 0.0  ;;  %v9473_v4 = vpop.eup %8667 }
 0x3ba   : > { %8673 = vpow2.f32 %v1495_v55  ;;  %v1473_v27 = vsub.f32 %v9399_v20, %v1447_v25  ;;  %1515 = vadd.xlane.f32.xlu1 %v1514_v26  ;;  %v1520_v38 = vsel %vm878_vm1, %v9473_v4, 0.0 }
 0x3bb   : > { %v9476_v8 = vpop.eup %8669  ;;  %v1501_v28 = vmul.f32 1.442695, %v1474_v24 }
 0x3bc   : > { %v1499_v35 = vmul.f32 1.442695, %v1473_v27  ;;  %v1517_v7 = vsel %vm878_vm1, %v9476_v8, 0.0 }
 0x3bd   : > { %8675 = vpow2.f32 %v1501_v28  ;;  %v1453_v11 = vpop.xlane.xlu1 %1452  ;;  %1518 = vadd.xlane.f32.xlu0 %v1517_v7  ;;  %v1429_v18 = vpop.xlane.xlu0 %1428 }
 0x3be   : > { %8677 = vpow2.f32 %v1499_v35  ;;  %v1475_v39 = vsub.f32 %v9416_v30, %v1453_v11  ;;  %v1467_v20 = vsub.f32 %v9406_v23, %v1429_v18  ;;  %1521 = vadd.xlane.f32.xlu1 %v1520_v38  ;;  %v837_v11 = vld [vmem:[%s9099_s25 + $0xe0] sm:$0xff]  ;;  %v838_v18 = vld [vmem:[%s9099_s25 + $0xe8] sm:$0xff] }
 0x3bf   : > { %v9540_v38 = vpack.c.bf16 %v838_v18, %v837_v11  ;;  %v839_v11 = vld [vmem:[%s9099_s25 + $0xf0] sm:$0xff] }
 0x3c0   : > { %v1503_v12 = vmul.f32 1.442695, %v1475_v39  ;;  %v1487_v42 = vmul.f32 1.442695, %v1467_v20 }
 0x3c1   : > { %v1456_v43 = vpop.xlane.xlu1 %1455  ;;  %v1432_v44 = vpop.xlane.xlu0 %1431  ;;  %8346 = vmatprep.subr.bf16.mxu1 %v9540_v38 }
 0x3c2   : > { %8679 = vpow2.f32 %v1503_v12  ;;  %v1476_v46 = vsub.f32 %v9420_v34, %v1456_v43  ;;  %v1468_v51 = vsub.f32 %v9418_v31, %v1432_v44 }
 0x3c3   : > { %v9486_v53 = vpop.eup %8671  ;;  %8681 = vpow2.f32 %v1487_v42 }
 0x3c4   : > { %v9488_v56 = vpop.eup %8673  ;;  %v1505_v57 = vmul.f32 1.442695, %v1476_v46  ;;  %v1489_v58 = vmul.f32 1.442695, %v1468_v51  ;;  %v1538_v23 = vsel %vm878_vm1, %v9486_v53, 0.0  ;;  %v1204_v46 = vmul.f32 %v9271_v3, %v9302_v29 }
 0x3c5   : > { %v1459_v30 = vpop.xlane.xlu1 %1458  ;;  %1539 = vadd.xlane.f32.xlu1 %v1538_v23  ;;  %v1435_v59 = vpop.xlane.xlu0 %1434  ;;  %v1535_v60 = vsel %vm878_vm1, %v9488_v56, 0.0  ;;  %v1205_v51 = vmul.f32 %v9265_v63, %v9309_v32  ;;  %v1207_v29 = vmul.f32 %v9240_v50, %v9324_v37 }
 0x3c6   : > { %8683 = vpow2.f32 %v1505_v57  ;;  %v1477_v34 = vsub.f32 %v9434_v41, %v1459_v30  ;;  %v1469_v31 = vsub.f32 %v9432_v40, %v1435_v59  ;;  %1536 = vadd.xlane.f32.xlu0 %v1535_v60 }
 0x3c7   : > { %v9496_v61 = vpop.eup %8675  ;;  %8685 = vpow2.f32 %v1489_v58  ;;  %v8333_v60 = vpack.c.bf16 %v1205_v51, %v1204_v46 }
 0x3c8   : > { %v9498_v62 = vpop.eup %8677  ;;  %v1507_v0 = vmul.f32 1.442695, %v1477_v34  ;;  %v1491_v1 = vmul.f32 1.442695, %v1469_v31  ;;  %v1544_v2 = vsel %vm878_vm1, %v9496_v61, 0.0 }
 0x3c9   : > { %v1462_v5 = vpop.xlane.xlu1 %1461  ;;  %1545 = vadd.xlane.f32.xlu1 %v1544_v2  ;;  %v1438_v9 = vpop.xlane.xlu0 %1437  ;;  %v1541_v10 = vsel %vm878_vm1, %v9498_v62, 0.0 }
 0x3ca   : > { %8687 = vpow2.f32 %v1507_v0  ;;  %v1478_v40 = vsub.f32 %v9448_v49, %v1462_v5  ;;  %v1470_v41 = vsub.f32 %v9446_v48, %v1438_v9  ;;  %1542 = vadd.xlane.f32.xlu0 %v1541_v10 }
 0x3cb   : > { %8689 = vpow2.f32 %v1491_v1 }
 0x3cc   : > { %v9506_v13 = vpop.eup %8679  ;;  %v1509_v45 = vmul.f32 1.442695, %v1478_v40  ;;  %v1493_v15 = vmul.f32 1.442695, %v1470_v41 }
 0x3cd   : > { %v9508_v16 = vpop.eup %8681  ;;  %v1547_v52 = vsel %vm878_vm1, %v9506_v13, 0.0 }
 0x3ce   : > { %8691 = vpow2.f32 %v1509_v45  ;;  %1548 = vadd.xlane.f32.xlu1 %v1547_v52  ;;  %v1523_v47 = vsel %vm878_vm1, %v9508_v16, 0.0 }
 0x3cf   : > { %8693 = vpow2.f32 %v1493_v15  ;;  %1524 = vadd.xlane.f32.xlu0 %v1523_v47 }
 0x3d0   : > { %v9514_v49 = vpop.eup %8683 }
 0x3d1   : > { %v9516_v48 = vpop.eup %8685  ;;  %v1550_v19 = vsel %vm878_vm1, %v9514_v49, 0.0 }
 0x3d2   : > { %1551 = vadd.xlane.f32.xlu1 %v1550_v19  ;;  %v1526_v55 = vsel %vm878_vm1, %v9516_v48, 0.0 }
 0x3d3   : > { %1527 = vadd.xlane.f32.xlu0 %v1526_v55 }
 0x3d4   : > { %v9522_v22 = vpop.eup %8687 }
 0x3d5   : > { %v9524_v24 = vpop.eup %8689  ;;  %v1553_v25 = vsel %vm878_vm1, %v9522_v22, 0.0 }
 0x3d6   : > { %1554 = vadd.xlane.f32.xlu1 %v1553_v25  ;;  %v1529_v26 = vsel %vm878_vm1, %v9524_v24, 0.0 }
 0x3d7   : > { %1530 = vadd.xlane.f32.xlu0 %v1529_v26 }
 0x3d8   : > { %v9530_v27 = vpop.eup %8691 }
 0x3d9   : > { %v9532_v28 = vpop.eup %8693  ;;  %v1556_v35 = vsel %vm878_vm1, %v9530_v27, 0.0 }
 0x3da   : > { %1557 = vadd.xlane.f32.xlu1 %v1556_v35  ;;  %v1532_v7 = vsel %vm878_vm1, %v9532_v28, 0.0 }
 0x3db   : > { %1533 = vadd.xlane.f32.xlu0 %v1532_v7 }
 0x443   : > { %v1513_v39 = vpop.xlane.xlu0 %1512 }
 0x444   : > { %8695 = vrcp.f32 %v1513_v39 }
 0x447   : > { %v1516_v20 = vpop.xlane.xlu1 %1515 }
 0x448   : > { %8697 = vrcp.f32 %v1516_v20 }
 0x44a   : > { %v1519_v12 = vpop.xlane.xlu0 %1518 }
 0x44b   : > { %8699 = vrcp.f32 %v1519_v12  ;;  %v1522_v42 = vpop.xlane.xlu1 %1521 }
 0x44c   : > { %8701 = vrcp.f32 %v1522_v42 }
 0x44e   : > { %v8696_v43 = vpop.eup %8695 }
 0x44f   : > { %v1575_v44 = vmul.f32 %v8696_v43, %v9462_v14  ;;  %v1206_v14 = vmul.f32 %v9250_v54, %v9315_v33 }
 0x451   : > { %7977 = vmatprep.mubr.msk.f32.mxu0 %vm878_vm1, %v1575_v44  ;;  %v8337_v54 = vpack.c.bf16 %v1207_v29, %v1206_v14 }
 0x452   : > { %v8698_v57 = vpop.eup %8697  ;;  %v1540_v58 = vpop.xlane.xlu1 %1539 }
 0x453   : > { %8703 = vrcp.f32 %v1540_v58  ;;  %v1537_v23 = vpop.xlane.xlu0 %1536  ;;  %v1576_v30 = vmul.f32 %v8698_v57, %v9468_v21  ;;  %v7356_v57 = vld [vmem:[%s9099_s25 + $0x103] ss:$0 sm:$0xff] }
 0x454   : > { %8705 = vrcp.f32 %v1537_v23 }
 0x455   : > { %v8700_v59 = vpop.eup %8699  ;;  %7978 = vmatmul.mubr.msk.f32.vlgmr.msra.gmra.mrb[0].mxu0 %vm878_vm1, %v1576_v30 }
 0x456   : > { %v8702_v34 = vpop.eup %8701  ;;  %8332 = vmatpush3.bf16.msra.mxu0 %v9281_v17  ;;  %v1546_v32 = vpop.xlane.xlu1 %1545  ;;  %v1577_v31 = vmul.f32 %v8700_v59, %v9476_v8  ;;  %v1208_v8 = vmul.f32 %v9271_v3, %v9330_v6 }
 0x457   : > { %8707 = vrcp.f32 %v1546_v32  ;;  %8334 = vmatprep.subr.bf16.mxu0 %v8333_v60  ;;  %v1543_v21 = vpop.xlane.xlu0 %1542  ;;  %v1578_v0 = vmul.f32 %v8702_v34, %v9473_v4  ;;  %v1209_v4 = vmul.f32 %v9265_v63, %v9338_v36 }
 0x458   : > { %8709 = vrcp.f32 %v1543_v21  ;;  %7980 = vmatprep.mubr.msk.f32.mxu0 %vm878_vm1, %v1577_v31 }
 0x459   : > { %7981 = vmatmul.mubr.msk.f32.gmra.mrb[2].mxu0 %vm878_vm1, %v1578_v0  ;;  %v8341_v41 = vpack.c.bf16 %v1209_v4, %v1208_v8 }
 0x45a   : > { %8336 = vmatpush3.bf16.msra.mxu0 %v8333_v60 }
 0x45b   : > { %8338 = vmatprep.subr.bf16.mxu0 %v8337_v54  ;;  %v1549_v50 = vpop.xlane.xlu1 %1548 }
 0x45c   : > { %8711 = vrcp.f32 %v1549_v50  ;;  %v1525_v33 = vpop.xlane.xlu0 %1524 }
 0x45d   : > { %v8704_v17 = vpop.eup %8703  ;;  %8713 = vrcp.f32 %v1525_v33 }
 0x45e   : > { %v8706_v37 = vpop.eup %8705  ;;  %v1584_v5 = vmul.f32 %v8704_v17, %v9486_v53 }
 0x45f   : > { %v1552_v1 = vpop.xlane.xlu1 %1551  ;;  %v1583_v2 = vmul.f32 %v8706_v37, %v9488_v56 }
 0x460   : > { %8715 = vrcp.f32 %v1552_v1  ;;  %v1528_v9 = vpop.xlane.xlu0 %1527 }
 0x461   : > { %v8708_v10 = vpop.eup %8707  ;;  %8717 = vrcp.f32 %v1528_v9  ;;  %7991 = vmatprep.mubr.msk.f32.mxu0 %vm878_vm1, %v1583_v2 }
 0x462   : > { %v8710_v40 = vpop.eup %8709  ;;  %7992 = vmatmul.mubr.msk.f32.vlgmr.msra.gmra.mrb[0].mxu0 %vm878_vm1, %v1584_v5  ;;  %v1586_v36 = vmul.f32 %v8708_v10, %v9496_v61 }
 0x463   : > { %8340 = vmatpush3.bf16.msra.mxu0 %v8337_v54  ;;  %v1555_v3 = vpop.xlane.xlu1 %1554  ;;  %v1585_v6 = vmul.f32 %v8710_v40, %v9498_v62 }
 0x464   : > { %8719 = vrcp.f32 %v1555_v3  ;;  %8342 = vmatprep.subr.bf16.mxu0 %v8341_v41  ;;  %v1531_v63 = vpop.xlane.xlu0 %1530 }
 0x465   : > { %8721 = vrcp.f32 %v1531_v63  ;;  %7994 = vmatprep.mubr.msk.f32.mxu0 %vm878_vm1, %v1585_v6 }
 0x466   : > { %v8712_v53 = vpop.eup %8711  ;;  %7995 = vmatmul.mubr.msk.f32.gmra.mrb[2].mxu0 %vm878_vm1, %v1586_v36 }
 0x467   : > { %v8714_v56 = vpop.eup %8713  ;;  %8344 = vmatpush3.bf16.msra.mxu0 %v8341_v41  ;;  %v1558_v45 = vpop.xlane.xlu1 %1557  ;;  %v1587_v15 = vmul.f32 %v8712_v53, %v9506_v13 }
 0x468   : > { %8723 = vrcp.f32 %v1558_v45  ;;  %v1534_v52 = vpop.xlane.xlu0 %1533  ;;  %v1579_v62 = vmul.f32 %v8714_v56, %v9508_v16  ;;  %v2164_v45 = vld [vmem:[%s9104_s26] sm:$0xff] }
 0x469   : > { %8725 = vrcp.f32 %v1534_v52  ;;  %8005 = vmatprep.mubr.msk.f32.mxu0 %vm878_vm1, %v1587_v15  ;;  %v2172_v15 = vld [vmem:[%s9104_s26 + $0x40] sm:$0xff]  ;;  %v2166_v52 = vld [vmem:[%s9104_s26 + $0x10] sm:$0xff] }
 0x46a   : > { %v8716_v47 = vpop.eup %8715  ;;  %7963 = vmatprep.mubr.msk.f32.mxu1 %vm878_vm1, %v1579_v62  ;;  %v7364_v62 = vcombine.high %v2164_v45, %v2172_v15 }
 0x46b   : > { %v8718_v61 = vpop.eup %8717  ;;  %v1588_v19 = vmul.f32 %v8716_v47, %v9514_v49  ;;  %v2174_v47 = vld [vmem:[%s9104_s26 + $0x50] sm:$0xff] }
 0x46c   : > { %v1580_v55 = vmul.f32 %v8718_v61, %v9516_v48  ;;  %v7363_v61 = vcombine.low %v2164_v45, %v2172_v15  ;;  %v2167_v45 = vld [vmem:[%s9104_s26 + $0x18] sm:$0xff] }
 0x46d   : > { %8006 = vmatmul.mubr.msk.f32.vlgmr.msra.gmra.mrb[0].mxu0 %vm878_vm1, %v1588_v19  ;;  %v7367_v19 = vcombine.low %v2166_v52, %v2174_v47  ;;  %v2175_v15 = vld [vmem:[%s9104_s26 + $0x58] sm:$0xff] }
 0x46e   : > { %v8720_v13 = vpop.eup %8719  ;;  %7964 = vmatmul.mubr.msk.f32.vlgmr.msra.gmra.mrb[36].mxu1 %vm878_vm1, %v1580_v55  ;;  %v7368_v55 = vcombine.high %v2166_v52, %v2174_v47 }
 0x46f   : > { %v8722_v25 = vpop.eup %8721  ;;  %v1589_v16 = vmul.f32 %v8720_v13, %v9522_v22  ;;  %8348 = vmatpush3.bf16.msra.mxu1 %v9540_v38  ;;  %v840_v22 = vld [vmem:[%s9099_s25 + $0xf8] sm:$0xff]  ;;  %v2180_v13 = vld [vmem:[%s9104_s26 + $0x80] sm:$0xff] }
 0x470   : > { %v1581_v26 = vmul.f32 %v8722_v25, %v9524_v24  ;;  %v8349_v18 = vpack.c.bf16 %v840_v22, %v839_v11  ;;  %2590 = vmatprep.subr.bf16.mxu0 %v7368_v55  ;;  %v2188_v25 = vld [vmem:[%s9104_s26 + $0xc0] sm:$0xff]  ;;  %v8922_v11 = vmov 0   ;;  %v2165_v22 = vld [vmem:[%s9104_s26 + $0x8] sm:$0xff] }
 0x471   : > { %8008 = vmatprep.mubr.msk.f32.mxu0 %vm878_vm1, %v1589_v16  ;;  %v2182_v16 = vld [vmem:[%s9104_s26 + $0x90] sm:$0xff]  ;;  %2591 = vmatpush1.bf16.msra.mxu0 %v7367_v19  ;;  %v8745_v19 = vld [vmem:[#allocation2 + $0x18] sm:$0xff] }
 0x472   : > { %v8724_v35 = vpop.eup %8723  ;;  %7966 = vmatprep.mubr.msk.f32.mxu1 %vm878_vm1, %v1581_v26  ;;  %8350 = vmatprep.subr.bf16.mxu1 %v8349_v18  ;;  %v7380_v26 = vcombine.high %v2180_v13, %v2188_v25 }
 0x473   : > { %v8726_v49 = vpop.eup %8725  ;;  %v1590_v48 = vmul.f32 %v8724_v35, %v9530_v27  ;;  %8352 = vmatpush3.bf16.msra.mxu1 %v8349_v18  ;;  %v2190_v35 = vld [vmem:[%s9104_s26 + $0xd0] sm:$0xff]  ;;  %v2173_v18 = vld [vmem:[%s9104_s26 + $0x48] sm:$0xff] }
 0x474   : > { %v1582_v7 = vmul.f32 %v8726_v49, %v9532_v28  ;;  %2484 = vmatprep.subr.bf16.mxu1 %v7364_v62  ;;  %v7379_v49 = vcombine.low %v2180_v13, %v2188_v25  ;;  %v2170_v25 = vld [vmem:[%s9104_s26 + $0x30] sm:$0xff] }
 0x475   : > { %8009 = vmatmul.mubr.msk.f32.gmra.mrb[2].mxu0 %vm878_vm1, %v1590_v48  ;;  %v7383_v48 = vcombine.low %v2182_v16, %v2190_v35 }
 0x476   : > { %7967 = vmatmul.mubr.msk.f32.gmra.mrb[38].mxu1 %vm878_vm1, %v1582_v7  ;;  %v7384_v7 = vcombine.high %v2182_v16, %v2190_v35  ;;  %2622 = vmatprep.mubr.bf16.mxu0 %v8922_v11  ;;  %v2178_v16 = vld [vmem:[%s9104_s26 + $0x70] sm:$0xff] }
 0x478   : > { %2592 = vmatprep.subr.bf16.mxu0 %v7384_v7  ;;  %v2183_v7 = vld [vmem:[%s9104_s26 + $0x98] sm:$0xff] }
 0x479   : > { %2593 = vmatpush1.bf16.msra.mxu0 %v7383_v48  ;;  %v7376_v48 = vcombine.high %v2170_v25, %v2178_v16 }
 0x540   : > { %v8007_v24 = vpop.f32.mrb[0].mxu0 }
 0x541   : > { %v7965_v38 = vpop.f32.mrb[36].mxu1  ;;  %v1964_v39 = vpop.f32.mrb[1].mxu0 }
 0x542   : > { %v8493_v20 = vadd.f32 %v8007_v24, %v7965_v38  ;;  %v1669_v12 = vpop.f32.mrb[37].mxu1  ;;  %v9633_v24 = vld [vmem:[%s9104_s26 + $0x20] sm:$0xff]  ;;  %v7365_v38 = vcombine.low %v2165_v22, %v2173_v18 }
 0x543   : > { %v8494_v42 = vadd.f32 %v1964_v39, %v1669_v12  ;;  %v7366_v39 = vcombine.high %v2165_v22, %v2173_v18  ;;  %v2191_v22 = vld [vmem:[%s9104_s26 + $0xd8] sm:$0xff]  ;;  %v2186_v18 = vld [vmem:[%s9104_s26 + $0xb0] sm:$0xff] }
 0x545   : > { %8019 = vmatprep.mubr.msk.f32.mxu1 %vm878_vm1, %v8494_v42 }
 0x546   : > { %8020 = vmatmul.mubr.msk.f32.vlgmr.msra.gmra.mrb[40].mxu1 %vm878_vm1, %v8493_v20  ;;  %v2176_v20 = vld [vmem:[%s9104_s26 + $0x60] sm:$0xff] }
 0x547   : > { %2485 = vmatpush1.bf16.msra.mxu1 %v7363_v61  ;;  %v7371_v12 = vcombine.low %v9633_v24, %v2176_v20  ;;  %v7372_v42 = vcombine.high %v9633_v24, %v2176_v20  ;;  %v7370_v61 = vcombine.high %v2167_v45, %v2175_v15  ;;  %v2194_v24 = vld [vmem:[%s9104_s26 + $0xf0] sm:$0xff]  ;;  %v7386_v20 = vcombine.high %v2183_v7, %v2191_v22 }
 0x548   : > { %v8010_v27 = vpop.f32.mrb[2].mxu0  ;;  %2486 = vmatprep.subr.bf16.mxu1 %v7380_v26  ;;  %v8746_v26 = vld [vmem:[#allocation2 + $0x10] sm:$0xff] }
 0x549   : > { %v7968_v28 = vpop.f32.mrb[38].mxu1  ;;  %v1974_v43 = vpop.f32.mrb[3].mxu0  ;;  %2696 = vmatprep.subr.bf16.mxu0 %v7372_v42  ;;  %v2169_v42 = vld [vmem:[%s9104_s26 + $0x28] sm:$0xff] }
 0x54a   : > { %v8495_v44 = vadd.f32 %v8010_v27, %v7968_v28  ;;  %v1679_v46 = vpop.f32.mrb[39].mxu1 }
 0x54b   : > { %v8496_v51 = vadd.f32 %v1974_v43, %v1679_v46  ;;  %2487 = vmatpush1.bf16.msra.mxu1 %v7379_v49 }
 0x54c   : > { %2537 = vmatprep.subr.bf16.mxu1 %v7366_v39  ;;  %v7375_v39 = vcombine.low %v2170_v25, %v2178_v16 }
 0x54d   : > { %8022 = vmatprep.mubr.msk.f32.mxu1 %vm878_vm1, %v8496_v51 }
 0x54e   : > { %8023 = vmatmul.mubr.msk.f32.gmra.mrb[42].mxu1 %vm878_vm1, %v8495_v44 }
 0x54f   : > { %2516 = vmatprep.mubr.bf16.mxu1 %v8922_v11 }
 0x619   : > { %v8021_v58 = vpop.f32.mrb[40].mxu1 }
 0x61a   : > { %v2075_v23 = vadd.f32 %v8021_v58, %v7356_v57  ;;  %v2069_v30 = vpop.f32.mrb[41].mxu1 }
 0x61b   : > { %v2070_v59 = vadd.f32 %v7356_v57, %v2069_v30 }
 0x61c   : > { %v2093_v60 = vsel %vm878_vm1, %v2075_v23, 0.0 }
 0x61d   : > { %2094 = vadd.xlane.f32.xlu1 %v2093_v60  ;;  %v2090_v14 = vsel %vm878_vm1, %v2070_v59, 0.0 }
 0x61e   : > { %2091 = vadd.xlane.f32.xlu0 %v2090_v14 }
 0x621   : > { %v8024_v29 = vpop.f32.mrb[42].mxu1 }
 0x622   : > { %v2085_v34 = vadd.f32 %v8024_v29, %v7356_v57  ;;  %v2079_v32 = vpop.f32.mrb[43].mxu1  ;;  %v7361_v29 = vld [vmem:[%s9099_s25 + $0x104] ss:$0 sm:$0xff] }
 0x623   : > { %v2080_v31 = vadd.f32 %v7356_v57, %v2079_v32 }
 0x624   : > { %v2099_v21 = vsel %vm878_vm1, %v2085_v34, 0.0 }
 0x625   : > { %2100 = vadd.xlane.f32.xlu1 %v2099_v21  ;;  %v2096_v0 = vsel %vm878_vm1, %v2080_v31, 0.0 }
 0x626   : > { %2097 = vadd.xlane.f32.xlu0 %v2096_v0 }
 0x6aa   : > { %v2095_v54 = vpop.xlane.xlu1 %2094 }
 0x6ab   : > { %v2104_v50 = vmul.f32 0.03125, %v2095_v54  ;;  %v2092_v33 = vpop.xlane.xlu0 %2091 }
 0x6ac   : > { %v2103_v17 = vmul.f32 0.03125, %v2092_v33 }
 0x6ad   : > { %v9600_v37 = vsub.f32 %v2075_v23, %v2104_v50 }
 0x6ae   : > { %v9602_v8 = vsub.f32 %v2070_v59, %v2103_v17  ;;  %v8743_v17 = vld [vmem:[#allocation2 + $0x8] sm:$0xff] }
 0x6af   : > { %v2112_v4 = vmul.f32 %v9600_v37, %v9600_v37 }
 0x6b0   : > { %v2111_v1 = vmul.f32 %v9602_v8, %v9602_v8 }
 0x6b1   : > { %v2118_v2 = vsel %vm878_vm1, %v2112_v4, 0.0 }
 0x6b2   : > { %2119 = vadd.xlane.f32.xlu1 %v2118_v2  ;;  %v2101_v5 = vpop.xlane.xlu1 %2100  ;;  %v2115_v9 = vsel %vm878_vm1, %v2111_v1, 0.0  ;;  %v2181_v1 = vld [vmem:[%s9104_s26 + $0x88] sm:$0xff] }
 0x6b3   : > { %v2106_v10 = vmul.f32 0.03125, %v2101_v5  ;;  %2116 = vadd.xlane.f32.xlu0 %v2115_v9  ;;  %v2098_v40 = vpop.xlane.xlu0 %2097  ;;  %v2189_v2 = vld [vmem:[%s9104_s26 + $0xc8] sm:$0xff]  ;;  %v8744_v9 = vld [vmem:[#allocation2] sm:$0xff] }
 0x6b4   : > { %v2105_v41 = vmul.f32 0.03125, %v2098_v40  ;;  %v7381_v47 = vcombine.low %v2181_v1, %v2189_v2 }
 0x6b5   : > { %v9610_v3 = vsub.f32 %v2085_v34, %v2106_v10 }
 0x6b6   : > { %v9612_v6 = vsub.f32 %v2080_v31, %v2105_v41  ;;  %v7362_v31 = vld [vmem:[%s9099_s25 + $0x105] ss:$0 sm:$0xff] }
 0x6b7   : > { %v2114_v63 = vmul.f32 %v9610_v3, %v9610_v3  ;;  %v2184_v41 = vld [vmem:[%s9104_s26 + $0xa0] sm:$0xff] }
 0x6b8   : > { %v2113_v36 = vmul.f32 %v9612_v6, %v9612_v6 }
 0x6b9   : > { %v2124_v53 = vsel %vm878_vm1, %v2114_v63, 0.0 }
 0x6ba   : > { %2125 = vadd.xlane.f32.xlu1 %v2124_v53  ;;  %v2121_v56 = vsel %vm878_vm1, %v2113_v36, 0.0  ;;  %v7382_v53 = vcombine.high %v2181_v1, %v2189_v2 }
 0x6bb   : > { %2122 = vadd.xlane.f32.xlu0 %v2121_v56 }
 0x73f   : > { %v2120_v27 = vpop.xlane.xlu1 %2119 }
 0x740   : > { %v2128_v28 = vmul.f32 0.03125, %v2120_v27  ;;  %v2117_v43 = vpop.xlane.xlu0 %2116  ;;  %v2177_v27 = vld [vmem:[%s9104_s26 + $0x68] sm:$0xff] }
 0x741   : > { %v2127_v44 = vmul.f32 0.03125, %v2117_v43  ;;  %v2204_v43 = vld [vmem:[%s9104_s26 + $0x140] sm:$0xff] }
 0x742   : > { %v2132_v46 = vadd.f32 1e-05, %v2128_v28  ;;  %v2196_v28 = vld [vmem:[%s9104_s26 + $0x100] sm:$0xff] }
 0x743   : > { %v2131_v51 = vadd.f32 1e-05, %v2127_v44  ;;  %v7385_v44 = vcombine.low %v2183_v7, %v2191_v22 }
 0x744   : > { %8727 = vrsqrt.f32 %v2132_v46  ;;  %v7391_v46 = vcombine.low %v2186_v18, %v2194_v24 }
 0x745   : > { %8729 = vrsqrt.f32 %v2131_v51  ;;  %v7374_v51 = vcombine.high %v2169_v42, %v2177_v27 }
 0x747   : > { %v2126_v57 = vpop.xlane.xlu1 %2125 }
 0x748   : > { %v2130_v58 = vmul.f32 0.03125, %v2126_v57  ;;  %v2123_v23 = vpop.xlane.xlu0 %2122  ;;  %v7413_v57 = vcombine.high %v2196_v28, %v2204_v43 }
 0x749   : > { %v2129_v30 = vmul.f32 0.03125, %v2123_v23  ;;  %v2193_v23 = vld [vmem:[%s9104_s26 + $0xe8] sm:$0xff] }
 0x74a   : > { %v2134_v59 = vadd.f32 1e-05, %v2130_v58  ;;  %v2185_v58 = vld [vmem:[%s9104_s26 + $0xa8] sm:$0xff] }
 0x74b   : > { %v2133_v60 = vadd.f32 1e-05, %v2129_v30  ;;  %v7373_v30 = vcombine.low %v2169_v42, %v2177_v27  ;;  %v2232_v42 = vld [vmem:[%s9104_s26 + $0x220] sm:$0x11] }
 0x74c   : > { %8731 = vrsqrt.f32 %v2134_v59  ;;  %v7412_v59 = vcombine.low %v2196_v28, %v2204_v43 }
 0x74d   : > { %8733 = vrsqrt.f32 %v2133_v60  ;;  %v7390_v60 = vcombine.high %v2185_v58, %v2193_v23 }
 0x74e   : > { %v8728_v14 = vpop.eup %8727 }
 0x74f   : > { %v8730_v34 = vpop.eup %8729  ;;  %v2140_v32 = vmul.f32 %v8728_v14, %v9600_v37  ;;  %v2171_v14 = vld [vmem:[%s9104_s26 + $0x38] sm:$0xff] }
 0x750   : > { %v2139_v21 = vmul.f32 %v8730_v34, %v9602_v8  ;;  %v2192_v8 = vld [vmem:[%s9104_s26 + $0xe0] sm:$0xff]  ;;  %v7389_v34 = vcombine.low %v2185_v58, %v2193_v23  ;;  %v9751_v23 = vld [vmem:[%s9104_s26 + $0x188] sm:$0xff] }
 0x751   : > { %v2148_v0 = vmul.f32 %v7361_v29, %v2140_v32  ;;  %v7387_v13 = vcombine.low %v2184_v41, %v2192_v8 }
 0x752   : > { %v2147_v54 = vmul.f32 %v7361_v29, %v2139_v21  ;;  %v2195_v21 = vld [vmem:[%s9104_s26 + $0xf8] sm:$0xff] }
 0x753   : > { %v2156_v50 = vadd.f32 %v7362_v31, %v2148_v0 }
 0x754   : > { %v2155_v33 = vadd.f32 %v7362_v31, %v2147_v54 }
 0x755   : > { %v9642_v4 = vadd.f32 %v8743_v17, %v2156_v50  ;;  %v2220_v17 = vld [vmem:[%s9104_s26 + $0x1c0] sm:$0xff] }
 0x756   : > { %v8732_v5 = vpop.eup %8731  ;;  %v9646_v10 = vadd.f32 %v8744_v9, %v2155_v33  ;;  %v2212_v33 = vld [vmem:[%s9104_s26 + $0x180] sm:$0xff]  ;;  %v9734_v9 = vld [vmem:[%s9104_s26 + $0x148] sm:$0xff] }
 0x757   : > { %v8734_v37 = vpop.eup %8733  ;;  %v2142_v40 = vmul.f32 %v8732_v5, %v9610_v3  ;;  %v7388_v3 = vcombine.high %v2184_v41, %v2192_v8  ;;  %v7429_v1 = vcombine.high %v2212_v33, %v2220_v17  ;;  %v7428_v2 = vcombine.low %v2212_v33, %v2220_v17  ;;  %v9731_v5 = vld [vmem:[%s9104_s26 + $0x108] sm:$0xff]  ;;  %v2228_v8 = vld [vmem:[%s9104_s26 + $0x200] sm:$0x11] }
 0x758   : > { %v9653_v63 = vpack.c.bf16 %v9642_v4, %v9646_v10  ;;  %v2141_v36 = vmul.f32 %v8734_v37, %v9612_v6  ;;  %v7415_v37 = vcombine.high %v9731_v5, %v9734_v9 }
 0x759   : > { %v2150_v56 = vmul.f32 %v7361_v29, %v2142_v40  ;;  %v2254_v40 = vlaneseq }
 0x75a   : > { %v2149_v52 = vmul.f32 %v7361_v29, %v2141_v36  ;;  %7395 = vmatmul.mubr.msk.bf16.vlgmr.msra.gmra.mrb[44].mxu1 %vm878_vm1, %v9653_v63  ;;  %7399 = vmatmul.mubr.msk.bf16.vlgmr.msra.gmra.mrb[4].mxu0 %vm878_vm1, %v9653_v63  ;;  %v2179_v29 = vld [vmem:[%s9104_s26 + $0x78] sm:$0xff]  ;;  %v2236_v36 = vunpack.c.l.bf16 %v2228_v8 }
 0x75b   : > { %v2158_v62 = vadd.f32 %v7362_v31, %v2150_v56  ;;  %2538 = vmatpush1.bf16.msra.mxu1 %v7365_v38  ;;  %2526 = vmatprep.mubr.bf16.mxu1 %v8922_v11  ;;  %v7369_v38 = vcombine.low %v2167_v45, %v2175_v15  ;;  %v7378_v32 = vcombine.high %v2171_v14, %v2179_v29  ;;  %v2255_v41 = vshrl.u32 %v2254_v40, 7 }
 0x75c   : > { %v2157_v6 = vadd.f32 %v7362_v31, %v2149_v52  ;;  %2539 = vmatprep.subr.bf16.mxu1 %v7382_v53  ;;  %2632 = vmatprep.mubr.bf16.mxu0 %v8922_v11  ;;  %v2187_v31 = vld [vmem:[%s9104_s26 + $0xb8] sm:$0xff]  ;;  %v7377_v0 = vcombine.low %v2171_v14, %v2179_v29  ;;  %v2237_v45 = vunpack.c.h.bf16 %v2228_v8  ;;  %v2244_v29 = vunpack.c.l.bf16 %v2232_v42 }
 0x75d   : > { %v9664_v55 = vadd.f32 %v8745_v19, %v2158_v62  ;;  %2697 = vmatpush1.bf16.msra.mxu0 %v7371_v12  ;;  %v7392_v12 = vcombine.high %v2186_v18, %v2194_v24  ;;  %v7394_v54 = vcombine.high %v2187_v31, %v2195_v21  ;;  %v7393_v50 = vcombine.low %v2187_v31, %v2195_v21 }
 0x75e   : > { %v9668_v35 = vadd.f32 %v8746_v26, %v2157_v6  ;;  %2698 = vmatprep.subr.bf16.mxu0 %v7388_v3  ;;  %v9742_v53 = vsub.s32 0, %v2255_v41 }
 0x75f   : > { %2540 = vmatpush1.bf16.msra.mxu1 %v7381_v47 }
 0x760   : > { %v9672_v49 = vpack.c.bf16 %v9664_v55, %v9668_v35  ;;  %2643 = vmatprep.subr.bf16.mxu1 %v7370_v61  ;;  %v2257_v52 = vrot.slane %v2236_v36, %v9742_v53  ;;  %v2261_v62 = vrot.slane %v2237_v45, %v9742_v53 }
 0x761   : > { %2699 = vmatpush1.bf16.msra.mxu0 %v7387_v13 }
 0x762   : > { %7396 = vmatmul.mubr.msk.bf16.gmra.mrb[48].mxu1 %vm878_vm1, %v9672_v49  ;;  %7400 = vmatmul.mubr.msk.bf16.gmra.mrb[8].mxu0 %vm878_vm1, %v9672_v49 }
 0x763   : > { %2569 = vmatprep.mubr.bf16.mxu1 %v8922_v11  ;;  %2728 = vmatprep.mubr.bf16.mxu0 %v8922_v11 }
 0x764   : > { %2802 = vmatprep.subr.bf16.mxu0 %v7376_v48 }
 0x76a   : > { %7397 = vmatmul.mubr.msk.bf16.vlgmr.msra.gmra.mrb[52].mxu1 %vm878_vm1, %v9653_v63  ;;  %7403 = vmatmul.mubr.msk.bf16.vlgmr.msra.gmra.mrb[12].mxu0 %vm878_vm1, %v9653_v63 }
 0x76b   : > { %2579 = vmatprep.mubr.bf16.mxu1 %v8922_v11  ;;  %2738 = vmatprep.mubr.bf16.mxu0 %v8922_v11 }
 0x76c   : > { %2644 = vmatpush1.bf16.msra.mxu1 %v7369_v38  ;;  %2803 = vmatpush1.bf16.msra.mxu0 %v7375_v39 }
 0x76d   : > { %2645 = vmatprep.subr.bf16.mxu1 %v7386_v20  ;;  %2804 = vmatprep.subr.bf16.mxu0 %v7392_v12  ;;  %v2229_v12 = vld [vmem:[%s9104_s26 + $0x208] sm:$0x11] }
 0x76e   : > { %v2238_v14 = vunpack.c.l.bf16 %v2229_v12 }
 0x770   : > { %2646 = vmatpush1.bf16.msra.mxu1 %v7385_v44  ;;  %2805 = vmatpush1.bf16.msra.mxu0 %v7391_v46 }
 0x771   : > { %2749 = vmatprep.subr.bf16.mxu1 %v7374_v51  ;;  %3168 = vmatprep.subr.bf16.mxu0 %v7413_v57 }
 0x772   : > { %7398 = vmatmul.mubr.msk.bf16.gmra.mrb[56].mxu1 %vm878_vm1, %v9672_v49  ;;  %7404 = vmatmul.mubr.msk.bf16.gmra.mrb[16].mxu0 %vm878_vm1, %v9672_v49 }
 0x773   : > { %2675 = vmatprep.mubr.bf16.mxu1 %v8922_v11  ;;  %2834 = vmatprep.mubr.bf16.mxu0 %v8922_v11 }
 0x77a   : > { %7401 = vmatmul.mubr.msk.bf16.vlgmr.msra.gmra.mrb[60].mxu1 %vm878_vm1, %v9653_v63  ;;  %7407 = vmatmul.mubr.msk.bf16.vlgmr.msra.gmra.mrb[20].mxu0 %vm878_vm1, %v9653_v63 }
 0x77b   : > { %2685 = vmatprep.mubr.bf16.mxu1 %v8922_v11  ;;  %2844 = vmatprep.mubr.bf16.mxu0 %v8922_v11 }
 0x77c   : > { %2750 = vmatpush1.bf16.msra.mxu1 %v7373_v30  ;;  %3169 = vmatpush1.bf16.xpose.msra.mxu0 %v7412_v59  ;;  %v9754_v30 = vld [vmem:[%s9104_s26 + $0x1c8] sm:$0xff] }
 0x77d   : > { %2751 = vmatprep.subr.bf16.mxu1 %v7390_v60  ;;  %3170 = vmatprep.subr.bf16.mxu0 %v7429_v1 }
 0x780   : > { %2752 = vmatpush1.bf16.msra.mxu1 %v7389_v34 }
 0x781   : > { %2855 = vmatprep.subr.bf16.mxu1 %v7378_v32 }
 0x782   : > { %7402 = vmatmul.mubr.msk.bf16.gmra.mrb[64].mxu1 %vm878_vm1, %v9672_v49  ;;  %7408 = vmatmul.mubr.msk.bf16.gmra.mrb[24].mxu0 %vm878_vm1, %v9672_v49 }
 0x783   : > { %2781 = vmatprep.mubr.bf16.mxu1 %v8922_v11 }
 0x784   : > { %3171 = vmatpush1.bf16.xpose.msra.mxu0 %v7428_v2  ;;  %v7431_v2 = vcombine.high %v9751_v23, %v9754_v30 }
 0x785   : > { %3217 = vmatprep.subr.bf16.mxu0 %v7415_v37 }
 0x78a   : > { %7405 = vmatmul.mubr.msk.bf16.vlgmr.msra.gmra.mrb[68].mxu1 %vm878_vm1, %v9653_v63 }
 0x78b   : > { %2791 = vmatprep.mubr.bf16.mxu1 %v8922_v11  ;;  %2856 = vmatpush1.bf16.msra.mxu1 %v7377_v0  ;;  %v2239_v0 = vunpack.c.h.bf16 %v2229_v12 }
 0x78c   : > { %2857 = vmatprep.subr.bf16.mxu1 %v7394_v54  ;;  %v2245_v54 = vunpack.c.h.bf16 %v2232_v42 }
 0x78f   : > { %2858 = vmatpush1.bf16.msra.mxu1 %v7393_v50 }
 0x792   : > { %7406 = vmatmul.mubr.msk.bf16.gmra.mrb[72].mxu1 %vm878_vm1, %v9672_v49 }
 0x793   : > { %2887 = vmatprep.mubr.bf16.mxu1 %v8922_v11 }
 0x79a   : > { %7409 = vmatmul.mubr.msk.bf16.vlgmr.msra.gmra.mrb[76].mxu1 %vm878_vm1, %v9653_v63  ;;  %v2230_v63 = vld [vmem:[%s9104_s26 + $0x210] sm:$0x11] }
 0x79b   : > { %2897 = vmatprep.mubr.bf16.mxu1 %v8922_v11  ;;  %v7414_v11 = vcombine.low %v9731_v5, %v9734_v9  ;;  %v2240_v56 = vunpack.c.l.bf16 %v2230_v63  ;;  %v2241_v15 = vunpack.c.h.bf16 %v2230_v63 }
 0x79d   : > { %v2273_v3 = vrot.slane %v2240_v56, %v9742_v53  ;;  %v2277_v47 = vrot.slane %v2241_v15, %v9742_v53  ;;  %v9763_v15 = vrot.slane %v2238_v14, %v9742_v53 }
 0x7a2   : > { %7410 = vmatmul.mubr.msk.bf16.gmra.mrb[80].mxu1 %vm878_vm1, %v9672_v49 }
 0x82d   : > { %v2518_v6 = vpop.f32.mrb[44].mxu1  ;;  %v2624_v61 = vpop.f32.mrb[4].mxu0 }
 0x82e   : > { %v2519_v19 = vadd.f32 %v2518_v6, %v2257_v52  ;;  %v2625_v13 = vadd.f32 %v2624_v61, %v2273_v3  ;;  %v2520_v25 = vpop.f32.mrb[45].mxu1  ;;  %v2626_v16 = vpop.f32.mrb[5].mxu0  ;;  %v9766_v6 = vrot.slane %v2244_v29, %v9742_v53 }
 0x82f   : > { %v2521_v26 = vadd.f32 %v2520_v25, %v2261_v62  ;;  %v2627_v49 = vadd.f32 %v2626_v16, %v2277_v47  ;;  %v2522_v48 = vpop.f32.mrb[46].mxu1  ;;  %v2628_v7 = vpop.f32.mrb[6].mxu0 }
 0x830   : > { %v2523_v22 = vadd.f32 %v2522_v48, %v2257_v52  ;;  %v2629_v18 = vadd.f32 %v2628_v7, %v2273_v3  ;;  %v2524_v24 = vpop.f32.mrb[47].mxu1  ;;  %v2630_v38 = vpop.f32.mrb[7].mxu0  ;;  %v2908_v27 = vmax.f32 %v2519_v19, 0.0  ;;  %v2912_v28 = vmax.f32 %v2625_v13, 0.0 }
 0x831   : > { %v2525_v39 = vadd.f32 %v2524_v24, %v2261_v62  ;;  %v2631_v20 = vadd.f32 %v2630_v38, %v2277_v47  ;;  %v2909_v46 = vmax.f32 %v2521_v26, 0.0  ;;  %v2913_v51 = vmax.f32 %v2627_v49, 0.0 }
 0x832   : > { %v2924_v43 = vmax.f32 %v2523_v22, 0.0  ;;  %v2928_v44 = vmax.f32 %v2629_v18, 0.0  ;;  %v9781_v22 = vld [vmem:[%s9104_s26 + $0x150] sm:$0xff] }
 0x833   : > { %v2925_v57 = vmax.f32 %v2525_v39, 0.0  ;;  %v2929_v58 = vmax.f32 %v2631_v20, 0.0  ;;  %v7430_v39 = vcombine.low %v9751_v23, %v9754_v30 }
 0x834   : > { %v2972_v59 = vpack.c.bf16 %v2924_v43, %v2908_v27  ;;  %v9756_v60 = vpack.c.bf16 %v2928_v44, %v2912_v28 }
 0x835   : > { %v2973_v34 = vpack.c.bf16 %v2925_v57, %v2909_v46  ;;  %v9758_v32 = vpack.c.bf16 %v2929_v58, %v2913_v51  ;;  %v2528_v31 = vpop.f32.mrb[48].mxu1  ;;  %v2634_v21 = vpop.f32.mrb[8].mxu0 }
 0x836   : > { %v2529_v50 = vadd.f32 %v2528_v31, %v2257_v52  ;;  %v2635_v33 = vadd.f32 %v2634_v21, %v2273_v3  ;;  %v2530_v17 = vpop.f32.mrb[49].mxu1  ;;  %v2636_v1 = vpop.f32.mrb[9].mxu0  ;;  %v2234_v31 = vld [vmem:[%s9104_s26 + $0x230] sm:$0x11] }
 0x837   : > { %v2531_v37 = vadd.f32 %v2530_v17, %v2261_v62  ;;  %v2637_v40 = vadd.f32 %v2636_v1, %v2277_v47  ;;  %v2532_v41 = vpop.f32.mrb[50].mxu1  ;;  %v2638_v8 = vpop.f32.mrb[10].mxu0  ;;  %3200 = vmatprep.mubr.bf16.mxu0 %v2973_v34  ;;  %v2231_v34 = vld [vmem:[%s9104_s26 + $0x218] sm:$0x11] }
 0x838   : > { %v2533_v63 = vadd.f32 %v2532_v41, %v2257_v52  ;;  %v2639_v36 = vadd.f32 %v2638_v8, %v2273_v3  ;;  %v2534_v56 = vpop.f32.mrb[51].mxu1  ;;  %v2640_v45 = vpop.f32.mrb[11].mxu0  ;;  %3201 = vmatmul.mubr.bf16.vlgmr.msra.gmra.mrb[28].mxu0 %v2972_v59  ;;  %v9772_v52 = vrot.slane %v2239_v0, %v9742_v53  ;;  %v9775_v3 = vrot.slane %v2245_v54, %v9742_v53 }
 0x839   : > { %v2535_v61 = vadd.f32 %v2534_v56, %v2261_v62  ;;  %v2641_v19 = vadd.f32 %v2640_v45, %v2277_v47  ;;  %3218 = vmatpush1.bf16.xpose.msra.mxu0 %v7414_v11  ;;  %v2940_v13 = vmax.f32 %v2529_v50, 0.0  ;;  %v2944_v25 = vmax.f32 %v2635_v33, 0.0  ;;  %v9778_v47 = vld [vmem:[%s9104_s26 + $0x110] sm:$0xff] }
 0x83a   : > { %v2956_v16 = vmax.f32 %v2533_v63, 0.0  ;;  %v2960_v26 = vmax.f32 %v2639_v36, 0.0  ;;  %3219 = vmatprep.subr.bf16.mxu0 %v7431_v2  ;;  %v2941_v49 = vmax.f32 %v2531_v37, 0.0  ;;  %v2945_v48 = vmax.f32 %v2637_v40, 0.0  ;;  %v9804_v37 = vld [vmem:[%s9104_s26 + $0x190] sm:$0xff] }
 0x83b   : > { %v2957_v7 = vmax.f32 %v2535_v61, 0.0  ;;  %v2961_v62 = vmax.f32 %v2641_v19, 0.0  ;;  %v7417_v28 = vcombine.high %v9778_v47, %v9781_v22  ;;  %v7416_v29 = vcombine.low %v9778_v47, %v9781_v22  ;;  %v9807_v40 = vld [vmem:[%s9104_s26 + $0x1d0] sm:$0xff] }
 0x83c   : > { %v2988_v5 = vpack.c.bf16 %v2956_v16, %v2940_v13  ;;  %v9783_v9 = vpack.c.bf16 %v2960_v26, %v2944_v25  ;;  %v2242_v63 = vunpack.c.l.bf16 %v2231_v34  ;;  %v2248_v36 = vunpack.c.l.bf16 %v2234_v31 }
 0x83d   : > { %v2989_v11 = vpack.c.bf16 %v2957_v7, %v2941_v49  ;;  %v9785_v18 = vpack.c.bf16 %v2961_v62, %v2945_v48  ;;  %v2571_v24 = vpop.f32.mrb[52].mxu1  ;;  %v2730_v38 = vpop.f32.mrb[12].mxu0  ;;  %v2243_v13 = vunpack.c.h.bf16 %v2231_v34  ;;  %v2249_v25 = vunpack.c.h.bf16 %v2234_v31 }
 0x83e   : > { %v2572_v20 = vadd.f32 %v2571_v24, %v9763_v15  ;;  %v2731_v12 = vadd.f32 %v2730_v38, %v9766_v6  ;;  %v2573_v42 = vpop.f32.mrb[53].mxu1  ;;  %v2732_v27 = vpop.f32.mrb[13].mxu0  ;;  %v7433_v7 = vcombine.high %v9804_v37, %v9807_v40 }
 0x83f   : > { %v2574_v43 = vadd.f32 %v2573_v42, %v9772_v52  ;;  %v2733_v44 = vadd.f32 %v2732_v27, %v9775_v3  ;;  %v2575_v46 = vpop.f32.mrb[54].mxu1  ;;  %v2734_v51 = vpop.f32.mrb[14].mxu0  ;;  %3208 = vmatprep.mubr.bf16.mxu0 %v2989_v11 }
 0x840   : > { %v2576_v57 = vadd.f32 %v2575_v46, %v9763_v15  ;;  %v2735_v58 = vadd.f32 %v2734_v51, %v9766_v6  ;;  %v2577_v23 = vpop.f32.mrb[55].mxu1  ;;  %v2736_v30 = vpop.f32.mrb[15].mxu0  ;;  %3209 = vmatmul.mubr.bf16.gmra.mrb[32].mxu0 %v2988_v5  ;;  %v2910_v21 = vmax.f32 %v2572_v20, 0.0  ;;  %v2916_v0 = vmax.f32 %v2731_v12, 0.0 }
 0x841   : > { %v2578_v59 = vadd.f32 %v2577_v23, %v9772_v52  ;;  %v2737_v14 = vadd.f32 %v2736_v30, %v9775_v3  ;;  %3220 = vmatpush1.bf16.xpose.msra.mxu0 %v7430_v39  ;;  %v2911_v33 = vmax.f32 %v2574_v43, 0.0  ;;  %v2917_v17 = vmax.f32 %v2733_v44, 0.0  ;;  %v9836_v30 = vld [vmem:[%s9104_s26 + $0x118] sm:$0xff] }
 0x842   : > { %v2926_v54 = vmax.f32 %v2576_v57, 0.0  ;;  %v2932_v50 = vmax.f32 %v2735_v58, 0.0  ;;  %3266 = vmatprep.subr.bf16.mxu0 %v7417_v28  ;;  %v9822_v20 = vrot.slane %v2242_v63, %v9742_v53  ;;  %v9825_v12 = vrot.slane %v2248_v36, %v9742_v53 }
 0x843   : > { %v2927_v1 = vmax.f32 %v2578_v59, 0.0  ;;  %v2933_v2 = vmax.f32 %v2737_v14, 0.0 }
 0x844   : > { %v2974_v41 = vpack.c.bf16 %v2926_v54, %v2910_v21  ;;  %v9809_v8 = vpack.c.bf16 %v2932_v50, %v2916_v0  ;;  %v7432_v21 = vcombine.low %v9804_v37, %v9807_v40 }
 0x845   : > { %v2975_v56 = vpack.c.bf16 %v2927_v1, %v2911_v33  ;;  %v9811_v45 = vpack.c.bf16 %v2933_v2, %v2917_v17  ;;  %v2581_v61 = vpop.f32.mrb[56].mxu1  ;;  %v2740_v19 = vpop.f32.mrb[16].mxu0 }
 0x846   : > { %v2582_v16 = vadd.f32 %v2581_v61, %v9763_v15  ;;  %v2741_v26 = vadd.f32 %v2740_v19, %v9766_v6  ;;  %v2583_v49 = vpop.f32.mrb[57].mxu1  ;;  %v2742_v48 = vpop.f32.mrb[17].mxu0 }
 0x847   : > { %v2584_v62 = vadd.f32 %v2583_v49, %v9772_v52  ;;  %v2743_v47 = vadd.f32 %v2742_v48, %v9775_v3  ;;  %v2585_v22 = vpop.f32.mrb[58].mxu1  ;;  %v2744_v5 = vpop.f32.mrb[18].mxu0  ;;  %3249 = vmatprep.mubr.bf16.mxu0 %v2975_v56 }
 0x848   : > { %v2586_v11 = vadd.f32 %v2585_v22, %v9763_v15  ;;  %v2745_v24 = vadd.f32 %v2744_v5, %v9766_v6  ;;  %v2587_v38 = vpop.f32.mrb[59].mxu1  ;;  %v2746_v39 = vpop.f32.mrb[19].mxu0  ;;  %3250 = vmatmul.mubr.bf16.vlgmr.msra.gmra.mrb[28].mxu0 %v2974_v41  ;;  %v9830_v15 = vrot.slane %v2243_v13, %v9742_v53  ;;  %v9833_v6 = vrot.slane %v2249_v25, %v9742_v53  ;;  %v2233_v13 = vld [vmem:[%s9104_s26 + $0x228] sm:$0x11]  ;;  %v2215_v22 = vld [vmem:[%s9104_s26 + $0x198] sm:$0xff] }
 0x849   : > { %v2588_v42 = vadd.f32 %v2587_v38, %v9772_v52  ;;  %v2747_v27 = vadd.f32 %v2746_v39, %v9775_v3  ;;  %3267 = vmatpush1.bf16.xpose.msra.mxu0 %v7416_v29  ;;  %v2942_v28 = vmax.f32 %v2582_v16, 0.0  ;;  %v2948_v43 = vmax.f32 %v2741_v26, 0.0  ;;  %v9839_v52 = vld [vmem:[%s9104_s26 + $0x158] sm:$0xff] }
 0x84a   : > { %v2958_v44 = vmax.f32 %v2586_v11, 0.0  ;;  %v2964_v46 = vmax.f32 %v2745_v24, 0.0  ;;  %3268 = vmatprep.subr.bf16.mxu0 %v7433_v7  ;;  %v2943_v51 = vmax.f32 %v2584_v62, 0.0  ;;  %v2949_v57 = vmax.f32 %v2743_v47, 0.0  ;;  %v2223_v5 = vld [vmem:[%s9104_s26 + $0x1d8] sm:$0xff] }
 0x84b   : > { %v2959_v58 = vmax.f32 %v2588_v42, 0.0  ;;  %v2965_v23 = vmax.f32 %v2747_v27, 0.0  ;;  %v7419_v17 = vcombine.high %v9836_v30, %v9839_v52  ;;  %v2246_v38 = vunpack.c.l.bf16 %v2233_v13 }
 0x84c   : > { %v2990_v3 = vpack.c.bf16 %v2958_v44, %v2942_v28  ;;  %v9841_v59 = vpack.c.bf16 %v2964_v46, %v2948_v43  ;;  %v7418_v28 = vcombine.low %v9836_v30, %v9839_v52  ;;  %v2247_v43 = vunpack.c.h.bf16 %v2233_v13 }
 0x84d   : > { %v2991_v14 = vpack.c.bf16 %v2959_v58, %v2943_v51  ;;  %v9843_v29 = vpack.c.bf16 %v2965_v23, %v2949_v57  ;;  %v2677_v34 = vpop.f32.mrb[60].mxu1  ;;  %v2836_v31 = vpop.f32.mrb[20].mxu0  ;;  %v7435_v58 = vcombine.high %v2215_v22, %v2223_v5  ;;  %v2297_v52 = vrot.slane %v2246_v38, %v9742_v53 }
 0x84e   : > { %v2678_v0 = vadd.f32 %v2677_v34, %v9822_v20  ;;  %v2837_v54 = vadd.f32 %v2836_v31, %v9825_v12  ;;  %v2679_v50 = vpop.f32.mrb[61].mxu1  ;;  %v2838_v33 = vpop.f32.mrb[21].mxu0 }
 0x84f   : > { %v2680_v1 = vadd.f32 %v2679_v50, %v9830_v15  ;;  %v2839_v2 = vadd.f32 %v2838_v33, %v9833_v6  ;;  %v2681_v41 = vpop.f32.mrb[62].mxu1  ;;  %v2840_v63 = vpop.f32.mrb[22].mxu0  ;;  %3257 = vmatprep.mubr.bf16.mxu0 %v2991_v14  ;;  %v2301_v33 = vrot.slane %v2247_v43, %v9742_v53 }
 0x850   : > { %v2682_v36 = vadd.f32 %v2681_v41, %v9822_v20  ;;  %v2841_v37 = vadd.f32 %v2840_v63, %v9825_v12  ;;  %v2683_v40 = vpop.f32.mrb[63].mxu1  ;;  %v2842_v56 = vpop.f32.mrb[23].mxu0  ;;  %3258 = vmatmul.mubr.bf16.gmra.mrb[32].mxu0 %v2990_v3  ;;  %v2914_v25 = vmax.f32 %v2678_v0, 0.0  ;;  %v2920_v16 = vmax.f32 %v2837_v54, 0.0 }
 0x851   : > { %v2684_v61 = vadd.f32 %v2683_v40, %v9830_v15  ;;  %v2843_v19 = vadd.f32 %v2842_v56, %v9833_v6  ;;  %3269 = vmatpush1.bf16.xpose.msra.mxu0 %v7432_v21  ;;  %3298 = vmatprep.mubr.bf16.mxu0 %v9758_v32  ;;  %v2915_v48 = vmax.f32 %v2680_v1, 0.0  ;;  %v2921_v7 = vmax.f32 %v2839_v2, 0.0 }
 0x852   : > { %v2930_v26 = vmax.f32 %v2682_v36, 0.0  ;;  %v2936_v49 = vmax.f32 %v2841_v37, 0.0  ;;  %3315 = vmatprep.subr.bf16.mxu0 %v7419_v17  ;;  %v2200_v36 = vld [vmem:[%s9104_s26 + $0x120] sm:$0xff] }
 0x853   : > { %v2931_v62 = vmax.f32 %v2684_v61, 0.0  ;;  %v2937_v47 = vmax.f32 %v2843_v19, 0.0  ;;  %v2208_v37 = vld [vmem:[%s9104_s26 + $0x160] sm:$0xff]  ;;  %v7434_v61 = vcombine.low %v2215_v22, %v2223_v5  ;;  %v2235_v5 = vld [vmem:[%s9104_s26 + $0x238] sm:$0x11] }
 0x854   : > { %v9861_v11 = vpack.c.bf16 %v2930_v26, %v2914_v25  ;;  %v9863_v24 = vpack.c.bf16 %v2936_v49, %v2920_v16  ;;  %v7421_v25 = vcombine.high %v2200_v36, %v2208_v37 }
 0x855   : > { %v2979_v39 = vpack.c.bf16 %v2931_v62, %v2915_v48  ;;  %v9865_v42 = vpack.c.bf16 %v2937_v47, %v2921_v7  ;;  %v2687_v32 = vpop.f32.mrb[64].mxu1  ;;  %v2846_v27 = vpop.f32.mrb[24].mxu0 }
 0x856   : > { %v2688_v44 = vadd.f32 %v2687_v32, %v9822_v20  ;;  %v2847_v46 = vadd.f32 %v2846_v27, %v9825_v12  ;;  %v2689_v51 = vpop.f32.mrb[65].mxu1  ;;  %v2848_v57 = vpop.f32.mrb[25].mxu0  ;;  %v2216_v32 = vld [vmem:[%s9104_s26 + $0x1a0] sm:$0xff] }
 0x857   : > { %v2690_v23 = vadd.f32 %v2689_v51, %v9830_v15  ;;  %v2849_v3 = vadd.f32 %v2848_v57, %v9833_v6  ;;  %v2691_v14 = vpop.f32.mrb[66].mxu1  ;;  %v2850_v34 = vpop.f32.mrb[26].mxu0  ;;  %v2224_v27 = vld [vmem:[%s9104_s26 + $0x1e0] sm:$0xff] }
 0x858   : > { %v2692_v31 = vadd.f32 %v2691_v14, %v9822_v20  ;;  %v2851_v21 = vadd.f32 %v2850_v34, %v9825_v12  ;;  %v2693_v0 = vpop.f32.mrb[67].mxu1  ;;  %v2852_v30 = vpop.f32.mrb[27].mxu0  ;;  %3299 = vmatmul.mubr.bf16.vlgmr.msra.gmra.mrb[28].mxu0 %v9756_v60  ;;  %v2946_v20 = vmax.f32 %v2688_v44, 0.0  ;;  %v2952_v17 = vmax.f32 %v2847_v46, 0.0 }
 0x859   : > { %v2694_v54 = vadd.f32 %v2693_v0, %v9830_v15  ;;  %v2853_v50 = vadd.f32 %v2852_v30, %v9833_v6  ;;  %3316 = vmatpush1.bf16.xpose.msra.mxu0 %v7418_v28  ;;  %3306 = vmatprep.mubr.bf16.mxu0 %v9785_v18  ;;  %v2947_v2 = vmax.f32 %v2690_v23, 0.0  ;;  %v2953_v60 = vmax.f32 %v2849_v3, 0.0 }
 0x85a   : > { %v2962_v12 = vmax.f32 %v2692_v31, 0.0  ;;  %v2968_v1 = vmax.f32 %v2851_v21, 0.0  ;;  %3317 = vmatprep.subr.bf16.mxu0 %v7435_v58  ;;  %v7420_v46 = vcombine.low %v2200_v36, %v2208_v37  ;;  %v7437_v58 = vcombine.high %v2216_v32, %v2224_v27 }
 0x85b   : > { %v2963_v41 = vmax.f32 %v2694_v54, 0.0  ;;  %v2969_v63 = vmax.f32 %v2853_v50, 0.0  ;;  %v2251_v3 = vunpack.c.h.bf16 %v2235_v5 }
 0x85c   : > { %v2994_v40 = vpack.c.bf16 %v2962_v12, %v2946_v20  ;;  %v9883_v15 = vpack.c.bf16 %v2968_v1, %v2952_v17  ;;  %v2201_v17 = vld [vmem:[%s9104_s26 + $0x128] sm:$0xff] }
 0x85d   : > { %v2995_v6 = vpack.c.bf16 %v2963_v41, %v2947_v2  ;;  %v9885_v56 = vpack.c.bf16 %v2969_v63, %v2953_v60  ;;  %v2783_v18 = vpop.f32.mrb[68].mxu1  ;;  %v2317_v20 = vrot.slane %v2251_v3, %v9742_v53  ;;  %v2209_v12 = vld [vmem:[%s9104_s26 + $0x168] sm:$0xff]  ;;  %v7436_v60 = vcombine.low %v2216_v32, %v2224_v27 }
 0x85e   : > { %v2784_v19 = vadd.f32 %v2783_v18, %v2297_v52  ;;  %v2785_v13 = vpop.f32.mrb[69].mxu1  ;;  %v7423_v41 = vcombine.high %v2201_v17, %v2209_v12 }
 0x85f   : > { %v2786_v16 = vadd.f32 %v2785_v13, %v2301_v33  ;;  %v2787_v26 = vpop.f32.mrb[70].mxu1 }
 0x860   : > { %v2788_v49 = vadd.f32 %v2787_v26, %v2297_v52  ;;  %v2789_v48 = vpop.f32.mrb[71].mxu1  ;;  %3307 = vmatmul.mubr.bf16.gmra.mrb[32].mxu0 %v9783_v9  ;;  %v2918_v62 = vmax.f32 %v2784_v19, 0.0  ;;  %v2250_v9 = vunpack.c.l.bf16 %v2235_v5 }
 0x861   : > { %v2790_v7 = vadd.f32 %v2789_v48, %v2301_v33  ;;  %3318 = vmatpush1.bf16.xpose.msra.mxu0 %v7434_v61  ;;  %3347 = vmatprep.mubr.bf16.mxu0 %v2979_v39  ;;  %v2919_v38 = vmax.f32 %v2786_v16, 0.0  ;;  %v2225_v16 = vld [vmem:[%s9104_s26 + $0x1e8] sm:$0xff] }
 0x862   : > { %v2934_v47 = vmax.f32 %v2788_v49, 0.0  ;;  %3364 = vmatprep.subr.bf16.mxu0 %v7421_v25  ;;  %v2313_v30 = vrot.slane %v2250_v9, %v9742_v53  ;;  %v2217_v25 = vld [vmem:[%s9104_s26 + $0x1a8] sm:$0xff]  ;;  %v2210_v9 = vld [vmem:[%s9104_s26 + $0x170] sm:$0xff] }
 0x863   : > { %v2935_v22 = vmax.f32 %v2790_v7, 0.0  ;;  %v7422_v7 = vcombine.low %v2201_v17, %v2209_v12 }
 0x864   : > { %v9891_v28 = vpack.c.bf16 %v2934_v47, %v2918_v62 }
 0x865   : > { %v9893_v43 = vpack.c.bf16 %v2935_v22, %v2919_v38  ;;  %v2793_v44 = vpop.f32.mrb[72].mxu1 }
 0x866   : > { %v2794_v51 = vadd.f32 %v2793_v44, %v2297_v52  ;;  %v2795_v57 = vpop.f32.mrb[73].mxu1 }
 0x867   : > { %v2796_v23 = vadd.f32 %v2795_v57, %v2301_v33  ;;  %v2797_v39 = vpop.f32.mrb[74].mxu1  ;;  %v2202_v57 = vld [vmem:[%s9104_s26 + $0x130] sm:$0xff] }
 0x868   : > { %v2798_v14 = vadd.f32 %v2797_v39, %v2297_v52  ;;  %v2799_v34 = vpop.f32.mrb[75].mxu1  ;;  %3348 = vmatmul.mubr.bf16.vlgmr.msra.gmra.mrb[28].mxu0 %v9861_v11  ;;  %v2950_v21 = vmax.f32 %v2794_v51, 0.0  ;;  %v7438_v39 = vcombine.low %v2217_v25, %v2225_v16  ;;  %v7425_v3 = vcombine.high %v2202_v57, %v2210_v9 }
 0x869   : > { %v2800_v31 = vadd.f32 %v2799_v34, %v2301_v33  ;;  %3365 = vmatpush1.bf16.xpose.msra.mxu0 %v7420_v46  ;;  %3355 = vmatprep.mubr.bf16.mxu0 %v2995_v6  ;;  %v2951_v54 = vmax.f32 %v2796_v23, 0.0 }
 0x86a   : > { %v2966_v0 = vmax.f32 %v2798_v14, 0.0  ;;  %3366 = vmatprep.subr.bf16.mxu0 %v7437_v58  ;;  %v7424_v14 = vcombine.low %v2202_v57, %v2210_v9 }
 0x86b   : > { %v2967_v50 = vmax.f32 %v2800_v31, 0.0  ;;  %v2203_v31 = vld [vmem:[%s9104_s26 + $0x138] sm:$0xff] }
 0x86c   : > { %v9900_v1 = vpack.c.bf16 %v2966_v0, %v2950_v21  ;;  %v2211_v21 = vld [vmem:[%s9104_s26 + $0x178] sm:$0xff] }
 0x86d   : > { %v2999_v52 = vpack.c.bf16 %v2967_v50, %v2951_v54  ;;  %v2889_v2 = vpop.f32.mrb[76].mxu1  ;;  %v7426_v54 = vcombine.low %v2203_v31, %v2211_v21 }
 0x86e   : > { %v2890_v11 = vadd.f32 %v2889_v2, %v2313_v30  ;;  %v2891_v33 = vpop.f32.mrb[77].mxu1 }
 0x86f   : > { %v2892_v63 = vadd.f32 %v2891_v33, %v2317_v20  ;;  %v2893_v36 = vpop.f32.mrb[78].mxu1 }
 0x870   : > { %v2894_v37 = vadd.f32 %v2893_v36, %v2313_v30  ;;  %v2895_v6 = vpop.f32.mrb[79].mxu1  ;;  %3356 = vmatmul.mubr.bf16.gmra.mrb[32].mxu0 %v2994_v40  ;;  %v2922_v53 = vmax.f32 %v2890_v11, 0.0  ;;  %v7439_v40 = vcombine.high %v2217_v25, %v2225_v16 }
 0x871   : > { %v2896_v18 = vadd.f32 %v2895_v6, %v2317_v20  ;;  %3367 = vmatpush1.bf16.xpose.msra.mxu0 %v7436_v60  ;;  %3396 = vmatprep.mubr.bf16.mxu0 %v9811_v45  ;;  %v2923_v19 = vmax.f32 %v2892_v63, 0.0 }
 0x872   : > { %v2938_v61 = vmax.f32 %v2894_v37, 0.0  ;;  %3413 = vmatprep.subr.bf16.mxu0 %v7423_v41 }
 0x873   : > { %v2939_v13 = vmax.f32 %v2896_v18, 0.0 }
 0x874   : > { %v2986_v26 = vpack.c.bf16 %v2938_v61, %v2922_v53 }
 0x875   : > { %v2987_v49 = vpack.c.bf16 %v2939_v13, %v2923_v19  ;;  %v2899_v48 = vpop.f32.mrb[80].mxu1 }
 0x876   : > { %v2900_v62 = vadd.f32 %v2899_v48, %v2313_v30  ;;  %v2901_v47 = vpop.f32.mrb[81].mxu1 }
 0x877   : > { %v2902_v38 = vadd.f32 %v2901_v47, %v2317_v20  ;;  %v2903_v22 = vpop.f32.mrb[82].mxu1 }
 0x878   : > { %v2904_v5 = vadd.f32 %v2903_v22, %v2313_v30  ;;  %v2905_v45 = vpop.f32.mrb[83].mxu1  ;;  %3397 = vmatmul.mubr.bf16.vlgmr.msra.gmra.mrb[28].mxu0 %v9809_v8  ;;  %v2954_v27 = vmax.f32 %v2900_v62, 0.0  ;;  %v2218_v8 = vld [vmem:[%s9104_s26 + $0x1b0] sm:$0xff]  ;;  %v7427_v30 = vcombine.high %v2203_v31, %v2211_v21 }
 0x879   : > { %v2906_v32 = vadd.f32 %v2905_v45, %v2317_v20  ;;  %3414 = vmatpush1.bf16.xpose.msra.mxu0 %v7422_v7  ;;  %3404 = vmatprep.mubr.bf16.mxu0 %v9843_v29  ;;  %v2955_v46 = vmax.f32 %v2902_v38, 0.0  ;;  %v2226_v29 = vld [vmem:[%s9104_s26 + $0x1f0] sm:$0xff] }
 0x87a   : > { %v2970_v44 = vmax.f32 %v2904_v5, 0.0  ;;  %3415 = vmatprep.subr.bf16.mxu0 %v7439_v40  ;;  %v7441_v34 = vcombine.high %v2218_v8, %v2226_v29  ;;  %v7440_v0 = vcombine.low %v2218_v8, %v2226_v29 }
 0x87b   : > { %v2971_v51 = vmax.f32 %v2906_v32, 0.0 }
 0x87c   : > { %v3002_v58 = vpack.c.bf16 %v2970_v44, %v2954_v27 }
 0x87d   : > { %v3003_v23 = vpack.c.bf16 %v2971_v51, %v2955_v46 }
 0x880   : > { %3405 = vmatmul.mubr.bf16.gmra.mrb[32].mxu0 %v9841_v59  ;;  %v2219_v59 = vld [vmem:[%s9104_s26 + $0x1b8] sm:$0xff] }
 0x881   : > { %3416 = vmatpush1.bf16.xpose.msra.mxu0 %v7438_v39  ;;  %3445 = vmatprep.mubr.bf16.mxu0 %v9893_v43  ;;  %v2227_v43 = vld [vmem:[%s9104_s26 + $0x1f8] sm:$0xff] }
 0x882   : > { %3462 = vmatprep.subr.bf16.mxu0 %v7425_v3  ;;  %v7443_v50 = vcombine.high %v2219_v59, %v2227_v43 }
 0x888   : > { %3446 = vmatmul.mubr.bf16.vlgmr.msra.gmra.mrb[28].mxu0 %v9891_v28  ;;  %v7442_v28 = vcombine.low %v2219_v59, %v2227_v43 }
 0x889   : > { %3463 = vmatpush1.bf16.xpose.msra.mxu0 %v7424_v14  ;;  %3453 = vmatprep.mubr.bf16.mxu0 %v2999_v52 }
 0x88a   : > { %3464 = vmatprep.subr.bf16.mxu0 %v7441_v34  ;;  %v7444_v34 = vld [vmem:[%s9099_s25 + $0x107] ss:$0 sm:$0xff] }
 0x890   : > { %3454 = vmatmul.mubr.bf16.gmra.mrb[32].mxu0 %v9900_v1 }
 0x891   : > { %3465 = vmatpush1.bf16.xpose.msra.mxu0 %v7440_v0  ;;  %3494 = vmatprep.mubr.bf16.mxu0 %v9865_v42  ;;  %v7411_v42 = vld [vmem:[%s9099_s25 + $0x106] ss:$0 sm:$0xff]  ;;  %v7445_v0 = vld [vmem:[%s9099_s25 + $0x108] ss:$0 sm:$0xff] }
 0x892   : > { %3511 = vmatprep.subr.bf16.mxu0 %v7427_v30 }
 0x898   : > { %3495 = vmatmul.mubr.bf16.vlgmr.msra.gmra.mrb[28].mxu0 %v9863_v24 }
 0x899   : > { %3512 = vmatpush1.bf16.xpose.msra.mxu0 %v7426_v54  ;;  %3502 = vmatprep.mubr.bf16.mxu0 %v9885_v56 }
 0x89a   : > { %3513 = vmatprep.subr.bf16.mxu0 %v7443_v50 }
 0x8a0   : > { %3503 = vmatmul.mubr.bf16.gmra.mrb[32].mxu0 %v9883_v15 }
 0x8a1   : > { %3514 = vmatpush1.bf16.xpose.msra.mxu0 %v7442_v28  ;;  %3543 = vmatprep.mubr.bf16.mxu0 %v2987_v49 }
 0x8a8   : > { %3544 = vmatmul.mubr.bf16.vlgmr.msra.gmra.mrb[28].mxu0 %v2986_v26 }
 0x8a9   : > { %3551 = vmatprep.mubr.bf16.mxu0 %v3003_v23 }
 0x8b0   : > { %3552 = vmatmul.mubr.bf16.gmra.mrb[32].mxu0 %v3002_v58 }
 0x97b   : > { %v3545_v20 = vpop.f32.mrb[28].mxu0 }
 0x97c   : > { %v8497_v17 = vadd.f32 %v7411_v42, %v3545_v20  ;;  %v3547_v12 = vpop.f32.mrb[29].mxu0 }
 0x97d   : > { %v3548_v1 = vpop.f32.mrb[30].mxu0 }
 0x97e   : > { %v8498_v52 = vadd.f32 %v7411_v42, %v3548_v1  ;;  %v3550_v2 = vpop.f32.mrb[31].mxu0  ;;  %v3562_v24 = vsel %vm878_vm1, %v8497_v17, 0.0 }
 0x97f   : > { %3563 = vadd.xlane.f32.xlu0 %v3562_v24 }
 0x980   : > { %v3565_v56 = vsel %vm878_vm1, %v8498_v52, 0.0 }
 0x981   : > { %3566 = vadd.xlane.f32.xlu1 %v3565_v56 }
 0x983   : > { %v3553_v60 = vpop.f32.mrb[32].mxu0 }
 0x984   : > { %v8499_v15 = vadd.f32 %v7411_v42, %v3553_v60  ;;  %v3555_v11 = vpop.f32.mrb[33].mxu0 }
 0x985   : > { %v3556_v33 = vpop.f32.mrb[34].mxu0 }
 0x986   : > { %v8500_v41 = vadd.f32 %v7411_v42, %v3556_v33  ;;  %v3558_v63 = vpop.f32.mrb[35].mxu0  ;;  %v3568_v36 = vsel %vm878_vm1, %v8499_v15, 0.0 }
 0x987   : > { %3569 = vadd.xlane.f32.xlu0 %v3568_v36 }
 0x988   : > { %v3571_v37 = vsel %vm878_vm1, %v8500_v41, 0.0 }
 0x989   : > { %3572 = vadd.xlane.f32.xlu1 %v3571_v37 }
 0xa0c   : > { %v3564_v6 = vpop.xlane.xlu0 %3563 }
 0xa0d   : > { %v3574_v18 = vmul.f32 0.03125, %v3564_v6 }
 0xa0e   : > { %v3567_v53 = vpop.xlane.xlu1 %3566 }
 0xa0f   : > { %v3578_v61 = vsub.f32 %v8497_v17, %v3574_v18  ;;  %v3575_v19 = vmul.f32 0.03125, %v3567_v53 }
 0xa11   : > { %v3579_v13 = vsub.f32 %v8498_v52, %v3575_v19  ;;  %v3582_v25 = vmul.f32 %v3578_v61, %v3578_v61 }
 0xa13   : > { %v3586_v16 = vsel %vm878_vm1, %v3582_v25, 0.0  ;;  %v3583_v26 = vmul.f32 %v3579_v13, %v3579_v13 }
 0xa14   : > { %3587 = vadd.xlane.f32.xlu0 %v3586_v16  ;;  %v3570_v49 = vpop.xlane.xlu0 %3569 }
 0xa15   : > { %v3576_v48 = vmul.f32 0.03125, %v3570_v49  ;;  %v3589_v7 = vsel %vm878_vm1, %v3583_v26, 0.0 }
 0xa16   : > { %3590 = vadd.xlane.f32.xlu1 %v3589_v7  ;;  %v3573_v62 = vpop.xlane.xlu1 %3572 }
 0xa17   : > { %v3580_v47 = vsub.f32 %v8499_v15, %v3576_v48  ;;  %v3577_v40 = vmul.f32 0.03125, %v3573_v62 }
 0xa19   : > { %v3581_v38 = vsub.f32 %v8500_v41, %v3577_v40  ;;  %v3584_v22 = vmul.f32 %v3580_v47, %v3580_v47 }
 0xa1b   : > { %v3592_v5 = vsel %vm878_vm1, %v3584_v22, 0.0  ;;  %v3585_v45 = vmul.f32 %v3581_v38, %v3581_v38 }
 0xa1c   : > { %3593 = vadd.xlane.f32.xlu0 %v3592_v5 }
 0xa1d   : > { %v3595_v32 = vsel %vm878_vm1, %v3585_v45, 0.0 }
 0xa1e   : > { %3596 = vadd.xlane.f32.xlu1 %v3595_v32 }
 0xaa1   : > { %v3588_v27 = vpop.xlane.xlu0 %3587 }
 0xaa2   : > { %v3598_v44 = vmul.f32 0.03125, %v3588_v27 }
 0xaa3   : > { %v3591_v46 = vpop.xlane.xlu1 %3590 }
 0xaa4   : > { %v3602_v51 = vadd.f32 1e-05, %v3598_v44  ;;  %v3599_v57 = vmul.f32 0.03125, %v3591_v46 }
 0xaa6   : > { %8735 = vrsqrt.f32 %v3602_v51  ;;  %v3603_v9 = vadd.f32 1e-05, %v3599_v57 }
 0xaa8   : > { %8737 = vrsqrt.f32 %v3603_v9 }
 0xaa9   : > { %v3594_v58 = vpop.xlane.xlu0 %3593 }
 0xaaa   : > { %v3600_v23 = vmul.f32 0.03125, %v3594_v58 }
 0xaab   : > { %v3597_v39 = vpop.xlane.xlu1 %3596 }
 0xaac   : > { %v3604_v3 = vadd.f32 1e-05, %v3600_v23  ;;  %v3601_v8 = vmul.f32 0.03125, %v3597_v39 }
 0xaae   : > { %8739 = vrsqrt.f32 %v3604_v3  ;;  %v3605_v29 = vadd.f32 1e-05, %v3601_v8 }
 0xab0   : > { %v8736_v14 = vpop.eup %8735  ;;  %8741 = vrsqrt.f32 %v3605_v29 }
 0xab1   : > { %v3610_v31 = vmul.f32 %v8736_v14, %v3578_v61 }
 0xab2   : > { %v8738_v21 = vpop.eup %8737 }
 0xab3   : > { %v3618_v30 = vmul.f32 %v7444_v34, %v3610_v31  ;;  %v3611_v59 = vmul.f32 %v8738_v21, %v3579_v13 }
 0xab5   : > { %v3626_v43 = vadd.f32 %v7445_v0, %v3618_v30  ;;  %v3619_v54 = vmul.f32 %v7444_v34, %v3611_v59 }
 0xab7   : > { %v3630_v50 = vadd.f32 %v3626_v43, %v9646_v10  ;;  %v3627_v28 = vadd.f32 %v7445_v0, %v3619_v54 }
 0xab8   : > { %v8740_v42 = vpop.eup %8739 }
 0xab9   : > { %3634 = vst.msk [vmem:[#allocation2] sm:$0xff] %vm878_vm1, %v3630_v50  ;;  %v3631_v20 = vadd.f32 %v3627_v28, %v9642_v4  ;;  %v3612_v17 = vmul.f32 %v8740_v42, %v3580_v47 }
 0xaba   : > { %v8742_v12 = vpop.eup %8741 }
 0xabb   : > { %3635 = vst.msk [vmem:[#allocation2 + $0x8] sm:$0xff] %vm878_vm1, %v3631_v20  ;;  %v3620_v1 = vmul.f32 %v7444_v34, %v3612_v17  ;;  %v3613_v52 = vmul.f32 %v8742_v12, %v3581_v38 }
 0xabd   : > { %v3628_v2 = vadd.f32 %v7445_v0, %v3620_v1  ;;  %v3621_v24 = vmul.f32 %v7444_v34, %v3613_v52 }
 0xabf   : > { %v3632_v56 = vadd.f32 %v3628_v2, %v9668_v35  ;;  %v3629_v60 = vadd.f32 %v7445_v0, %v3621_v24 }
 0xac1   : > { %3636 = vst.msk [vmem:[#allocation2 + $0x10] sm:$0xff] %vm878_vm1, %v3632_v56  ;;  %v3633_v10 = vadd.f32 %v3629_v60, %v9664_v55 }
 0xac3   : > { %3637 = vst.msk [vmem:[#allocation2 + $0x18] sm:$0xff] %vm878_vm1, %v3633_v10 }
 0xac4 PF: > { %p7446_p9 = scmp.lt.s32.totalorder %s9016_s29, 6 }
 0xac5   : > { %v3646_v4 = vld [vmem:[#allocation2] sm:$0xff] (!%p7446_p9)  ;;  %v3647_v15 = vld [vmem:[#allocation2 + $0x8] sm:$0xff] (!%p7446_p9)  ;;  %vm3650_vm3 = vcmask (!%p7446_p9), 261120   ;;  %v3738_v53 = vld [vmem:[%s9114_s28 + $0x10] sm:$0xff] (!%p7446_p9)  ;;  %vm3752_vm4 = vcmask (!%p7446_p9), 523264   ;;  %vm4296_vm6 = vcmask (!%p7446_p9), 130048  }
 0xac6   : > { %3641 = sbr.rel (%p7446_p9) target bundleno = 6905 (0x1af9), region = 88  ;;  %v8353_v35 = vpack.c.bf16 (!%p7446_p9), %v3647_v15, %v3646_v4  ;;  %v3644_v41 = vld [vmem:[%s9114_s28 + $0x40] sm:$0xff] (!%p7446_p9)  ;;  %v9947_v36 = vld [vmem:[#allocation3 + $0x8] sm:$0xff] (!%p7446_p9)  ;;  %v3739_v61 = vld [vmem:[%s9114_s28 + $0x18] sm:$0xff] (!%p7446_p9) }
 0xac7   : > { %8033 = vmatprep.mubr.msk.f32.mxu0 (!%p7446_p9), %vm3650_vm3, %v3644_v41  ;;  %v9945_v55 = vld [vmem:[#allocation3] sm:$0xff] (!%p7446_p9)  ;;  %v3737_v6 = vld [vmem:[%s9114_s28 + $0x8] sm:$0xff] (!%p7446_p9)  ;;  %v3747_v25 = vmul.f32 (!%p7446_p9), %v3739_v61, %v9947_v36  ;;  %v3742_v38 = vld [vmem:[%s9114_s28 + $0x30] sm:$0xff] (!%p7446_p9) }
 0xac8   : > { %v3648_v11 = vld [vmem:[#allocation2 + $0x10] sm:$0xff] (!%p7446_p9)  ;;  %v3736_v37 = vld [vmem:[%s9114_s28] sm:$0xff] (!%p7446_p9)  ;;  %8354 = vmatprep.subr.bf16.mxu0 (!%p7446_p9), %v8353_v35  ;;  %v3745_v19 = vmul.f32 (!%p7446_p9), %v3737_v6, %v9947_v36  ;;  %v3746_v13 = vmul.f32 (!%p7446_p9), %v3738_v53, %v9945_v55  ;;  %v3741_v49 = vld [vmem:[%s9114_s28 + $0x28] sm:$0xff] (!%p7446_p9)  ;;  %v3750_v45 = vmul.f32 (!%p7446_p9), %v3742_v38, %v9945_v55 }
 0xac9   : > { %v3744_v18 = vmul.f32 (!%p7446_p9), %v3736_v37, %v9945_v55  ;;  %8356 = vmatpush3.bf16.msra.mxu0 (!%p7446_p9), %v8353_v35  ;;  %v3740_v26 = vld [vmem:[%s9114_s28 + $0x20] sm:$0xff] (!%p7446_p9)  ;;  %v3645_v48 = vld [vmem:[%s9114_s28 + $0x48] sm:$0xff] (!%p7446_p9)  ;;  %v3749_v47 = vmul.f32 (!%p7446_p9), %v3741_v49, %v9947_v36  ;;  %v3743_v22 = vld [vmem:[%s9114_s28 + $0x38] sm:$0xff] (!%p7446_p9) }
 0xaca   : > { %v3649_v33 = vld [vmem:[#allocation2 + $0x18] sm:$0xff] (!%p7446_p9)  ;;  %v8365_v7 = vpack.c.bf16 (!%p7446_p9), %v3747_v25, %v3746_v13  ;;  %v3748_v62 = vmul.f32 (!%p7446_p9), %v3740_v26, %v9945_v55  ;;  %v3732_v40 = vld [vmem:[%s9109_s6] sm:$0xff] (!%p7446_p9)  ;;  %v3751_v32 = vmul.f32 (!%p7446_p9), %v3743_v22, %v9947_v36  ;;  %v3733_v44 = vld [vmem:[%s9109_s6 + $0x8] sm:$0xff] (!%p7446_p9) }
 0xacb   : > { %v8357_v63 = vpack.c.bf16 (!%p7446_p9), %v3649_v33, %v3648_v11  ;;  %v8361_v16 = vpack.c.bf16 (!%p7446_p9), %v3745_v19, %v3744_v18  ;;  %v3734_v46 = vld [vmem:[%s9109_s6 + $0x10] sm:$0xff] (!%p7446_p9)  ;;  %v3735_v51 = vld [vmem:[%s9109_s6 + $0x18] sm:$0xff] (!%p7446_p9)  ;;  %v3856_v23 = vld [vmem:[%s9114_s28 + $0x60] sm:$0xff] (!%p7446_p9) }
 0xacc   : > { %v8369_v5 = vpack.c.bf16 (!%p7446_p9), %v3749_v47, %v3748_v62  ;;  %v8373_v27 = vpack.c.bf16 (!%p7446_p9), %v3751_v32, %v3750_v45  ;;  %v3854_v57 = vld [vmem:[%s9114_s28 + $0x50] sm:$0xff] (!%p7446_p9)  ;;  %v3855_v9 = vld [vmem:[%s9114_s28 + $0x58] sm:$0xff] (!%p7446_p9)  ;;  %v3857_v39 = vld [vmem:[%s9114_s28 + $0x68] sm:$0xff] (!%p7446_p9) }
 0xacd   : > { %8358 = vmatprep.subr.bf16.mxu0 %v8357_v63  ;;  %v8377_v58 = vpack.c.bf16 %v3855_v9, %v3854_v57  ;;  %v8381_v3 = vpack.c.bf16 %v3857_v39, %v3856_v23  ;;  %v3859_v8 = vld [vmem:[%s9114_s28 + $0x70] sm:$0xff]  ;;  %v3860_v29 = vld [vmem:[%s9114_s28 + $0x78] sm:$0xff]  ;;  %v3861_v0 = vld [vmem:[%s9114_s28 + $0x80] sm:$0xff] }
 0xace   : > { %8360 = vmatpush3.bf16.msra.mxu0 %v8357_v63  ;;  %v8385_v14 = vpack.c.bf16 %v3860_v29, %v3859_v8  ;;  %v3862_v30 = vld [vmem:[%s9114_s28 + $0x88] sm:$0xff]  ;;  %v3864_v42 = vld [vmem:[%s9114_s28 + $0x90] sm:$0xff]  ;;  %v3865_v20 = vld [vmem:[%s9114_s28 + $0x98] sm:$0xff] }
 0xacf   : > { %8362 = vmatprep.subr.bf16.mxu0 %v8361_v16  ;;  %v8389_v50 = vpack.c.bf16 %v3862_v30, %v3861_v0  ;;  %v8393_v1 = vpack.c.bf16 %v3865_v20, %v3864_v42  ;;  %v3866_v2 = vld [vmem:[%s9114_s28 + $0xa0] sm:$0xff]  ;;  %v3867_v24 = vld [vmem:[%s9114_s28 + $0xa8] sm:$0xff]  ;;  %v7453_v60 = vld [vmem:[%s9114_s28 + $0x150] ss:$0 sm:$0xff] }
 0xad0   : > { %v8397_v56 = vpack.c.bf16 %v3867_v24, %v3866_v2  ;;  %v10007_v15 = vld [vmem:[%s10530_s4] sm:$0xff]  ;;  %v7456_v33 = vld [vmem:[%s9114_s28 + $0x151] ss:$0 sm:$0xff]  ;;  %vm10014_vm5 = vmpackc.low %vm3650_vm3, %vm3650_vm3 }
 0xad1   : > { %8034 = vmatmul.mubr.msk.f32.vlgmr.msra.gmra.mrb[0].mxu0 %vm3650_vm3, %v3645_v48  ;;  %v10025_v19 = vld [vmem:[%s10530_s4 + $0x8] sm:$0xff]  ;;  %v10030_v13 = vld [vmem:[%s10530_s4 + $0x10] sm:$0xff]  ;;  %v10037_v26 = vld [vmem:[%s10530_s4 + $0x18] sm:$0xff] }
 0xad2   : > { %8364 = vmatpush3.bf16.msra.mxu0 %v8361_v16  ;;  %8052 = vmatprep.mubr.msk.f32.mxu0 %vm3752_vm4, %v3732_v40  ;;  %v10043_v49 = vld [vmem:[%s10530_s4 + $0x20] sm:$0xff]  ;;  %v10051_v62 = vld [vmem:[%s10530_s4 + $0x28] sm:$0xff]  ;;  %v10057_v47 = vld [vmem:[%s10530_s4 + $0x30] sm:$0xff] }
 0xad3   : > { %8366 = vmatprep.subr.bf16.mxu0 %v8365_v7  ;;  %v10065_v22 = vld [vmem:[%s10530_s4 + $0x38] sm:$0xff]  ;;  %v7459_v45 = vld [vmem:[%s9114_s28 + $0x152] ss:$0 sm:$0xff]  ;;  %v10090_v30 = vld [vmem:[%s10531_s5] sm:$0xff] }
 0xad4   : > { %v10114_v2 = vld [vmem:[%s10531_s5 + $0x28] sm:$0xff]  ;;  %v4841_v18 = vld [vmem:[%s9114_s28 + $0xd0] sm:$0xff] }
 0xad6   : > { %8368 = vmatpush3.bf16.msra.mxu0 %v8365_v7 }
 0xad7   : > { %8370 = vmatprep.subr.bf16.mxu0 %v8369_v5 }
 0xada   : > { %8372 = vmatpush3.bf16.msra.mxu0 %v8369_v5 }
 0xadb   : > { %8374 = vmatprep.subr.bf16.mxu0 %v8373_v27 }
 0xade   : > { %8376 = vmatpush3.bf16.msra.mxu0 %v8373_v27 }
 0xadf   : > { %8378 = vmatprep.subr.bf16.mxu0 %v8377_v58 }
 0xae1   : > { %8053 = vmatmul.mubr.msk.f32.vlgmr.msra.gmra.mrb[2].mxu0 %vm3752_vm4, %v3733_v44 }
 0xae2   : > { %8055 = vmatprep.mubr.msk.f32.mxu0 %vm3752_vm4, %v3734_v46  ;;  %8380 = vmatpush3.bf16.msra.mxu0 %v8377_v58 }
 0xae3   : > { %8382 = vmatprep.subr.bf16.mxu0 %v8381_v3 }
 0xae5   : > { %8056 = vmatmul.mubr.msk.f32.gmra.mrb[4].mxu0 %vm3752_vm4, %v3735_v51 }
 0xae6   : > { %8384 = vmatpush3.bf16.msra.mxu0 %v8381_v3 }
 0xae7   : > { %8386 = vmatprep.subr.bf16.mxu0 %v8385_v14 }
 0xba4   : > { %v9981_v34 = vpop.f32.mrb[0].mxu0 }
 0xba5   : > { %v9983_v31 = vpop.f32.mrb[1].mxu0 }
 0xbb4   : > { %v8054_v21 = vpop.f32.mrb[2].mxu0 }
 0xbb5   : > { %v3831_v59 = vpop.f32.mrb[3].mxu0  ;;  %v3851_v54 = vadd.f32 %v8054_v21, %v9947_v36 }
 0xbb6   : > { %v3850_v43 = vadd.f32 %v3831_v59, %v9945_v55 }
 0xbb8   : > { %8066 = vmatprep.mubr.msk.f32.mxu0 %vm3650_vm3, %v3850_v43  ;;  %v8057_v28 = vpop.f32.mrb[4].mxu0  ;;  %v10095_v43 = vld [vmem:[%s10531_s5 + $0x8] sm:$0xff] }
 0xbb9   : > { %8067 = vmatmul.mubr.msk.f32.vlgmr.msra.gmra.mrb[6].mxu0 %vm3650_vm3, %v3851_v54  ;;  %v3841_v17 = vpop.f32.mrb[5].mxu0  ;;  %v3853_v52 = vadd.f32 %v8057_v28, %v9947_v36  ;;  %v10101_v28 = vld [vmem:[%s10531_s5 + $0x10] sm:$0xff] }
 0xbba   : > { %8388 = vmatpush3.bf16.msra.mxu0 %v8385_v14  ;;  %v3852_v12 = vadd.f32 %v3841_v17, %v9945_v55 }
 0xbbb   : > { %8390 = vmatprep.subr.bf16.mxu0 %v8389_v50 }
 0xbbc   : > { %8077 = vmatprep.mubr.msk.f32.mxu0 %vm3650_vm3, %v3852_v12  ;;  %v10108_v12 = vld [vmem:[%s10531_s5 + $0x18] sm:$0xff] }
 0xbbe   : > { %8392 = vmatpush3.bf16.msra.mxu0 %v8389_v50 }
 0xbbf   : > { %8394 = vmatprep.subr.bf16.mxu0 %v8393_v1 }
 0xbc1   : > { %8078 = vmatmul.mubr.msk.f32.vlgmr.msra.gmra.mrb[8].mxu0 %vm3650_vm3, %v3853_v52 }
 0xbc2   : > { %8396 = vmatpush3.bf16.msra.mxu0 %v8393_v1  ;;  %8088 = vmatprep.mubr.msk.f32.mxu0 %vm3650_vm3, %v9945_v55 }
 0xbc3   : > { %8398 = vmatprep.subr.bf16.mxu0 %v8397_v56 }
 0xbc6   : > { %8400 = vmatpush3.bf16.msra.mxu0 %v8397_v56 }
 0xbc9   : > { %8089 = vmatmul.mubr.msk.f32.vlgmr.msra.gmra.mrb[10].mxu0 %vm3650_vm3, %v9947_v36 }
 0xc8c   : > { %v8068_v10 = vpop.f32.mrb[6].mxu0 }
 0xc8d   : > { %v3966_v4 = vpop.f32.mrb[7].mxu0  ;;  %v3972_v61 = vadd.f32 %v8068_v10, %v7453_v60 }
 0xc8e   : > { %v3967_v11 = vadd.f32 %v7453_v60, %v3966_v4 }
 0xc8f   : > { %v4146_v25 = vmul.f32 %v3972_v61, %v10025_v19  ;;  %v4148_v48 = vmul.f32 %v3972_v61, %v10037_v26  ;;  %v4150_v40 = vmul.f32 %v3972_v61, %v10051_v62  ;;  %v4152_v5 = vmul.f32 %v3972_v61, %v10065_v22 }
 0xc90   : > { %v4145_v35 = vmul.f32 %v3967_v11, %v10007_v15  ;;  %v4147_v16 = vmul.f32 %v3967_v11, %v10030_v13  ;;  %v4149_v7 = vmul.f32 %v3967_v11, %v10043_v49  ;;  %v4151_v38 = vmul.f32 %v3967_v11, %v10057_v47 }
 0xc92   : > { %8095 = vmatprep.mubr.msk.f32.mxu0 %vm3650_vm3, %v4145_v35  ;;  %v10123_v35 = vld [vmem:[%s10531_s5 + $0x20] sm:$0xff] }
 0xc94   : > { %v8079_v41 = vpop.f32.mrb[8].mxu0 }
 0xc95   : > { %v4057_v63 = vadd.f32 %v8079_v41, %v7456_v33  ;;  %v4051_v37 = vpop.f32.mrb[9].mxu0 }
 0xc96   : > { %v4052_v6 = vadd.f32 %v7456_v33, %v4051_v37  ;;  %v10128_v33 = vld [vmem:[%s10531_s5 + $0x38] sm:$0xff] }
 0xc98   : > { %v8401_v53 = vpack.c.bf16 %v4057_v63, %v4052_v6 }
 0xc9a   : > { %8403 = vmatprep.subr.msk.bf16.mxu0 %vm10014_vm5, %v8401_v53 }
 0xc9b   : > { %8406 = vmatpush3.bf16.xpose.msk.msra.mxu0 %vm10014_vm5, %v8401_v53 }
 0xc9c   : > { %v8090_v32 = vpop.f32.mrb[10].mxu0 }
 0xc9d   : > { %v4142_v27 = vadd.f32 %v8090_v32, %v7459_v45  ;;  %v4136_v44 = vpop.f32.mrb[11].mxu0 }
 0xc9e   : > { %v4137_v46 = vadd.f32 %v7459_v45, %v4136_v44 }
 0xc9f   : > { %v4156_v51 = vmul.f32 %v4142_v27, %v10037_v26  ;;  %v4154_v23 = vmul.f32 %v4142_v27, %v10025_v19  ;;  %v4158_v8 = vmul.f32 %v4142_v27, %v10051_v62  ;;  %v4160_v14 = vmul.f32 %v4142_v27, %v10065_v22 }
 0xca0   : > { %v4155_v57 = vmul.f32 %v4137_v46, %v10030_v13  ;;  %v4153_v58 = vmul.f32 %v4137_v46, %v10007_v15  ;;  %v4157_v3 = vmul.f32 %v4137_v46, %v10043_v49  ;;  %v4159_v29 = vmul.f32 %v4137_v46, %v10057_v47 }
 0xca2   : > { %8096 = vmatmul.mubr.msk.f32.vlgmr.msra.gmra.mrb[12].mxu0 %vm3650_vm3, %v4146_v25  ;;  %v8407_v9 = vpack.c.bf16 %v4156_v51, %v4155_v57  ;;  %v10076_v39 = vpack.c.bf16 %v4154_v23, %v4153_v58  ;;  %v10083_v21 = vpack.c.bf16 %v4158_v8, %v4157_v3  ;;  %v10085_v0 = vpack.c.bf16 %v4160_v14, %v4159_v29  ;;  %v10137_v25 = vld [vmem:[%s10531_s5 + $0x30] sm:$0xff] }
 0xca3   : > { %8098 = vmatprep.mubr.msk.f32.mxu0 %vm3650_vm3, %v4147_v16 }
 0xca4   : > { %8408 = vmatprep.subr.bf16.mxu1 %v8407_v9 }
 0xca5   : > { %8410 = vmatpush3.bf16.msra.mxu1 %v8407_v9 }
 0xca6   : > { %8099 = vmatmul.mubr.msk.f32.gmra.mrb[14].mxu0 %vm3650_vm3, %v4148_v48  ;;  %8412 = vmatprep.subr.bf16.mxu1 %v10076_v39 }
 0xca7   : > { %8101 = vmatprep.mubr.msk.f32.mxu0 %vm3650_vm3, %v4149_v7 }
 0xcaa   : > { %8102 = vmatmul.mubr.msk.f32.gmra.mrb[16].mxu0 %vm3650_vm3, %v4150_v40 }
 0xcab   : > { %8104 = vmatprep.mubr.msk.f32.mxu0 %vm3650_vm3, %v4151_v38 }
 0xcae   : > { %8105 = vmatmul.mubr.msk.f32.gmra.mrb[18].mxu0 %vm3650_vm3, %v4152_v5 }
 0xd75   : > { %v8097_v59 = vpop.f32.mrb[12].mxu0 }
 0xd76   : > { %v4257_v54 = vpop.f32.mrb[13].mxu0  ;;  %v4263_v42 = vadd.f32 %v8097_v59, %v10095_v43 }
 0xd77   : > { %v4258_v50 = vadd.f32 %v4257_v54, %v10090_v30 }
 0xd78   : > { %v4300_v10 = vsel %vm4296_vm6, %v4263_v42, -inf }
 0xd79   : > { %v8100_v20 = vpop.f32.mrb[14].mxu0  ;;  %v4297_v17 = vsel %vm4296_vm6, %v4258_v50, -inf }
 0xd7a   : > { %v4267_v1 = vpop.f32.mrb[15].mxu0  ;;  %4298 = vmax.xlane.f32.xlu1 %v4297_v17  ;;  %v4273_v24 = vadd.f32 %v8100_v20, %v10108_v12 }
 0xd7b   : > { %v4268_v52 = vadd.f32 %v4267_v1, %v10101_v28 }
 0xd7c   : > { %v4306_v6 = vsel %vm4296_vm6, %v4273_v24, -inf }
 0xd7d   : > { %v8103_v56 = vpop.f32.mrb[16].mxu0  ;;  %v4303_v60 = vsel %vm4296_vm6, %v4268_v52, -inf }
 0xd7e   : > { %v4283_v4 = vadd.f32 %v8103_v56, %v10114_v2  ;;  %v4277_v11 = vpop.f32.mrb[17].mxu0  ;;  %4304 = vmax.xlane.f32.xlu0 %v4303_v60  ;;  %4301 = vmax.xlane.f32.xlu1 %v4300_v10 }
 0xd7f   : > { %v4278_v63 = vadd.f32 %v4277_v11, %v10123_v35 }
 0xd80   : > { %v4312_v41 = vsel %vm4296_vm6, %v4283_v4, -inf }
 0xd81   : > { %v8106_v37 = vpop.f32.mrb[18].mxu0  ;;  %v4309_v7 = vsel %vm4296_vm6, %v4278_v63, -inf }
 0xd82   : > { %v4293_v53 = vadd.f32 %v8106_v37, %v10128_v33  ;;  %v4287_v61 = vpop.f32.mrb[19].mxu0  ;;  %4307 = vmax.xlane.f32.xlu0 %v4306_v6  ;;  %4313 = vmax.xlane.f32.xlu1 %v4312_v41 }
 0xd83   : > { %v4288_v48 = vadd.f32 %v4287_v61, %v10137_v25 }
 0xd84   : > { %v4318_v16 = vsel %vm4296_vm6, %v4293_v53, -inf }
 0xd85   : > { %v4315_v40 = vsel %vm4296_vm6, %v4288_v48, -inf }
 0xd86   : > { %4310 = vmax.xlane.f32.xlu0 %v4309_v7  ;;  %4319 = vmax.xlane.f32.xlu1 %v4318_v16 }
 0xd8a   : > { %4316 = vmax.xlane.f32.xlu0 %v4315_v40 }
 0xe07   : > { %v4299_v38 = vpop.xlane.xlu1 %4298 }
 0xe08   : > { %v4321_v5 = vsub.f32 %v4258_v50, %v4299_v38  ;;  %v3869_v38 = vld [vmem:[%s9114_s28 + $0xb0] sm:$0xff] }
 0xe0a   : > { %v4329_v44 = vmul.f32 1.442695, %v4321_v5  ;;  %v3870_v5 = vld [vmem:[%s9114_s28 + $0xb8] sm:$0xff] }
 0xe0b   : > { %v4305_v45 = vpop.xlane.xlu0 %4304  ;;  %v4302_v32 = vpop.xlane.xlu1 %4301 }
 0xe0c   : > { %v4323_v27 = vsub.f32 %v4268_v52, %v4305_v45  ;;  %v4322_v51 = vsub.f32 %v4263_v42, %v4302_v32  ;;  %v3871_v45 = vld [vmem:[%s9114_s28 + $0xc0] sm:$0xff]  ;;  %v8423_v32 = vpack.c.bf16 %v3870_v5, %v3869_v38 }
 0xe0e   : > { %v4333_v46 = vmul.f32 1.442695, %v4323_v27  ;;  %v4331_v23 = vmul.f32 1.442695, %v4322_v51  ;;  %v3872_v27 = vld [vmem:[%s9114_s28 + $0xc8] sm:$0xff]  ;;  %8424 = vmatprep.subr.bf16.mxu0 %v8423_v32 }
 0xe0f   : > { %v4308_v57 = vpop.xlane.xlu0 %4307  ;;  %v4314_v9 = vpop.xlane.xlu1 %4313  ;;  %8426 = vmatpush3.bf16.msra.mxu0 %v8423_v32 }
 0xe10   : > { %8747 = vpow2.f32 %v4333_v46  ;;  %v4324_v58 = vsub.f32 %v4273_v24, %v4308_v57  ;;  %v4326_v8 = vsub.f32 %v4283_v4, %v4314_v9 }
 0xe11   : > { %8749 = vpow2.f32 %v4329_v44  ;;  %v8427_v44 = vpack.c.bf16 %v3872_v27, %v3871_v45  ;;  %v7488_v45 = vld [vmem:[%s9114_s28 + $0x157] ss:$0 sm:$0xff] }
 0xe12   : > { %v4335_v3 = vmul.f32 1.442695, %v4324_v58  ;;  %v4339_v54 = vmul.f32 1.442695, %v4326_v8 }
 0xe13   : > { %v4311_v29 = vpop.xlane.xlu0 %4310  ;;  %v4320_v14 = vpop.xlane.xlu1 %4319  ;;  %8428 = vmatprep.subr.bf16.mxu0 %v8427_v44 }
 0xe14   : > { %8751 = vpow2.f32 %v4335_v3  ;;  %v4325_v59 = vsub.f32 %v4278_v63, %v4311_v29  ;;  %v4328_v20 = vsub.f32 %v4293_v53, %v4320_v14  ;;  %8430 = vmatpush3.bf16.msra.mxu0 %v8427_v44 }
 0xe15   : > { %8753 = vpow2.f32 %v4331_v23 }
 0xe16   : > { %v4337_v50 = vmul.f32 1.442695, %v4325_v59  ;;  %v4343_v52 = vmul.f32 1.442695, %v4328_v20 }
 0xe17   : > { %v4317_v17 = vpop.xlane.xlu0 %4316 }
 0xe18   : > { %8755 = vpow2.f32 %v4337_v50  ;;  %v4327_v1 = vsub.f32 %v4288_v48, %v4317_v17 }
 0xe19   : > { %8757 = vpow2.f32 %v4339_v54 }
 0xe1a   : > { %v8748_v42 = vpop.eup %8747  ;;  %v4341_v56 = vmul.f32 1.442695, %v4327_v1 }
 0xe1b   : > { %v4351_v24 = vsel %vm4296_vm6, %v8748_v42, 0.0  ;;  %v8750_v60 = vpop.eup %8749 }
 0xe1c   : > { %8759 = vpow2.f32 %v4341_v56  ;;  %4352 = vadd.xlane.f32.xlu0 %v4351_v24  ;;  %v4345_v11 = vsel %vm4296_vm6, %v8750_v60, 0.0 }
 0xe1d   : > { %8761 = vpow2.f32 %v4343_v52 }
 0xe1e   : > { %v8752_v10 = vpop.eup %8751 }
 0xe1f   : > { %v4354_v4 = vsel %vm4296_vm6, %v8752_v10, 0.0  ;;  %v8754_v41 = vpop.eup %8753 }
 0xe20   : > { %4355 = vadd.xlane.f32.xlu1 %v4354_v4  ;;  %4346 = vadd.xlane.f32.xlu0 %v4345_v11  ;;  %v4348_v6 = vsel %vm4296_vm6, %v8754_v41, 0.0  ;;  %v4847_v11 = vld [vmem:[%s9114_s28 + $0xf8] sm:$0xff] }
 0xe22   : > { %v8756_v63 = vpop.eup %8755 }
 0xe23   : > { %v4357_v37 = vsel %vm4296_vm6, %v8756_v63, 0.0  ;;  %v8758_v53 = vpop.eup %8757 }
 0xe24   : > { %4358 = vadd.xlane.f32.xlu0 %v4357_v37  ;;  %4349 = vadd.xlane.f32.xlu1 %v4348_v6  ;;  %v4360_v48 = vsel %vm4296_vm6, %v8758_v53, 0.0  ;;  %v4849_v37 = vld [vmem:[%s9114_s28 + $0x108] sm:$0xff] }
 0xe26   : > { %v8760_v61 = vpop.eup %8759 }
 0xe27   : > { %v4363_v16 = vsel %vm4296_vm6, %v8760_v61, 0.0  ;;  %v8762_v7 = vpop.eup %8761 }
 0xe28   : > { %4364 = vadd.xlane.f32.xlu0 %v4363_v16  ;;  %4361 = vadd.xlane.f32.xlu1 %v4360_v48  ;;  %v4366_v40 = vsel %vm4296_vm6, %v8762_v7, 0.0 }
 0xe2c   : > { %4367 = vadd.xlane.f32.xlu1 %v4366_v40 }
 0xea9   : > { %v4353_v46 = vpop.xlane.xlu0 %4352 }
 0xeaa   : > { %8763 = vrcp.f32 %v4353_v46 }
 0xead   : > { %v4347_v51 = vpop.xlane.xlu0 %4346  ;;  %v4356_v57 = vpop.xlane.xlu1 %4355 }
 0xeae   : > { %8765 = vrcp.f32 %v4347_v51 }
 0xeaf   : > { %8767 = vrcp.f32 %v4356_v57 }
 0xeb1   : > { %v4350_v9 = vpop.xlane.xlu1 %4349  ;;  %v4359_v58 = vpop.xlane.xlu0 %4358 }
 0xeb2   : > { %8769 = vrcp.f32 %v4350_v9 }
 0xeb3   : > { %8771 = vrcp.f32 %v4359_v58 }
 0xeb4   : > { %v8764_v23 = vpop.eup %8763 }
 0xeb5   : > { %v4379_v3 = vmul.f32 %v8764_v23, %v8748_v42  ;;  %v4362_v59 = vpop.xlane.xlu1 %4361  ;;  %v4365_v50 = vpop.xlane.xlu0 %4364 }
 0xeb6   : > { %8773 = vrcp.f32 %v4362_v59 }
 0xeb7   : > { %8111 = vmatprep.mubr.msk.f32.mxu1 %vm4296_vm6, %v4379_v3  ;;  %8775 = vrcp.f32 %v4365_v50  ;;  %v4842_v50 = vld [vmem:[%s9114_s28 + $0xd8] sm:$0xff] }
 0xeb8   : > { %v8766_v8 = vpop.eup %8765 }
 0xeb9   : > { %v8768_v29 = vpop.eup %8767  ;;  %v4377_v14 = vmul.f32 %v8766_v8, %v8750_v60  ;;  %v4368_v42 = vpop.xlane.xlu1 %4367 }
 0xeba   : > { %v4380_v54 = vmul.f32 %v8768_v29, %v8752_v10  ;;  %8777 = vrcp.f32 %v4368_v42 }
 0xebc   : > { %8112 = vmatmul.mubr.msk.f32.vlgmr.msra.gmra.mrb[0].mxu1 %vm4296_vm6, %v4380_v54  ;;  %v8770_v20 = vpop.eup %8769 }
 0xebd   : > { %8414 = vmatpush3.bf16.msra.mxu1 %v10076_v39  ;;  %8118 = vmatprep.mubr.msk.f32.mxu1 %vm4296_vm6, %v4377_v14  ;;  %v8772_v17 = vpop.eup %8771  ;;  %v4378_v1 = vmul.f32 %v8770_v20, %v8754_v41  ;;  %v8431_v20 = vpack.c.bf16 %v4842_v50, %v4841_v18 }
 0xebe   : > { %8416 = vmatprep.subr.bf16.mxu1 %v10083_v21  ;;  %v4381_v52 = vmul.f32 %v8772_v17, %v8756_v63  ;;  %v4848_v63 = vld [vmem:[%s9114_s28 + $0x100] sm:$0xff] }
 0xebf   : > { %v4843_v17 = vld [vmem:[%s9114_s28 + $0xe0] sm:$0xff] }
 0xec0   : > { %v8774_v39 = vpop.eup %8773 }
 0xec1   : > { %v8776_v56 = vpop.eup %8775  ;;  %v4382_v24 = vmul.f32 %v8774_v39, %v8758_v53  ;;  %v4852_v39 = vld [vmem:[%s9114_s28 + $0x118] sm:$0xff] }
 0xec2   : > { %v4383_v60 = vmul.f32 %v8776_v56, %v8760_v61  ;;  %v8443_v61 = vpack.c.bf16 %v4849_v37, %v4848_v63  ;;  %v7483_v63 = vld [vmem:[%s9114_s28 + $0x154] ss:$0 sm:$0xff] }
 0xec4   : > { %8119 = vmatmul.mubr.msk.f32.vlgmr.msra.gmra.mrb[0].mxu1 %vm4296_vm6, %v4378_v1  ;;  %v8778_v10 = vpop.eup %8777  ;;  %v4844_v1 = vld [vmem:[%s9114_s28 + $0xe8] sm:$0xff] }
 0xec5   : > { %8418 = vmatpush3.bf16.msra.mxu1 %v10083_v21  ;;  %8125 = vmatprep.mubr.msk.f32.mxu1 %vm4296_vm6, %v4381_v52  ;;  %v4384_v4 = vmul.f32 %v8778_v10, %v8762_v7  ;;  %v4846_v21 = vld [vmem:[%s9114_s28 + $0xf0] sm:$0xff]  ;;  %v8435_v42 = vpack.c.bf16 %v4844_v1, %v4843_v17 }
 0xec6   : > { %8420 = vmatprep.subr.bf16.mxu1 %v10085_v0  ;;  %v8439_v41 = vpack.c.bf16 %v4847_v11, %v4846_v21  ;;  %v4851_v52 = vld [vmem:[%s9114_s28 + $0x110] sm:$0xff] }
 0xec7   : > { %v8447_v56 = vpack.c.bf16 %v4852_v39, %v4851_v52 }
 0xec8   : > { %8440 = vmatprep.subr.bf16.mxu0 %v8439_v41 }
 0xecc   : > { %8126 = vmatmul.mubr.msk.f32.vlgmr.msra.gmra.mrb[0].mxu1 %vm4296_vm6, %v4382_v24 }
 0xecd   : > { %8422 = vmatpush3.bf16.msra.mxu1 %v10085_v0  ;;  %8132 = vmatprep.mubr.msk.f32.mxu1 %vm4296_vm6, %v4383_v60  ;;  %v7480_v0 = vld [vmem:[%s9114_s28 + $0x153] ss:$0 sm:$0xff] }
 0xece   : > { %8432 = vmatprep.subr.bf16.mxu1 %v8431_v20 }
 0xed4   : > { %8133 = vmatmul.mubr.msk.f32.vlgmr.msra.gmra.mrb[0].mxu1 %vm4296_vm6, %v4384_v4 }
 0xed5   : > { %8434 = vmatpush3.bf16.msra.mxu1 %v8431_v20 }
 0xed6   : > { %8436 = vmatprep.subr.bf16.mxu1 %v8435_v42 }
 0xed9   : > { %8438 = vmatpush3.bf16.msra.mxu1 %v8435_v42 }
 0xeda   : > { %8448 = vmatprep.subr.bf16.mxu1 %v8447_v56 }
 0xfa7   : > { %v8134_v6 = vpop.f32.mrb[0].mxu1 }
 0xfa8   : > { %v4702_v53 = vpop.f32.mrb[1].mxu1 }
 0xfa9   : > { %8143 = vmatprep.mubr.msk.f32.mxu0 %vm3650_vm3, %v4702_v53 }
 0xfaa   : > { %8144 = vmatmul.mubr.msk.f32.vlgmr.msra.gmra.mrb[20].mxu0 %vm3650_vm3, %v8134_v6 }
 0xfab   : > { %8442 = vmatpush3.bf16.msra.mxu0 %v8439_v41  ;;  %8165 = vmatprep.mubr.msk.f32.mxu0 %vm3650_vm3, %v9983_v31 }
 0xfac   : > { %8444 = vmatprep.subr.bf16.mxu0 %v8443_v61 }
 0xfaf   : > { %8446 = vmatpush3.bf16.msra.mxu0 %v8443_v61  ;;  %v7484_v61 = vld [vmem:[%s9114_s28 + $0x155] ss:$0 sm:$0xff] }
 0xfb2   : > { %8166 = vmatmul.mubr.msk.f32.vlgmr.msra.gmra.mrb[22].mxu0 %vm3650_vm3, %v9981_v34 }
0x107d   : > { %v8145_v16 = vpop.f32.mrb[20].mxu0 }
0x107e   : > { %v4795_v48 = vadd.f32 %v8145_v16, %v7480_v0  ;;  %v4789_v7 = vpop.f32.mrb[21].mxu0 }
0x107f   : > { %v4790_v40 = vadd.f32 %v7480_v0, %v4789_v7 }
0x1080   : > { %v4803_v38 = vsel %vm3650_vm3, %v4795_v48, 0.0 }
0x1081   : > { %4804 = vadd.xlane.f32.xlu1 %v4803_v38  ;;  %v4800_v5 = vsel %vm3650_vm3, %v4790_v40, 0.0  ;;  %v4854_v38 = vld [vmem:[%s9114_s28 + $0x128] sm:$0xff] }
0x1082   : > { %4801 = vadd.xlane.f32.xlu0 %v4800_v5 }
0x1085   : > { %v8167_v32 = vpop.f32.mrb[22].mxu0 }
0x1086   : > { %v5028_v27 = vadd.f32 %v8167_v32, %v7488_v45  ;;  %v5022_v44 = vpop.f32.mrb[23].mxu0 }
0x1087   : > { %v5023_v46 = vadd.f32 %v7488_v45, %v5022_v44 }
0x1089   : > { %v8455_v51 = vpack.c.bf16 %v5028_v27, %v5023_v46 }
0x108b   : > { %8457 = vmatprep.subr.msk.bf16.mxu0 %vm10014_vm5, %v8455_v51 }
0x108c   : > { %8460 = vmatpush3.bf16.xpose.msk.msra.mxu0 %vm10014_vm5, %v8455_v51 }
0x110e   : > { %v4805_v57 = vpop.xlane.xlu1 %4804 }
0x110f   : > { %v4808_v9 = vmul.f32 0.03125, %v4805_v57  ;;  %v4802_v58 = vpop.xlane.xlu0 %4801 }
0x1110   : > { %v4807_v23 = vmul.f32 0.03125, %v4802_v58 }
0x1111   : > { %v4810_v3 = vsub.f32 %v4795_v48, %v4808_v9  ;;  %v7491_v9 = vld [vmem:[%s9114_s28 + $0x158] ss:$0 sm:$0xff] }
0x1112   : > { %v4809_v8 = vsub.f32 %v4790_v40, %v4807_v23  ;;  %v4853_v40 = vld [vmem:[%s9114_s28 + $0x120] sm:$0xff] }
0x1113   : > { %v4812_v29 = vmul.f32 %v4810_v3, %v4810_v3  ;;  %v8451_v32 = vpack.c.bf16 %v4854_v38, %v4853_v40 }
0x1114   : > { %v4811_v14 = vmul.f32 %v4809_v8, %v4809_v8 }
0x1115   : > { %v4816_v59 = vsel %vm3650_vm3, %v4812_v29, 0.0 }
0x1116   : > { %4817 = vadd.xlane.f32.xlu1 %v4816_v59  ;;  %v4813_v54 = vsel %vm3650_vm3, %v4811_v14, 0.0 }
0x1117   : > { %4814 = vadd.xlane.f32.xlu0 %v4813_v54 }
0x11a3   : > { %v4818_v24 = vpop.xlane.xlu1 %4817 }
0x11a4   : > { %v4820_v60 = vmul.f32 0.03125, %v4818_v24  ;;  %v4815_v10 = vpop.xlane.xlu0 %4814 }
0x11a5   : > { %v4819_v4 = vmul.f32 0.03125, %v4815_v10 }
0x11a6   : > { %v4822_v21 = vadd.f32 1e-05, %v4820_v60 }
0x11a7   : > { %v4821_v11 = vadd.f32 1e-05, %v4819_v4 }
0x11a8   : > { %8779 = vrsqrt.f32 %v4822_v21 }
0x11a9   : > { %8781 = vrsqrt.f32 %v4821_v11 }
0x11b2   : > { %v8780_v41 = vpop.eup %8779 }
0x11b3   : > { %v8782_v37 = vpop.eup %8781  ;;  %v4826_v6 = vmul.f32 %v8780_v41, %v4810_v3 }
0x11b4   : > { %v4825_v53 = vmul.f32 %v8782_v37, %v4809_v8 }
0x11b5   : > { %v4832_v0 = vmul.f32 %v7483_v63, %v4826_v6 }
0x11b6   : > { %v4831_v16 = vmul.f32 %v7483_v63, %v4825_v53 }
0x11b7   : > { %v4838_v48 = vadd.f32 %v7484_v61, %v4832_v0 }
0x11b8   : > { %v4837_v7 = vadd.f32 %v7484_v61, %v4831_v16 }
0x11b9   : > { %v10202_v45 = vadd.f32 %v4838_v48, %v9947_v36 }
0x11ba   : > { %v10199_v5 = vadd.f32 %v4837_v7, %v9945_v55  ;;  %v7485_v55 = vld [vmem:[%s9114_s28 + $0x156] ss:$0 sm:$0xff] }
0x11bc   : > { %8154 = vmatprep.mubr.msk.f32.mxu1 %vm3650_vm3, %v10199_v5 }
0x11bd   : > { %8155 = vmatmul.mubr.msk.f32.vlgmr.msra.gmra.mrb[2].mxu1 %vm3650_vm3, %v10202_v45 }
0x11be   : > { %8450 = vmatpush3.bf16.msra.mxu1 %v8447_v56  ;;  %8176 = vmatprep.mubr.msk.f32.mxu1 %vm3650_vm3, %v9983_v31 }
0x11bf   : > { %8452 = vmatprep.subr.bf16.mxu1 %v8451_v32 }
0x11c2   : > { %8454 = vmatpush3.bf16.msra.mxu1 %v8451_v32 }
0x11c5   : > { %8177 = vmatmul.mubr.msk.f32.vlgmr.msra.gmra.mrb[4].mxu1 %vm3650_vm3, %v9981_v34 }
0x1290   : > { %v8156_v36 = vpop.f32.mrb[2].mxu1 }
0x1291   : > { %v4943_v27 = vadd.f32 %v8156_v36, %v7485_v55  ;;  %v4937_v44 = vpop.f32.mrb[3].mxu1 }
0x1292   : > { %v4938_v46 = vadd.f32 %v7485_v55, %v4937_v44 }
0x1293   : > { %v5111_v57 = vmul.f32 %v4943_v27, %v10025_v19  ;;  %v5113_v3 = vmul.f32 %v4943_v27, %v10037_v26  ;;  %v5115_v42 = vmul.f32 %v4943_v27, %v10051_v62 }
0x1294   : > { %v5110_v51 = vmul.f32 %v4938_v46, %v10007_v15  ;;  %v5112_v58 = vmul.f32 %v4938_v46, %v10030_v13  ;;  %v5114_v29 = vmul.f32 %v4938_v46, %v10043_v49 }
0x1296   : > { %8183 = vmatprep.mubr.msk.f32.mxu0 %vm3650_vm3, %v5110_v51 }
0x1297   : > { %8184 = vmatmul.mubr.msk.f32.vlgmr.msra.gmra.mrb[24].mxu0 %vm3650_vm3, %v5111_v57 }
0x1298   : > { %v8178_v31 = vpop.f32.mrb[4].mxu1  ;;  %8186 = vmatprep.mubr.msk.f32.mxu0 %vm3650_vm3, %v5112_v58 }
0x1299   : > { %v5107_v34 = vadd.f32 %v8178_v31, %v7491_v9  ;;  %v5101_v23 = vpop.f32.mrb[5].mxu1 }
0x129a   : > { %v5102_v8 = vadd.f32 %v7491_v9, %v5101_v23 }
0x129b   : > { %8187 = vmatmul.mubr.msk.f32.gmra.mrb[26].mxu0 %vm3650_vm3, %v5113_v3  ;;  %v5121_v14 = vmul.f32 %v5107_v34, %v10037_v26  ;;  %v5119_v59 = vmul.f32 %v5107_v34, %v10025_v19  ;;  %v5123_v54 = vmul.f32 %v5107_v34, %v10051_v62  ;;  %v5125_v18 = vmul.f32 %v5107_v34, %v10065_v22 }
0x129c   : > { %8189 = vmatprep.mubr.msk.f32.mxu0 %vm3650_vm3, %v5114_v29  ;;  %v5120_v50 = vmul.f32 %v5102_v8, %v10030_v13  ;;  %v5118_v20 = vmul.f32 %v5102_v8, %v10007_v15  ;;  %v5122_v17 = vmul.f32 %v5102_v8, %v10043_v49  ;;  %v5124_v1 = vmul.f32 %v5102_v8, %v10057_v47 }
0x129d   : > { %v5116_v26 = vmul.f32 %v4938_v46, %v10057_v47  ;;  %v5117_v15 = vmul.f32 %v4943_v27, %v10065_v22 }
0x129e   : > { %v8461_v52 = vpack.c.bf16 %v5121_v14, %v5120_v50  ;;  %v10234_v19 = vpack.c.bf16 %v5119_v59, %v5118_v20  ;;  %v10236_v39 = vpack.c.bf16 %v5123_v54, %v5122_v17  ;;  %v10238_v56 = vpack.c.bf16 %v5125_v18, %v5124_v1 }
0x129f   : > { %8190 = vmatmul.mubr.msk.f32.gmra.mrb[28].mxu0 %vm3650_vm3, %v5115_v42 }
0x12a0   : > { %8462 = vmatprep.subr.bf16.mxu1 %v8461_v52  ;;  %8192 = vmatprep.mubr.msk.f32.mxu0 %vm3650_vm3, %v5116_v26 }
0x12a1   : > { %8464 = vmatpush3.bf16.msra.mxu1 %v8461_v52 }
0x12a2   : > { %8466 = vmatprep.subr.bf16.mxu1 %v10234_v19 }
0x12a3   : > { %8193 = vmatmul.mubr.msk.f32.gmra.mrb[30].mxu0 %vm3650_vm3, %v5117_v15 }
0x136a   : > { %v8185_v13 = vpop.f32.mrb[24].mxu0 }
0x136b   : > { %v5222_v49 = vpop.f32.mrb[25].mxu0  ;;  %v5228_v10 = vadd.f32 %v8185_v13, %v10095_v43 }
0x136c   : > { %v5223_v21 = vadd.f32 %v5222_v49, %v10090_v30 }
0x136d   : > { %v5264_v37 = vsel %vm4296_vm6, %v5228_v10, -inf }
0x136e   : > { %v8188_v62 = vpop.f32.mrb[26].mxu0  ;;  %v5261_v43 = vsel %vm4296_vm6, %v5223_v21, -inf }
0x136f   : > { %v5238_v47 = vadd.f32 %v8188_v62, %v10108_v12  ;;  %v5232_v24 = vpop.f32.mrb[27].mxu0 }
0x1370   : > { %v5233_v60 = vadd.f32 %v5232_v24, %v10101_v28 }
0x1371   : > { %v5270_v4 = vsel %vm4296_vm6, %v5238_v47, -inf }
0x1372   : > { %5271 = vmax.xlane.f32.xlu1 %v5270_v4  ;;  %v8191_v22 = vpop.f32.mrb[28].mxu0  ;;  %v5267_v11 = vsel %vm4296_vm6, %v5233_v60, -inf  ;;  %v4858_v4 = vld [vmem:[%s9114_s28 + $0x140] sm:$0xff] }
0x1373   : > { %v5242_v41 = vpop.f32.mrb[29].mxu0  ;;  %5268 = vmax.xlane.f32.xlu0 %v5267_v11  ;;  %v5248_v63 = vadd.f32 %v8191_v22, %v10114_v2  ;;  %v4859_v22 = vld [vmem:[%s9114_s28 + $0x148] sm:$0xff] }
0x1374   : > { %v5243_v12 = vadd.f32 %v5242_v41, %v10123_v35  ;;  %v8481_v11 = vpack.c.bf16 %v4859_v22, %v4858_v4  ;;  %v5815_v22 = vld [vmem:[%s9082_s16 + $0x50] sm:$0xff] }
0x1375   : > { %v5276_v53 = vsel %vm4296_vm6, %v5248_v63, -inf }
0x1376   : > { %5265 = vmax.xlane.f32.xlu1 %v5264_v37  ;;  %v8194_v28 = vpop.f32.mrb[30].mxu0  ;;  %v5273_v0 = vsel %vm4296_vm6, %v5243_v12, -inf }
0x1377   : > { %v5252_v6 = vpop.f32.mrb[31].mxu0  ;;  %5262 = vmax.xlane.f32.xlu0 %v5261_v43  ;;  %v5258_v30 = vadd.f32 %v8194_v28, %v10128_v33 }
0x1378   : > { %v5253_v61 = vadd.f32 %v5252_v6, %v10137_v25 }
0x1379   : > { %v5282_v2 = vsel %vm4296_vm6, %v5258_v30, -inf }
0x137a   : > { %5277 = vmax.xlane.f32.xlu1 %v5276_v53  ;;  %v5279_v35 = vsel %vm4296_vm6, %v5253_v61, -inf }
0x137b   : > { %5274 = vmax.xlane.f32.xlu0 %v5273_v0 }
0x137e   : > { %5283 = vmax.xlane.f32.xlu1 %v5282_v2 }
0x137f   : > { %5280 = vmax.xlane.f32.xlu0 %v5279_v35 }
0x13ff   : > { %v5272_v16 = vpop.xlane.xlu1 %5271 }
0x1400   : > { %v5288_v48 = vsub.f32 %v5238_v47, %v5272_v16  ;;  %v5269_v7 = vpop.xlane.xlu0 %5268 }
0x1401   : > { %v5287_v40 = vsub.f32 %v5233_v60, %v5269_v7  ;;  %v4856_v60 = vld [vmem:[%s9114_s28 + $0x130] sm:$0xff] }
0x1402   : > { %v5299_v38 = vmul.f32 1.442695, %v5288_v48 }
0x1403   : > { %v5297_v33 = vmul.f32 1.442695, %v5287_v40  ;;  %v5266_v32 = vpop.xlane.xlu1 %5265 }
0x1404   : > { %8783 = vpow2.f32 %v5299_v38  ;;  %v5286_v55 = vsub.f32 %v5228_v10, %v5266_v32  ;;  %v5263_v25 = vpop.xlane.xlu0 %5262  ;;  %v4857_v10 = vld [vmem:[%s9114_s28 + $0x138] sm:$0xff] }
0x1405   : > { %8785 = vpow2.f32 %v5297_v33  ;;  %v5285_v36 = vsub.f32 %v5223_v21, %v5263_v25  ;;  %v8477_v21 = vpack.c.bf16 %v4857_v10, %v4856_v60 }
0x1406   : > { %v5295_v27 = vmul.f32 1.442695, %v5286_v55 }
0x1407   : > { %v5293_v44 = vmul.f32 1.442695, %v5285_v36  ;;  %v5278_v46 = vpop.xlane.xlu1 %5277  ;;  %8478 = vmatprep.subr.bf16.mxu0 %v8477_v21 }
0x1408   : > { %8787 = vpow2.f32 %v5295_v27  ;;  %v5290_v51 = vsub.f32 %v5248_v63, %v5278_v46  ;;  %v5275_v57 = vpop.xlane.xlu0 %5274  ;;  %8480 = vmatpush3.bf16.msra.mxu0 %v8477_v21  ;;  %v5807_v21 = vld [vmem:[%s9082_s16 + $0x10] sm:$0xff] }
0x1409   : > { %8789 = vpow2.f32 %v5293_v44  ;;  %v5289_v9 = vsub.f32 %v5243_v12, %v5275_v57  ;;  %8482 = vmatprep.subr.bf16.mxu0 %v8481_v11  ;;  %v7512_v44 = vld [vmem:[%s9114_s28 + $0x159] ss:$0 sm:$0xff] }
0x140a   : > { %v5303_v58 = vmul.f32 1.442695, %v5290_v51 }
0x140b   : > { %v5301_v31 = vmul.f32 1.442695, %v5289_v9  ;;  %v5284_v34 = vpop.xlane.xlu1 %5283 }
0x140c   : > { %8791 = vpow2.f32 %v5303_v58  ;;  %v5292_v23 = vsub.f32 %v5258_v30, %v5284_v34  ;;  %v5281_v3 = vpop.xlane.xlu0 %5280  ;;  %8484 = vmatpush3.bf16.msra.mxu0 %v8481_v11  ;;  %v5808_v11 = vld [vmem:[%s9082_s16 + $0x18] sm:$0xff] }
0x140d   : > { %8793 = vpow2.f32 %v5301_v31  ;;  %v5291_v8 = vsub.f32 %v5253_v61, %v5281_v3 }
0x140e   : > { %v8784_v29 = vpop.eup %8783  ;;  %v5307_v14 = vmul.f32 1.442695, %v5292_v23 }
0x140f   : > { %v8786_v59 = vpop.eup %8785  ;;  %v5305_v54 = vmul.f32 1.442695, %v5291_v8  ;;  %v5318_v18 = vsel %vm4296_vm6, %v8784_v29, 0.0 }
0x1410   : > { %8795 = vpow2.f32 %v5307_v14  ;;  %5319 = vadd.xlane.f32.xlu1 %v5318_v18  ;;  %v5315_v50 = vsel %vm4296_vm6, %v8786_v59, 0.0 }
0x1411   : > { %8797 = vpow2.f32 %v5305_v54  ;;  %5316 = vadd.xlane.f32.xlu0 %v5315_v50  ;;  %v5805_v50 = vld [vmem:[%s9082_s16] sm:$0xff] }
0x1412   : > { %v8788_v20 = vpop.eup %8787 }
0x1413   : > { %v8790_v17 = vpop.eup %8789  ;;  %v5312_v1 = vsel %vm4296_vm6, %v8788_v20, 0.0 }
0x1414   : > { %5313 = vadd.xlane.f32.xlu1 %v5312_v1  ;;  %v5309_v42 = vsel %vm4296_vm6, %v8790_v17, 0.0 }
0x1415   : > { %5310 = vadd.xlane.f32.xlu0 %v5309_v42  ;;  %v5814_v42 = vld [vmem:[%s9082_s16 + $0x48] sm:$0xff] }
0x1416   : > { %v8792_v26 = vpop.eup %8791 }
0x1417   : > { %v8794_v52 = vpop.eup %8793  ;;  %v5324_v15 = vsel %vm4296_vm6, %v8792_v26, 0.0 }
0x1418   : > { %5325 = vadd.xlane.f32.xlu1 %v5324_v15  ;;  %v5321_v13 = vsel %vm4296_vm6, %v8794_v52, 0.0 }
0x1419   : > { %5322 = vadd.xlane.f32.xlu0 %v5321_v13  ;;  %v5821_v13 = vld [vmem:[%s9082_s16 + $0x80] sm:$0xff] }
0x141a   : > { %v8796_v49 = vpop.eup %8795 }
0x141b   : > { %v8798_v62 = vpop.eup %8797  ;;  %v5330_v47 = vsel %vm4296_vm6, %v8796_v49, 0.0 }
0x141c   : > { %5331 = vadd.xlane.f32.xlu1 %v5330_v47  ;;  %v5327_v24 = vsel %vm4296_vm6, %v8798_v62, 0.0 }
0x141d   : > { %5328 = vadd.xlane.f32.xlu0 %v5327_v24  ;;  %v5830_v24 = vld [vmem:[%s9082_s16 + $0xc8] sm:$0xff] }
0x149d   : > { %v5320_v41 = vpop.xlane.xlu1 %5319 }
0x149e   : > { %8799 = vrcp.f32 %v5320_v41  ;;  %v5317_v63 = vpop.xlane.xlu0 %5316  ;;  %v8923_v41 = vmov 0  }
0x149f   : > { %8801 = vrcp.f32 %v5317_v63  ;;  %v7521_v63 = vcombine.low %v5807_v21, %v5815_v22 }
0x14a1   : > { %v5314_v12 = vpop.xlane.xlu1 %5313 }
0x14a2   : > { %v5311_v37 = vpop.xlane.xlu0 %5310 }
0x14a3   : > { %8803 = vrcp.f32 %v5311_v37  ;;  %v7522_v37 = vcombine.high %v5807_v21, %v5815_v22 }
0x14a4   : > { %8805 = vrcp.f32 %v5314_v12  ;;  %v5816_v12 = vld [vmem:[%s9082_s16 + $0x58] sm:$0xff] }
0x14a5   : > { %v5326_v61 = vpop.xlane.xlu1 %5325 }
0x14a6   : > { %v5323_v28 = vpop.xlane.xlu0 %5322 }
0x14a7   : > { %8807 = vrcp.f32 %v5323_v28  ;;  %v7523_v28 = vcombine.low %v5808_v11, %v5816_v12 }
0x14a8   : > { %v8800_v43 = vpop.eup %8799  ;;  %8809 = vrcp.f32 %v5326_v61 }
0x14a9   : > { %v8802_v6 = vpop.eup %8801  ;;  %v5344_v53 = vmul.f32 %v8800_v43, %v8784_v29  ;;  %v5332_v40 = vpop.xlane.xlu1 %5331  ;;  %v7524_v43 = vcombine.high %v5808_v11, %v5816_v12  ;;  %v5837_v11 = vld [vmem:[%s9082_s16 + $0x100] sm:$0xff] }
0x14aa   : > { %v5343_v30 = vmul.f32 %v8802_v6, %v8786_v59  ;;  %v5329_v0 = vpop.xlane.xlu0 %5328 }
0x14ab   : > { %8811 = vrcp.f32 %v5329_v0 }
0x14ac   : > { %8199 = vmatprep.mubr.msk.f32.mxu1 %vm4296_vm6, %v5343_v30  ;;  %8813 = vrcp.f32 %v5332_v40  ;;  %v7516_v40 = vld [vmem:[%s9114_s28 + $0x15b] ss:$0 sm:$0xff] }
0x14ad   : > { %v8804_v2 = vpop.eup %8803  ;;  %8200 = vmatmul.mubr.msk.f32.vlgmr.msra.gmra.mrb[6].mxu1 %vm4296_vm6, %v5344_v53 }
0x14ae   : > { %8468 = vmatpush3.bf16.msra.mxu1 %v10234_v19  ;;  %v5341_v35 = vmul.f32 %v8804_v2, %v8790_v17  ;;  %v8806_v16 = vpop.eup %8805  ;;  %v5806_v17 = vld [vmem:[%s9082_s16 + $0x8] sm:$0xff] }
0x14af   : > { %8470 = vmatprep.subr.bf16.mxu1 %v10236_v39  ;;  %v5342_v7 = vmul.f32 %v8806_v16, %v8788_v20  ;;  %v5813_v20 = vld [vmem:[%s9082_s16 + $0x40] sm:$0xff]  ;;  %v7520_v15 = vcombine.high %v5806_v17, %v5814_v42  ;;  %v7515_v16 = vld [vmem:[%s9114_s28 + $0x15a] ss:$0 sm:$0xff] }
0x14b0   : > { %8206 = vmatprep.mubr.msk.f32.mxu1 %vm4296_vm6, %v5341_v35  ;;  %v7518_v1 = vcombine.high %v5805_v50, %v5813_v20 }
0x14b1   : > { %v8808_v48 = vpop.eup %8807  ;;  %6164 = vmatprep.subr.bf16.mxu0 %v7520_v15 }
0x14b2   : > { %v5345_v38 = vmul.f32 %v8808_v48, %v8794_v52  ;;  %v8810_v19 = vpop.eup %8809  ;;  %v7519_v52 = vcombine.low %v5806_v17, %v5814_v42  ;;  %v5811_v17 = vld [vmem:[%s9082_s16 + $0x30] sm:$0xff]  ;;  %v5812_v42 = vld [vmem:[%s9082_s16 + $0x38] sm:$0xff] }
0x14b3   : > { %v5346_v32 = vmul.f32 %v8810_v19, %v8792_v26  ;;  %v7517_v26 = vcombine.low %v5805_v50, %v5813_v20 }
0x14b5   : > { %8207 = vmatmul.mubr.msk.f32.vlgmr.msra.gmra.mrb[6].mxu1 %vm4296_vm6, %v5342_v7  ;;  %v8812_v33 = vpop.eup %8811 }
0x14b6   : > { %8472 = vmatpush3.bf16.msra.mxu1 %v10236_v39  ;;  %8213 = vmatprep.mubr.msk.f32.mxu1 %vm4296_vm6, %v5345_v38  ;;  %v5347_v55 = vmul.f32 %v8812_v33, %v8798_v62  ;;  %v8814_v25 = vpop.eup %8813  ;;  %v5822_v62 = vld [vmem:[%s9082_s16 + $0x88] sm:$0xff] }
0x14b7   : > { %8474 = vmatprep.subr.bf16.mxu1 %v10238_v56  ;;  %v5348_v36 = vmul.f32 %v8814_v25, %v8796_v49  ;;  %v5829_v49 = vld [vmem:[%s9082_s16 + $0xc0] sm:$0xff]  ;;  %v7535_v10 = vcombine.low %v5822_v62, %v5830_v24  ;;  %v7536_v4 = vcombine.high %v5822_v62, %v5830_v24  ;;  %v5823_v25 = vld [vmem:[%s9082_s16 + $0x90] sm:$0xff]  ;;  %v5828_v24 = vld [vmem:[%s9082_s16 + $0xb8] sm:$0xff] }
0x14b8   : > { %v7534_v47 = vcombine.high %v5821_v13, %v5829_v49  ;;  %v7533_v60 = vcombine.low %v5821_v13, %v5829_v49  ;;  %v5827_v62 = vld [vmem:[%s9082_s16 + $0xb0] sm:$0xff] }
0x14bd   : > { %8214 = vmatmul.mubr.msk.f32.vlgmr.msra.gmra.mrb[6].mxu1 %vm4296_vm6, %v5346_v32 }
0x14be   : > { %8476 = vmatpush3.bf16.msra.mxu1 %v10238_v56  ;;  %8220 = vmatprep.mubr.msk.f32.mxu1 %vm4296_vm6, %v5347_v55 }
0x14bf   : > { %6121 = vmatprep.subr.bf16.mxu1 %v7518_v1  ;;  %v5819_v1 = vld [vmem:[%s9082_s16 + $0x70] sm:$0xff] }
0x14c0   : > { %v7530_v13 = vcombine.high %v5811_v17, %v5819_v1 }
0x14c5   : > { %8221 = vmatmul.mubr.msk.f32.vlgmr.msra.gmra.mrb[6].mxu1 %vm4296_vm6, %v5348_v36 }
0x14c6   : > { %6122 = vmatpush1.bf16.msra.mxu1 %v7517_v26  ;;  %6153 = vmatprep.mubr.bf16.mxu1 %v8923_v41  ;;  %v5820_v26 = vld [vmem:[%s9082_s16 + $0x78] sm:$0xff] }
0x14c7   : > { %6123 = vmatprep.subr.bf16.mxu1 %v7534_v47  ;;  %v7532_v49 = vcombine.high %v5812_v42, %v5820_v26  ;;  %v5835_v47 = vld [vmem:[%s9082_s16 + $0xf0] sm:$0xff] }
0x14c8   : > { %v7546_v21 = vcombine.high %v5827_v62, %v5835_v47 }
0x14ca   : > { %6124 = vmatpush1.bf16.msra.mxu1 %v7533_v60  ;;  %v5836_v60 = vld [vmem:[%s9082_s16 + $0xf8] sm:$0xff] }
0x14cb   : > { %6207 = vmatprep.subr.bf16.mxu1 %v7522_v37  ;;  %v7548_v22 = vcombine.high %v5828_v24, %v5836_v60  ;;  %v7545_v37 = vcombine.low %v5827_v62, %v5835_v47  ;;  %v7547_v12 = vcombine.low %v5828_v24, %v5836_v60 }
0x1598   : > { %v8222_v39 = vpop.f32.mrb[6].mxu1 }
0x1599   : > { %v5666_v27 = vpop.f32.mrb[7].mxu1 }
0x159a   : > { %8231 = vmatprep.mubr.msk.f32.mxu0 %vm3650_vm3, %v5666_v27  ;;  %v5824_v27 = vld [vmem:[%s9082_s16 + $0x98] sm:$0xff] }
0x159b   : > { %8232 = vmatmul.mubr.msk.f32.vlgmr.msra.gmra.mrb[32].mxu0 %vm3650_vm3, %v8222_v39  ;;  %v5831_v39 = vld [vmem:[%s9082_s16 + $0xd0] sm:$0xff] }
0x159c   : > { %6165 = vmatpush1.bf16.msra.mxu0 %v7519_v52  ;;  %6196 = vmatprep.mubr.bf16.mxu0 %v8923_v41 }
0x159d   : > { %6166 = vmatprep.subr.bf16.mxu0 %v7536_v4  ;;  %v7531_v4 = vcombine.low %v5812_v42, %v5820_v26 }
0x15a0   : > { %6167 = vmatpush1.bf16.msra.mxu0 %v7535_v10  ;;  %v7529_v10 = vcombine.low %v5811_v17, %v5819_v1 }
0x15a1   : > { %6250 = vmatprep.subr.bf16.mxu0 %v7524_v43 }
0x166e   : > { %v8233_v46 = vpop.f32.mrb[32].mxu0 }
0x166f   : > { %v5759_v51 = vadd.f32 %v8233_v46, %v7512_v44  ;;  %v5753_v57 = vpop.f32.mrb[33].mxu0 }
0x1670   : > { %v5754_v9 = vadd.f32 %v7512_v44, %v5753_v57  ;;  %v5832_v44 = vld [vmem:[%s9082_s16 + $0xd8] sm:$0xff]  ;;  %v7538_v57 = vcombine.high %v5823_v25, %v5831_v39 }
0x1671   : > { %v5767_v58 = vsel %vm3650_vm3, %v5759_v51, 0.0 }
0x1672   : > { %5768 = vadd.xlane.f32.xlu1 %v5767_v58  ;;  %v5764_v56 = vsel %vm3650_vm3, %v5754_v9, 0.0  ;;  %v5809_v58 = vld [vmem:[%s9082_s16 + $0x20] sm:$0xff] }
0x1673   : > { %5765 = vadd.xlane.f32.xlu0 %v5764_v56  ;;  %v5817_v56 = vld [vmem:[%s9082_s16 + $0x60] sm:$0xff] }
0x16ff   : > { %v5769_v31 = vpop.xlane.xlu1 %5768 }
0x1700   : > { %v5771_v34 = vmul.f32 0.03125, %v5769_v31  ;;  %v5766_v23 = vpop.xlane.xlu0 %5765  ;;  %v5810_v31 = vld [vmem:[%s9082_s16 + $0x28] sm:$0xff] }
0x1701   : > { %v5770_v3 = vmul.f32 0.03125, %v5766_v23  ;;  %v7526_v23 = vcombine.high %v5809_v58, %v5817_v56 }
0x1702   : > { %v5773_v8 = vsub.f32 %v5759_v51, %v5771_v34  ;;  %v7539_v34 = vcombine.low %v5824_v27, %v5832_v44 }
0x1703   : > { %v5772_v29 = vsub.f32 %v5754_v9, %v5770_v3  ;;  %v7540_v9 = vcombine.high %v5824_v27, %v5832_v44  ;;  %v5894_v44 = vlaneseq }
0x1704   : > { %v5775_v14 = vmul.f32 %v5773_v8, %v5773_v8 }
0x1705   : > { %v5774_v59 = vmul.f32 %v5772_v29, %v5772_v29 }
0x1706   : > { %v5779_v54 = vsel %vm3650_vm3, %v5775_v14, 0.0  ;;  %v5826_v14 = vld [vmem:[%s9082_s16 + $0xa8] sm:$0xff] }
0x1707   : > { %5780 = vadd.xlane.f32.xlu1 %v5779_v54  ;;  %v5776_v18 = vsel %vm3650_vm3, %v5774_v59, 0.0  ;;  %v5834_v59 = vld [vmem:[%s9082_s16 + $0xe8] sm:$0xff]  ;;  %v7525_v54 = vcombine.low %v5809_v58, %v5817_v56 }
0x1708   : > { %5777 = vadd.xlane.f32.xlu0 %v5776_v18  ;;  %v7544_v20 = vcombine.high %v5826_v14, %v5834_v59  ;;  %v7543_v15 = vcombine.low %v5826_v14, %v5834_v59 }
0x1794   : > { %v5781_v6 = vpop.xlane.xlu1 %5780 }
0x1795   : > { %v5783_v30 = vmul.f32 0.03125, %v5781_v6  ;;  %v5778_v53 = vpop.xlane.xlu0 %5777  ;;  %v5853_v6 = vld [vmem:[%s9082_s16 + $0x180] sm:$0xff] }
0x1796   : > { %v5782_v61 = vmul.f32 0.03125, %v5778_v53  ;;  %v5839_v53 = vld [vmem:[%s9082_s16 + $0x110] sm:$0xff] }
0x1797   : > { %v5785_v0 = vadd.f32 1e-05, %v5783_v30  ;;  %v5861_v30 = vld [vmem:[%s9082_s16 + $0x1c0] sm:$0xff] }
0x1798   : > { %v5784_v2 = vadd.f32 1e-05, %v5782_v61  ;;  %v7575_v61 = vcombine.high %v5853_v6, %v5861_v30 }
0x1799   : > { %8815 = vrsqrt.f32 %v5785_v0  ;;  %v7574_v0 = vcombine.low %v5853_v6, %v5861_v30 }
0x179a   : > { %8817 = vrsqrt.f32 %v5784_v2 }
0x17a3   : > { %v8816_v35 = vpop.eup %8815 }
0x17a4   : > { %v8818_v48 = vpop.eup %8817  ;;  %v5789_v7 = vmul.f32 %v8816_v35, %v5773_v8  ;;  %v5825_v8 = vld [vmem:[%s9082_s16 + $0xa0] sm:$0xff] }
0x17a5   : > { %v5788_v38 = vmul.f32 %v8818_v48, %v5772_v29  ;;  %v5833_v29 = vld [vmem:[%s9082_s16 + $0xe0] sm:$0xff]  ;;  %v10371_v48 = vld [vmem:[%s9082_s16 + $0x148] sm:$0xff] }
0x17a6   : > { %v5795_v19 = vmul.f32 %v7515_v16, %v5789_v7  ;;  %v7542_v50 = vcombine.high %v5825_v8, %v5833_v29  ;;  %v7541_v52 = vcombine.low %v5825_v8, %v5833_v29  ;;  %v5855_v7 = vld [vmem:[%s9082_s16 + $0x190] sm:$0xff] }
0x17a7   : > { %v5794_v33 = vmul.f32 %v7515_v16, %v5788_v38  ;;  %v10368_v16 = vld [vmem:[%s9082_s16 + $0x108] sm:$0xff]  ;;  %v5863_v38 = vld [vmem:[%s9082_s16 + $0x1d0] sm:$0xff] }
0x17a8   : > { %v5801_v32 = vadd.f32 %v7516_v40, %v5795_v19  ;;  %v7560_v19 = vcombine.low %v10368_v16, %v10371_v48 }
0x17a9   : > { %v5800_v55 = vadd.f32 %v7516_v40, %v5794_v33  ;;  %v7561_v40 = vcombine.high %v10368_v16, %v10371_v48  ;;  %v7578_v33 = vcombine.low %v5855_v7, %v5863_v38 }
0x17aa   : > { %v10311_v36 = vadd.f32 %v5801_v32, %v10202_v45  ;;  %v5818_v45 = vld [vmem:[%s9082_s16 + $0x68] sm:$0xff]  ;;  %v7579_v32 = vcombine.high %v5855_v7, %v5863_v38 }
0x17ab   : > { %v10317_v46 = vadd.f32 %v5800_v55, %v10199_v5  ;;  %v7537_v5 = vcombine.low %v5823_v25, %v5831_v39  ;;  %v7528_v3 = vcombine.high %v5810_v31, %v5818_v45  ;;  %v7527_v18 = vcombine.low %v5810_v31, %v5818_v45  ;;  %v10380_v55 = vld [vmem:[%s9082_s16 + $0x118] sm:$0xff]  ;;  %v10406_v7 = vld [vmem:[%s9082_s16 + $0x188] sm:$0xff] }
0x17ac   : > { %v10383_v25 = vld [vmem:[%s9082_s16 + $0x158] sm:$0xff] }
0x17ad   : > { %v10321_v51 = vpack.c.bf16 %v10311_v36, %v10317_v46  ;;  %v7564_v39 = vcombine.low %v10380_v55, %v10383_v25  ;;  %v7565_v27 = vcombine.high %v10380_v55, %v10383_v25 }
0x17af   : > { %7549 = vmatmul.mubr.msk.bf16.vlgmr.msra.gmra.mrb[8].mxu1 %vm3650_vm3, %v10321_v51  ;;  %7550 = vmatmul.mubr.msk.bf16.vlgmr.msra.gmra.mrb[36].mxu0 %vm3650_vm3, %v10321_v51 }
0x17b0   : > { %6208 = vmatpush1.bf16.msra.mxu1 %v7521_v63  ;;  %6251 = vmatpush1.bf16.msra.mxu0 %v7523_v28  ;;  %v5845_v63 = vld [vmem:[%s9082_s16 + $0x140] sm:$0xff] }
0x17b1   : > { %6209 = vmatprep.subr.bf16.mxu1 %v7538_v57  ;;  %6252 = vmatprep.subr.bf16.mxu0 %v7540_v9  ;;  %v7559_v28 = vcombine.high %v5837_v11, %v5845_v63  ;;  %v7558_v43 = vcombine.low %v5837_v11, %v5845_v63  ;;  %v5869_v57 = vld [vmem:[%s9082_s16 + $0x200] sm:$0x11]  ;;  %v5870_v9 = vld [vmem:[%s9082_s16 + $0x208] sm:$0x11] }
0x17b2   : > { %6239 = vmatprep.mubr.bf16.mxu1 %v8923_v41  ;;  %6282 = vmatprep.mubr.bf16.mxu0 %v8923_v41  ;;  %v5877_v58 = vunpack.c.l.bf16 %v5869_v57  ;;  %v5879_v31 = vunpack.c.l.bf16 %v5870_v9  ;;  %v5878_v45 = vunpack.c.h.bf16 %v5869_v57 }
0x17b4   : > { %6210 = vmatpush1.bf16.msra.mxu1 %v7537_v5  ;;  %6253 = vmatpush1.bf16.msra.mxu0 %v7539_v34  ;;  %v5880_v5 = vunpack.c.h.bf16 %v5870_v9  ;;  %v5871_v34 = vld [vmem:[%s9082_s16 + $0x210] sm:$0x11] }
0x17b5   : > { %6293 = vmatprep.subr.bf16.mxu1 %v7526_v23  ;;  %6336 = vmatprep.subr.bf16.mxu0 %v7528_v3  ;;  %v5872_v23 = vld [vmem:[%s9082_s16 + $0x218] sm:$0x11]  ;;  %v5881_v59 = vunpack.c.l.bf16 %v5871_v34 }
0x17b6   : > { %v5884_v17 = vunpack.c.h.bf16 %v5872_v23 }
0x17b7   : > { %7551 = vmatmul.mubr.msk.bf16.vlgmr.msra.gmra.mrb[12].mxu1 %vm3650_vm3, %v10321_v51  ;;  %7552 = vmatmul.mubr.msk.bf16.vlgmr.msra.gmra.mrb[40].mxu0 %vm3650_vm3, %v10321_v51 }
0x17b8   : > { %6294 = vmatpush1.bf16.msra.mxu1 %v7525_v54  ;;  %6337 = vmatpush1.bf16.msra.mxu0 %v7527_v18  ;;  %v5883_v54 = vunpack.c.l.bf16 %v5872_v23  ;;  %v5882_v18 = vunpack.c.h.bf16 %v5871_v34 }
0x17b9   : > { %6295 = vmatprep.subr.bf16.mxu1 %v7542_v50  ;;  %6338 = vmatprep.subr.bf16.mxu0 %v7544_v20 }
0x17ba   : > { %6325 = vmatprep.mubr.bf16.mxu1 %v8923_v41  ;;  %6368 = vmatprep.mubr.bf16.mxu0 %v8923_v41 }
0x17bc   : > { %6296 = vmatpush1.bf16.msra.mxu1 %v7541_v52  ;;  %6339 = vmatpush1.bf16.msra.mxu0 %v7543_v15  ;;  %v5873_v15 = vld [vmem:[%s9082_s16 + $0x220] sm:$0x11] }
0x17bd   : > { %6379 = vmatprep.subr.bf16.mxu1 %v7530_v13  ;;  %6422 = vmatprep.subr.bf16.mxu0 %v7532_v49 }
0x17bf   : > { %7553 = vmatmul.mubr.msk.bf16.vlgmr.msra.gmra.mrb[16].mxu1 %vm3650_vm3, %v10321_v51  ;;  %7554 = vmatmul.mubr.msk.bf16.vlgmr.msra.gmra.mrb[44].mxu0 %vm3650_vm3, %v10321_v51 }
0x17c0   : > { %6380 = vmatpush1.bf16.msra.mxu1 %v7529_v10  ;;  %6423 = vmatpush1.bf16.msra.mxu0 %v7531_v4 }
0x17c1   : > { %6381 = vmatprep.subr.bf16.mxu1 %v7546_v21  ;;  %6424 = vmatprep.subr.bf16.mxu0 %v7548_v22 }
0x17c2   : > { %6411 = vmatprep.mubr.bf16.mxu1 %v8923_v41  ;;  %6454 = vmatprep.mubr.bf16.mxu0 %v8923_v41  ;;  %v5847_v41 = vld [vmem:[%s9082_s16 + $0x150] sm:$0xff] }
0x17c3   : > { %v7562_v2 = vcombine.low %v5839_v53, %v5847_v41  ;;  %v7563_v35 = vcombine.high %v5839_v53, %v5847_v41 }
0x17c4   : > { %6382 = vmatpush1.bf16.msra.mxu1 %v7545_v37  ;;  %6425 = vmatpush1.bf16.msra.mxu0 %v7547_v12 }
0x17c5   : > { %6677 = vmatprep.subr.bf16.mxu0 %v7559_v28  ;;  %6759 = vmatprep.subr.bf16.mxu1 %v7563_v35  ;;  %v5885_v28 = vunpack.c.l.bf16 %v5873_v15 }
0x17c7   : > { %7555 = vmatmul.mubr.msk.bf16.vlgmr.msra.gmra.mrb[20].mxu1 %vm3650_vm3, %v10321_v51  ;;  %7556 = vmatmul.mubr.msk.bf16.vlgmr.msra.gmra.mrb[48].mxu0 %vm3650_vm3, %v10321_v51  ;;  %v5895_v51 = vshrl.u32 %v5894_v44, 7 }
0x17c9   : > { %v10391_v56 = vsub.s32 0, %v5895_v51 }
0x17cb   : > { %v5897_v3 = vrot.slane %v5877_v58, %v10391_v56  ;;  %v5905_v8 = vrot.slane %v5879_v31, %v10391_v56  ;;  %v5901_v29 = vrot.slane %v5878_v45, %v10391_v56  ;;  %v5909_v14 = vrot.slane %v5880_v5, %v10391_v56 }
0x17cc   : > { %v5913_v24 = vrot.slane %v5881_v59, %v10391_v56  ;;  %v5921_v22 = vrot.slane %v5883_v54, %v10391_v56  ;;  %v5917_v11 = vrot.slane %v5882_v18, %v10391_v56  ;;  %v5925_v12 = vrot.slane %v5884_v17, %v10391_v56 }
0x17cd   : > { %6678 = vmatpush1.bf16.xpose.msra.mxu0 %v7558_v43  ;;  %6760 = vmatpush1.bf16.xpose.msra.mxu1 %v7562_v2  ;;  %v5874_v43 = vld [vmem:[%s9082_s16 + $0x228] sm:$0x11]  ;;  %v5929_v54 = vrot.slane %v5885_v28, %v10391_v56 }
0x17ce   : > { %6679 = vmatprep.subr.bf16.mxu0 %v7575_v61  ;;  %6761 = vmatprep.subr.bf16.mxu1 %v7579_v32  ;;  %v5887_v32 = vunpack.c.l.bf16 %v5874_v43  ;;  %v5888_v58 = vunpack.c.h.bf16 %v5874_v43 }
0x17d5   : > { %6680 = vmatpush1.bf16.xpose.msra.mxu0 %v7574_v0  ;;  %6762 = vmatpush1.bf16.xpose.msra.mxu1 %v7578_v33 }
0x17d6   : > { %6718 = vmatprep.subr.bf16.mxu0 %v7561_v40  ;;  %6800 = vmatprep.subr.bf16.mxu1 %v7565_v27  ;;  %v10409_v40 = vld [vmem:[%s9082_s16 + $0x1c8] sm:$0xff]  ;;  %v5886_v27 = vunpack.c.h.bf16 %v5873_v15  ;;  %v5941_v15 = vrot.slane %v5888_v58, %v10391_v56 }
0x17d7   : > { %v7577_v23 = vcombine.high %v10406_v7, %v10409_v40 }
0x1882   : > { %v6155_v50 = vpop.f32.mrb[8].mxu1  ;;  %v6198_v20 = vpop.f32.mrb[36].mxu0 }
0x1883   : > { %v6156_v1 = vadd.f32 %v6155_v50, %v5897_v3  ;;  %v6199_v42 = vadd.f32 %v6198_v20, %v5905_v8  ;;  %v6157_v26 = vpop.f32.mrb[9].mxu1  ;;  %v6200_v52 = vpop.f32.mrb[37].mxu0 }
0x1884   : > { %v6158_v13 = vadd.f32 %v6157_v26, %v5901_v29  ;;  %v6201_v49 = vadd.f32 %v6200_v52, %v5909_v14  ;;  %v6159_v62 = vpop.f32.mrb[10].mxu1  ;;  %v6202_v47 = vpop.f32.mrb[38].mxu0 }
0x1885   : > { %v6160_v60 = vadd.f32 %v6159_v62, %v5897_v3  ;;  %v6203_v10 = vadd.f32 %v6202_v47, %v5905_v8  ;;  %v6161_v4 = vpop.f32.mrb[11].mxu1  ;;  %v6204_v21 = vpop.f32.mrb[39].mxu0  ;;  %v6465_v6 = vmax.f32 %v6156_v1, 0.0  ;;  %v6467_v30 = vmax.f32 %v6199_v42, 0.0  ;;  %v5875_v3 = vld [vmem:[%s9082_s16 + $0x230] sm:$0x11] }
0x1886   : > { %v6162_v63 = vadd.f32 %v6161_v4, %v5901_v29  ;;  %v6205_v37 = vadd.f32 %v6204_v21, %v5909_v14  ;;  %v6466_v41 = vmax.f32 %v6158_v13, 0.0  ;;  %v6468_v0 = vmax.f32 %v6201_v49, 0.0  ;;  %v5876_v49 = vld [vmem:[%s9082_s16 + $0x238] sm:$0x11] }
0x1887   : > { %v6481_v53 = vmax.f32 %v6160_v60, 0.0  ;;  %v6483_v61 = vmax.f32 %v6203_v10, 0.0  ;;  %v5937_v1 = vrot.slane %v5887_v32, %v10391_v56  ;;  %v5933_v42 = vrot.slane %v5886_v27, %v10391_v56 }
0x1888   : > { %v6482_v2 = vmax.f32 %v6162_v63, 0.0  ;;  %v6484_v35 = vmax.f32 %v6205_v37, 0.0  ;;  %v5889_v13 = vunpack.c.l.bf16 %v5875_v3  ;;  %v10428_v63 = vld [vmem:[%s9082_s16 + $0x1d8] sm:$0xff]  ;;  %v5890_v37 = vunpack.c.h.bf16 %v5875_v3 }
0x1889   : > { %v6497_v38 = vpack.c.bf16 %v6481_v53, %v6465_v6  ;;  %v10411_v33 = vpack.c.bf16 %v6483_v61, %v6467_v30  ;;  %v7576_v30 = vcombine.low %v10406_v7, %v10409_v40  ;;  %v5892_v53 = vunpack.c.h.bf16 %v5876_v49 }
0x188a   : > { %v6498_v44 = vpack.c.bf16 %v6482_v2, %v6466_v41  ;;  %v6500_v51 = vpack.c.bf16 %v6484_v35, %v6468_v0  ;;  %v6241_v57 = vpop.f32.mrb[12].mxu1  ;;  %v6284_v9 = vpop.f32.mrb[40].mxu0  ;;  %v5949_v40 = vrot.slane %v5890_v37, %v10391_v56 }
0x188b   : > { %v6242_v31 = vadd.f32 %v6241_v57, %v5913_v24  ;;  %v6285_v45 = vadd.f32 %v6284_v9, %v5921_v22  ;;  %v6243_v5 = vpop.f32.mrb[13].mxu1  ;;  %v6286_v34 = vpop.f32.mrb[41].mxu0 }
0x188c   : > { %v6244_v8 = vadd.f32 %v6243_v5, %v5917_v11  ;;  %v6287_v29 = vadd.f32 %v6286_v34, %v5925_v12  ;;  %v6245_v14 = vpop.f32.mrb[14].mxu1  ;;  %v6288_v59 = vpop.f32.mrb[42].mxu0  ;;  %6709 = vmatprep.mubr.bf16.mxu0 %v6498_v44  ;;  %v5957_v34 = vrot.slane %v5892_v53, %v10391_v56  ;;  %v5857_v53 = vld [vmem:[%s9082_s16 + $0x1a0] sm:$0xff] }
0x188d   : > { %v6246_v18 = vadd.f32 %v6245_v14, %v5913_v24  ;;  %v6289_v50 = vadd.f32 %v6288_v59, %v5921_v22  ;;  %v6247_v20 = vpop.f32.mrb[15].mxu1  ;;  %v6290_v17 = vpop.f32.mrb[43].mxu0  ;;  %6710 = vmatmul.mubr.bf16.vlgmr.msra.gmra.mrb[52].mxu0 %v6497_v38  ;;  %v6469_v62 = vmax.f32 %v6242_v31, 0.0  ;;  %v6471_v47 = vmax.f32 %v6285_v45, 0.0 }
0x188e   : > { %v6248_v26 = vadd.f32 %v6247_v20, %v5917_v11  ;;  %v6291_v52 = vadd.f32 %v6290_v17, %v5925_v12  ;;  %6719 = vmatpush1.bf16.xpose.msra.mxu0 %v7560_v19  ;;  %6750 = vmatprep.mubr.bf16.mxu0 %v6500_v51  ;;  %v6470_v10 = vmax.f32 %v6244_v8, 0.0  ;;  %v6472_v4 = vmax.f32 %v6287_v29, 0.0  ;;  %v10425_v11 = vld [vmem:[%s9082_s16 + $0x198] sm:$0xff]  ;;  %v5849_v20 = vld [vmem:[%s9082_s16 + $0x160] sm:$0xff] }
0x188f   : > { %v6485_v24 = vmax.f32 %v6246_v18, 0.0  ;;  %v6487_v60 = vmax.f32 %v6289_v50, 0.0  ;;  %6720 = vmatprep.subr.bf16.mxu0 %v7577_v23  ;;  %v5891_v19 = vunpack.c.l.bf16 %v5876_v49  ;;  %v7581_v35 = vcombine.high %v10425_v11, %v10428_v63  ;;  %v5841_v50 = vld [vmem:[%s9082_s16 + $0x120] sm:$0xff] }
0x1890   : > { %v6486_v21 = vmax.f32 %v6248_v26, 0.0  ;;  %v6488_v22 = vmax.f32 %v6291_v52, 0.0  ;;  %v5945_v51 = vrot.slane %v5889_v13, %v10391_v56  ;;  %v7567_v49 = vcombine.high %v5841_v50, %v5849_v20 }
0x1891   : > { %v6501_v16 = vpack.c.bf16 %v6485_v24, %v6469_v62  ;;  %v10430_v48 = vpack.c.bf16 %v6487_v60, %v6471_v47  ;;  %v5953_v7 = vrot.slane %v5891_v19, %v10391_v56  ;;  %v7580_v56 = vcombine.low %v10425_v11, %v10428_v63 }
0x1892   : > { %v6502_v12 = vpack.c.bf16 %v6486_v21, %v6470_v10  ;;  %v6504_v28 = vpack.c.bf16 %v6488_v22, %v6472_v4  ;;  %v6327_v43 = vpop.f32.mrb[16].mxu1  ;;  %v6370_v6 = vpop.f32.mrb[44].mxu0 }
0x1893   : > { %v6328_v61 = vadd.f32 %v6327_v43, %v5929_v54  ;;  %v6371_v41 = vadd.f32 %v6370_v6, %v5937_v1  ;;  %v6329_v0 = vpop.f32.mrb[17].mxu1  ;;  %v6372_v2 = vpop.f32.mrb[45].mxu0 }
0x1894   : > { %v6330_v38 = vadd.f32 %v6329_v0, %v5933_v42  ;;  %v6373_v32 = vadd.f32 %v6372_v2, %v5941_v15  ;;  %v6331_v27 = vpop.f32.mrb[18].mxu1  ;;  %v6374_v44 = vpop.f32.mrb[46].mxu0  ;;  %6791 = vmatprep.mubr.bf16.mxu1 %v6502_v12 }
0x1895   : > { %v6332_v57 = vadd.f32 %v6331_v27, %v5929_v54  ;;  %v6375_v9 = vadd.f32 %v6374_v44, %v5937_v1  ;;  %v6333_v58 = vpop.f32.mrb[19].mxu1  ;;  %v6376_v31 = vpop.f32.mrb[47].mxu0  ;;  %6792 = vmatmul.mubr.bf16.vlgmr.msra.gmra.mrb[24].mxu1 %v6501_v16  ;;  %v6473_v23 = vmax.f32 %v6328_v61, 0.0  ;;  %v6475_v3 = vmax.f32 %v6371_v41, 0.0  ;;  %v5865_v61 = vld [vmem:[%s9082_s16 + $0x1e0] sm:$0xff]  ;;  %v5850_v27 = vld [vmem:[%s9082_s16 + $0x168] sm:$0xff] }
0x1896   : > { %v6334_v45 = vadd.f32 %v6333_v58, %v5933_v42  ;;  %v6377_v5 = vadd.f32 %v6376_v31, %v5941_v15  ;;  %6721 = vmatpush1.bf16.xpose.msra.mxu0 %v7576_v30  ;;  %6801 = vmatpush1.bf16.xpose.msra.mxu1 %v7564_v39  ;;  %v6474_v14 = vmax.f32 %v6330_v38, 0.0  ;;  %v6476_v59 = vmax.f32 %v6373_v32, 0.0  ;;  %v5842_v32 = vld [vmem:[%s9082_s16 + $0x128] sm:$0xff] }
0x1897   : > { %v6489_v8 = vmax.f32 %v6332_v57, 0.0  ;;  %v6491_v29 = vmax.f32 %v6375_v9, 0.0  ;;  %6832 = vmatprep.mubr.bf16.mxu1 %v6504_v28  ;;  %6802 = vmatprep.subr.bf16.mxu1 %v7581_v35  ;;  %v7566_v35 = vcombine.low %v5841_v50, %v5849_v20  ;;  %v7583_v38 = vcombine.high %v5857_v53, %v5865_v61  ;;  %v5858_v57 = vld [vmem:[%s9082_s16 + $0x1a8] sm:$0xff] }
0x1898   : > { %v6490_v54 = vmax.f32 %v6334_v45, 0.0  ;;  %v6492_v18 = vmax.f32 %v6377_v5, 0.0  ;;  %v7582_v44 = vcombine.low %v5857_v53, %v5865_v61  ;;  %v5866_v9 = vld [vmem:[%s9082_s16 + $0x1e8] sm:$0xff]  ;;  %v7568_v58 = vcombine.low %v5842_v32, %v5850_v27  ;;  %v5859_v5 = vld [vmem:[%s9082_s16 + $0x1b0] sm:$0xff] }
0x1899   : > { %v6505_v17 = vpack.c.bf16 %v6489_v8, %v6473_v23  ;;  %v10445_v1 = vpack.c.bf16 %v6491_v29, %v6475_v3  ;;  %v7585_v31 = vcombine.high %v5858_v57, %v5866_v9  ;;  %v5844_v8 = vld [vmem:[%s9082_s16 + $0x138] sm:$0xff] }
0x189a   : > { %v6506_v42 = vpack.c.bf16 %v6490_v54, %v6474_v14  ;;  %v6508_v55 = vpack.c.bf16 %v6492_v18, %v6476_v59  ;;  %v6413_v25 = vpop.f32.mrb[20].mxu1  ;;  %v6456_v39 = vpop.f32.mrb[48].mxu0  ;;  %v5852_v29 = vld [vmem:[%s9082_s16 + $0x178] sm:$0xff] }
0x189b   : > { %v6414_v26 = vadd.f32 %v6413_v25, %v5945_v51  ;;  %v6457_v52 = vadd.f32 %v6456_v39, %v5953_v7  ;;  %v6415_v15 = vpop.f32.mrb[21].mxu1  ;;  %v6458_v13 = vpop.f32.mrb[49].mxu0  ;;  %v7573_v59 = vcombine.high %v5844_v8, %v5852_v29  ;;  %v5860_v54 = vld [vmem:[%s9082_s16 + $0x1b8] sm:$0xff]  ;;  %v7572_v50 = vcombine.low %v5844_v8, %v5852_v29  ;;  %v7557_v39 = vld [vmem:[%s9114_s28 + $0x15c] ss:$0 sm:$0xff] }
0x189c   : > { %v6416_v62 = vadd.f32 %v6415_v15, %v5949_v40  ;;  %v6459_v47 = vadd.f32 %v6458_v13, %v5957_v34  ;;  %v6417_v24 = vpop.f32.mrb[22].mxu1  ;;  %v6460_v60 = vpop.f32.mrb[50].mxu0  ;;  %v5868_v18 = vld [vmem:[%s9082_s16 + $0x1f8] sm:$0xff] }
0x189d   : > { %v6418_v10 = vadd.f32 %v6417_v24, %v5945_v51  ;;  %v6461_v4 = vadd.f32 %v6460_v60, %v5953_v7  ;;  %6751 = vmatmul.mubr.bf16.vlgmr.msra.gmra.mrb[52].mxu0 %v10411_v33  ;;  %v6419_v21 = vpop.f32.mrb[23].mxu1  ;;  %v6462_v22 = vpop.f32.mrb[51].mxu0  ;;  %v6477_v11 = vmax.f32 %v6414_v26, 0.0  ;;  %v6479_v63 = vmax.f32 %v6457_v52, 0.0  ;;  %v5851_v7 = vld [vmem:[%s9082_s16 + $0x170] sm:$0xff] }
0x189e   : > { %v6420_v16 = vadd.f32 %v6419_v21, %v5949_v40  ;;  %v6463_v19 = vadd.f32 %v6462_v22, %v5957_v34  ;;  %6803 = vmatpush1.bf16.xpose.msra.mxu1 %v7580_v56  ;;  %v6478_v28 = vmax.f32 %v6416_v62, 0.0  ;;  %v6480_v43 = vmax.f32 %v6459_v47, 0.0  ;;  %v5867_v34 = vld [vmem:[%s9082_s16 + $0x1f0] sm:$0xff] }
0x189f   : > { %v6493_v37 = vmax.f32 %v6418_v10, 0.0  ;;  %v6495_v12 = vmax.f32 %v6461_v4, 0.0  ;;  %6841 = vmatprep.subr.bf16.mxu1 %v7567_v49  ;;  %v7569_v51 = vcombine.high %v5842_v32, %v5850_v27  ;;  %v7584_v40 = vcombine.low %v5858_v57, %v5866_v9 }
0x18a0   : > { %v6494_v6 = vmax.f32 %v6420_v16, 0.0  ;;  %v6496_v30 = vmax.f32 %v6463_v19, 0.0  ;;  %v7587_v3 = vcombine.high %v5859_v5, %v5867_v34  ;;  %v7586_v14 = vcombine.low %v5859_v5, %v5867_v34 }
0x18a1   : > { %v6509_v33 = vpack.c.bf16 %v6493_v37, %v6477_v11  ;;  %v6511_v41 = vpack.c.bf16 %v6495_v12, %v6479_v63  ;;  %v7589_v20 = vcombine.high %v5860_v54, %v5868_v18 }
0x18a2   : > { %v6510_v0 = vpack.c.bf16 %v6494_v6, %v6478_v28  ;;  %v6512_v2 = vpack.c.bf16 %v6496_v30, %v6480_v43 }
0x18a5   : > { %6833 = vmatmul.mubr.bf16.vlgmr.msra.gmra.mrb[24].mxu1 %v10430_v48  ;;  %v5843_v48 = vld [vmem:[%s9082_s16 + $0x130] sm:$0xff] }
0x18a6   : > { %6842 = vmatpush1.bf16.xpose.msra.mxu1 %v7566_v35  ;;  %6873 = vmatprep.mubr.bf16.mxu1 %v6506_v42  ;;  %v7571_v45 = vcombine.high %v5843_v48, %v5851_v7  ;;  %v7570_v23 = vcombine.low %v5843_v48, %v5851_v7  ;;  %v7591_v35 = vld [vmem:[%s9114_s28 + $0x15e] ss:$0 sm:$0xff] }
0x18a7   : > { %6843 = vmatprep.subr.bf16.mxu1 %v7583_v38 }
0x18ae   : > { %6844 = vmatpush1.bf16.xpose.msra.mxu1 %v7582_v44 }
0x18af   : > { %6882 = vmatprep.subr.bf16.mxu1 %v7569_v51 }
0x18b5   : > { %6874 = vmatmul.mubr.bf16.vlgmr.msra.gmra.mrb[24].mxu1 %v6505_v17  ;;  %v7588_v17 = vcombine.low %v5860_v54, %v5868_v18 }
0x18b6   : > { %6883 = vmatpush1.bf16.xpose.msra.mxu1 %v7568_v58  ;;  %6914 = vmatprep.mubr.bf16.mxu1 %v6508_v55 }
0x18b7   : > { %6884 = vmatprep.subr.bf16.mxu1 %v7585_v31 }
0x18be   : > { %6885 = vmatpush1.bf16.xpose.msra.mxu1 %v7584_v40 }
0x18bf   : > { %6923 = vmatprep.subr.bf16.mxu1 %v7571_v45 }
0x18c5   : > { %6915 = vmatmul.mubr.bf16.vlgmr.msra.gmra.mrb[24].mxu1 %v10445_v1 }
0x18c6   : > { %6924 = vmatpush1.bf16.xpose.msra.mxu1 %v7570_v23  ;;  %6955 = vmatprep.mubr.bf16.mxu1 %v6510_v0 }
0x18c7   : > { %6925 = vmatprep.subr.bf16.mxu1 %v7587_v3 }
0x18ce   : > { %6926 = vmatpush1.bf16.xpose.msra.mxu1 %v7586_v14 }
0x18cf   : > { %6964 = vmatprep.subr.bf16.mxu1 %v7573_v59 }
0x18d5   : > { %6956 = vmatmul.mubr.bf16.vlgmr.msra.gmra.mrb[24].mxu1 %v6509_v33 }
0x18d6   : > { %6965 = vmatpush1.bf16.xpose.msra.mxu1 %v7572_v50  ;;  %6996 = vmatprep.mubr.bf16.mxu1 %v6512_v2 }
0x18d7   : > { %6966 = vmatprep.subr.bf16.mxu1 %v7589_v20 }
0x18de   : > { %6967 = vmatpush1.bf16.xpose.msra.mxu1 %v7588_v17 }
0x18e5   : > { %6997 = vmatmul.mubr.bf16.vlgmr.msra.gmra.mrb[24].mxu1 %v6511_v41  ;;  %v7590_v41 = vld [vmem:[%s9114_s28 + $0x15d] ss:$0 sm:$0xff] }
0x1970   : > { %v6752_v1 = vpop.f32.mrb[52].mxu0 }
0x1971   : > { %v6754_v42 = vpop.f32.mrb[53].mxu0  ;;  %v8565_v56 = vadd.f32 %v7557_v39, %v6752_v1 }
0x1972   : > { %v6755_v55 = vpop.f32.mrb[54].mxu0 }
0x1973   : > { %v6757_v25 = vpop.f32.mrb[55].mxu0  ;;  %v8567_v52 = vadd.f32 %v7557_v39, %v6755_v55 }
0x19b8   : > { %v6998_v26 = vpop.f32.mrb[24].mxu1 }
0x19b9   : > { %v8566_v15 = vadd.f32 %v8565_v56, %v6998_v26  ;;  %v7000_v13 = vpop.f32.mrb[25].mxu1 }
0x19ba   : > { %v7001_v49 = vpop.f32.mrb[26].mxu1 }
0x19bb   : > { %v8568_v62 = vadd.f32 %v8567_v52, %v7001_v49  ;;  %v7003_v47 = vpop.f32.mrb[27].mxu1  ;;  %v7007_v24 = vsel %vm3650_vm3, %v8566_v15, 0.0 }
0x19bc   : > { %7008 = vadd.xlane.f32.xlu0 %v7007_v24 }
0x19bd   : > { %v7010_v60 = vsel %vm3650_vm3, %v8568_v62, 0.0 }
0x19be   : > { %7011 = vadd.xlane.f32.xlu1 %v7010_v60 }
0x1a49   : > { %v7009_v10 = vpop.xlane.xlu0 %7008 }
0x1a4a   : > { %v7013_v4 = vmul.f32 0.03125, %v7009_v10 }
0x1a4b   : > { %v7012_v21 = vpop.xlane.xlu1 %7011 }
0x1a4c   : > { %v7015_v22 = vsub.f32 %v8566_v15, %v7013_v4  ;;  %v7014_v16 = vmul.f32 0.03125, %v7012_v21 }
0x1a4e   : > { %v7016_v19 = vsub.f32 %v8568_v62, %v7014_v16  ;;  %v7017_v11 = vmul.f32 %v7015_v22, %v7015_v22 }
0x1a50   : > { %v7019_v63 = vsel %vm3650_vm3, %v7017_v11, 0.0  ;;  %v7018_v37 = vmul.f32 %v7016_v19, %v7016_v19 }
0x1a51   : > { %7020 = vadd.xlane.f32.xlu0 %v7019_v63 }
0x1a52   : > { %v7022_v12 = vsel %vm3650_vm3, %v7018_v37, 0.0 }
0x1a53   : > { %7023 = vadd.xlane.f32.xlu1 %v7022_v12 }
0x1ade   : > { %v7021_v28 = vpop.xlane.xlu0 %7020 }
0x1adf   : > { %v7025_v43 = vmul.f32 0.03125, %v7021_v28 }
0x1ae0   : > { %v7024_v6 = vpop.xlane.xlu1 %7023 }
0x1ae1   : > { %v7027_v30 = vadd.f32 1e-05, %v7025_v43  ;;  %v7026_v53 = vmul.f32 0.03125, %v7024_v6 }
0x1ae3   : > { %8819 = vrsqrt.f32 %v7027_v30  ;;  %v7028_v61 = vadd.f32 1e-05, %v7026_v53 }
0x1ae5   : > { %8821 = vrsqrt.f32 %v7028_v61 }
0x1aed   : > { %v8820_v33 = vpop.eup %8819 }
0x1aee   : > { %v7031_v0 = vmul.f32 %v8820_v33, %v7015_v22 }
0x1aef   : > { %v8822_v2 = vpop.eup %8821 }
0x1af0   : > { %v7037_v38 = vmul.f32 %v7590_v41, %v7031_v0  ;;  %v7032_v32 = vmul.f32 %v8822_v2, %v7016_v19 }
0x1af2   : > { %v7043_v27 = vadd.f32 %v7591_v35, %v7037_v38  ;;  %v7038_v44 = vmul.f32 %v7590_v41, %v7032_v32 }
0x1af4   : > { %v7045_v51 = vadd.f32 %v7043_v27, %v10317_v46  ;;  %v7044_v57 = vadd.f32 %v7591_v35, %v7038_v44 }
0x1af6   : > { %7047 = vst.msk [vmem:[#allocation3] sm:$0xff] %vm3650_vm3, %v7045_v51  ;;  %v7046_v9 = vadd.f32 %v7044_v57, %v10311_v36 }
0x1af8   : > { %7048 = vst.msk [vmem:[#allocation3 + $0x8] sm:$0xff] %vm3650_vm3, %v7046_v9 }
0x1af9 PF: > { %p7592_p12 = scmp.ne.s32.totalorder %s9016_s29, 11 }
0x1afa   : > { %s10561_s28 = sld [smem:[#allocation14_spill]] (!%p7592_p12)  ;;  %vm7059_vm7 = vcmask (!%p7592_p12), 261120   ;;  %vm7141_vm8 = vcmask (!%p7592_p12), 130048  }
0x1afb   : > { %7052 = sbr.rel (%p7592_p12) target bundleno = 7138 (0x1be2), region = 92 }
0x1afd   : > { %v7053_v7 = vld [vmem:[#allocation3] sm:$0xff] (!%p7592_p12) }
0x1afe   : > { %8242 = vmatprep.mubr.msk.f32.mxu0 (!%p7592_p12), %vm7059_vm7, %v7053_v7 }
0x1aff   : > { %v7054_v45 = vld [vmem:[#allocation3 + $0x8] sm:$0xff] (!%p7592_p12) }
0x1b00   : > { %s10562_s30 = smov (!%p7592_p12), %s10561_s28  ;;  %v7055_v58 = vld [vmem:[%s10561_s28] sm:$0xff] (!%p7592_p12) }
0x1b01   : > { %v7056_v31 = vld [vmem:[%s10562_s30 + $0x8] sm:$0xff] (!%p7592_p12)  ;;  %v7057_v46 = vld [vmem:[%s10562_s30 + $0x10] sm:$0xff] (!%p7592_p12)  ;;  %v7058_v48 = vld [vmem:[%s10562_s30 + $0x18] sm:$0xff] (!%p7592_p12) }
0x1b02   : > { %v8485_v36 = vpack.c.bf16 %v7056_v31, %v7055_v58  ;;  %v8489_v40 = vpack.c.bf16 %v7058_v48, %v7057_v46 }
0x1b04   : > { %8486 = vmatprep.subr.bf16.mxu0 %v8485_v36 }
0x1b05   : > { %8488 = vmatpush3.bf16.msra.mxu0 %v8485_v36 }
0x1b06   : > { %8490 = vmatprep.subr.bf16.mxu0 %v8489_v40 }
0x1b09   : > { %8492 = vmatpush3.bf16.msra.mxu0 %v8489_v40 }
0x1b0c   : > { %8243 = vmatmul.mubr.msk.f32.vlgmr.msra.gmra.mrb[0].mxu0 %vm7059_vm7, %v7054_v45 }
0x1bdf   : > { %v8244_v5 = vpop.f32.mrb[0].mxu0 }
0x1be0   : > { %7143 = vst.msk [vmem:[#allocation7 + $0x8] sm:$0xff] %vm7141_vm8, %v8244_v5  ;;  %v7132_v34 = vpop.f32.mrb[1].mxu0 }
0x1be1   : > { %7142 = vst.msk [vmem:[#allocation7] sm:$0xff] %vm7141_vm8, %v7132_v34 }
0x1be2 PF: > { %p8622_p0 = scmp.eq.s32.totalorder %s9016_s29, 11  ;;  %s8924_s20 = smov [#allocation7]  }
0x1be3   : > { %s7150_s14 = sshll.u32 %s8924_s20, 4  ;;  %s7151_s14 = int_to_ptr.vmem [resolvable:$true] %s7150_s14 }
0x1be4   : > { %s8853_s15 = scalar_lea.vmem %s7151_s14, 256  ;;  %p8860_p13 = scmp.lt.s32.totalorder %s7151_s14, %s7151_s14 }
0x1be5   : > { %p8854_p2 = scmp.ne.s32.totalorder %s7151_s14, %s8853_s15  ;;  %p8861_p1 = scmp.lt.s32.totalorder %s8853_s15, %s8853_s15 }
0x1be7   : > { %p8855_p3 = pnand %p8854_p2, %p8622_p0  ;;  %p8862_p5 = por %p8861_p1, %p8860_p13 }
0x1be9   : > { %p8856_p4 = pneg %p8855_p3 }
0x1beb   : > { %p8863_p10 = pnand %p8862_p5, %p8856_p4 }
0x1bed   : > { %8866 = shalt.err (!%p8863_p10)
}
0x1bee   : > { %s10563_s17 = sld [smem:[#allocation16_spill]] }
0x1bf4   : > { %s8867_s19 = scalar_lea.hbm %s10563_s17, 256 }
0x1bf5   : > { %p8868_p11 = scmp.ne.s32.totalorder %s10563_s17, %s8867_s19  ;;  %p8873_p7 = scmp.lt.u32.totalorder %s8867_s19, %s10563_s17 }
0x1bf7   : > { %p8869_p6 = pnand %p8868_p11, %p8622_p0 }
0x1bf9   : > { %p8870_p8 = pneg %p8869_p6 }
0x1bfb   : > { %p8875_p9 = pnand %p8873_p7, %p8870_p8 }
0x1bfd   : > { %8878 = shalt.err (!%p8875_p9)
}
0x1bfe   : > { %s8925_s28 = smov 128   ;;  %s8926_s6 = smov 8  }
0x1bff   : > { %8614 = dma.vmem_to_hbm [thread:$0]  (%p8622_p0), %s7151_s14, 256, %s10563_s17, [#allocation6], %s8925_s28, %s8925_s28, %s8926_s6  }
0x1c00   : > { %8900 = dma.done.wait (%p8622_p0), [#allocation6], 256  }
0x1c01   : > { %8902 = vsyncadd (%p8622_p0), [#allocation6], 4294967040 }
0x1c02 PF: > { %s10564_s28 = sld [smem:[#allocation12_spill]]  ;;  %s10565_s25 = sld [smem:[#allocation10_spill]] }
0x1c03   : > { %s10566_s26 = sld [smem:[#allocation11_spill]]  ;;  %s10567_s27 = sld [smem:[#allocation13_spill]] }
0x1c08   : > { %p24_p12 = scmp.ge.s32.totalorder %s10564_s28, 14  }
0x1c0a   :  { %26 = sbr.rel (!%p24_p12) target bundleno = 8 (0x8), region = 140 }
0x1c11   :  { %7166 = vsyncpa [#allocation5], 1 }
0x1c12   :  { %7168 = vsyncpa [#allocation5 + $0x1], 1 }
0x1c13   :  { %7169 = vsyncpa [#allocation6], 1 }
0x1c14   :  { %7171 = vsyncpa [#allocation6 + $0x1], 1 }

</bundles_post_ra>
